<compile_context>
chip_gen: v7x
topology: tpu7x:2x2x1
jax: 0.10.0
libtpu: 0.0.40
codegen_flags: <defaults>
</compile_context>

<pallas_src>
import math
import functools

import numpy as np
import jax
import jax.numpy as jnp
from jax.experimental import pallas as pl
from jax.experimental.pallas import tpu as pltpu
from jax.scipy.special import erf as _erf_ref

_SQRT1_2 = 0.7071067811865476


# ----------------------------------------------------------------------------
# In-kernel helpers
# ----------------------------------------------------------------------------
def _gelu(x):
    # torch.nn.GELU() (approximate='none'): 0.5*x*(1+erf(x/sqrt(2))).
    # erf via Abramowitz & Stegun 7.1.26; exp and the reciprocal go to the EUP slot.
    z = x * _SQRT1_2
    a = jnp.abs(z)
    t = pl.reciprocal(1.0 + 0.3275911 * a, approx=True)
    poly = t * (0.254829592 + t * (-0.284496736 + t * (1.421413741
               + t * (-1.453152027 + t * 1.061405429))))
    erf_abs = 1.0 - poly * jnp.exp(-a * a)
    erf = jnp.where(z >= 0.0, erf_abs, -erf_abs)
    return 0.5 * x * (1.0 + erf)


def _res_block_kernel(cmask_ref, g1_ref, b1_ref, w1_ref, g2_ref, b2_ref, w2_ref,
                      x_ref, o_ref, xpad_ref, pad_ref, slab_ref, *, H, W, C, Cp, top):
    """ResidualBlock: (BaseConvBlock o BaseConvBlock)(x) + x, all / sqrt(2).

    One batch sample, spatially flattened channels-last.  In-kernel arrays are
    lane-dense (HW, Cp) with Cp = ceil(C/128)*128; HBM I/O carries only C channels.
    """
    HW = H * W
    pad_rows = 2 * top + HW

    # ---- lane-pad the input inside the kernel (HBM only ever carries C channels) ----
    if Cp != C:
        xpad_ref[...] = jnp.zeros((HW, Cp), jnp.float32)
        xpad_ref[:, 0:C] = x_ref[0]
        x = xpad_ref[...]
        lane_mask = (jax.lax.broadcasted_iota(jnp.int32, (1, Cp), 1) < C
                     ).astype(jnp.float32)                 # (1, Cp): 1 on real lanes
    else:
        x = x_ref[0]
        lane_mask = None

    # ---- zero the halo rows every invocation (megacore-safe; interior rewritten) ----
    zeros_halo = jnp.zeros((top, Cp), jnp.float32)
    pad_ref[0:top, :] = zeros_halo
    pad_ref[top + HW:pad_rows, :] = zeros_halo

    # Compact (HW, 1) column-validity masks; broadcast implicitly inside the multiply
    # (never materialized at (HW, Cp)).
    mask_l = cmask_ref[:, 0:1]       # valid when j > 0      (dx = -1)
    mask_r = cmask_ref[:, 1:2]       # valid when j < W - 1  (dx = +1)

    inv_cnt = np.float32(1.0 / (HW * C))
    inv_sqrt2 = np.float32(1.0 / math.sqrt(2.0))

    def base_conv_block(h, g_ref, b_ref, w_ref):
        # GroupNorm(num_groups=1, C): two-pass stats (mean, then centered variance) for
        # numerical robustness.  h has exact zeros in padded lanes; the lane mask keeps
        # the centered values zero there too, so dividing by HW*C is exact.
        mu = jnp.sum(h) * inv_cnt
        mu_vec = mu if lane_mask is None else mu * lane_mask
        d = h - mu_vec
        var = jnp.sum(d * d) * inv_cnt
        scale = jax.lax.rsqrt(var + 1e-5) * g_ref[...]       # folded affine (1, Cp)
        hg = _gelu(d * scale + b_ref[...])                   # padded lanes stay 0

        # Stage into the row-zero-padded scratch: dy shifts become plain sublane slices
        # that read zeros above/below the image (no roll, no row masks).
        pad_ref[top:top + HW, :] = hg

        # 3x3 conv as 3 dy-grouped (HW, 3*Cp) x (3*Cp, Cp) MXU matmuls, f32 accumulation.
        # Column wrap-around of the flattened dx shifts is zeroed by mask_l / mask_r.
        acc = None
        for g, dy in enumerate((-1, 0, 1)):
            base = top + dy * W
            for t, dx in enumerate((-1, 0, 1)):
                if dy == 0 and dx == 0:
                    patch = hg
                else:
                    patch = pad_ref[base + dx:base + dx + HW, :]
                if dx == -1:
                    patch = patch * mask_l
                elif dx == 1:
                    patch = patch * mask_r
                slab_ref[:, t * Cp:(t + 1) * Cp] = patch.astype(jnp.bfloat16)
            part = jnp.dot(slab_ref[...], w_ref[g], preferred_element_type=jnp.float32)
            acc = part if acc is None else acc + part
        return acc

    h = base_conv_block(x, g1_ref, b1_ref, w1_ref)
    h = base_conv_block(h, g2_ref, b2_ref, w2_ref)

    # Residual add in f32 against the un-padded input; emit only the C real lanes.
    if Cp != C:
        o_ref[0] = ((h[:, 0:C] + x_ref[0]) * inv_sqrt2).astype(o_ref.dtype)
    else:
        o_ref[0] = ((h + x) * inv_sqrt2).astype(o_ref.dtype)


# ----------------------------------------------------------------------------
# Wrapper: ResidualBlock via pallas_call (NHWC in / NHWC out, C channels in HBM)
# ----------------------------------------------------------------------------
def residual_block_pallas(x_nhwc, params):
    N, H, W, C = x_nhwc.shape
    HW = H * W
    Cp = ((C + 127) // 128) * 128            # lane-dense channel width inside the kernel
    assert W % 8 == 0, "LL width must be a multiple of 8 (sublane-aligned dy taps)"
    top = ((W + 1 + 7) // 8) * 8             # 8-aligned halo rows above/below the image
    pad_rows = 2 * top + HW

    x = x_nhwc.reshape(N, HW, C).astype(jnp.float32)

    # Compact channel-invariant column masks: [:,0] ok for dx=-1 (j>0), [:,1] for dx=+1.
    j = np.arange(HW, dtype=np.int64) % W
    cmask = jnp.asarray(np.stack([j > 0, j < W - 1], axis=1).astype(np.float32))  # (HW,2)

    def prep_w(w):                            # (Cout, Cin, 3, 3) -> (3, 3*Cp, Cp) bf16
        w = jnp.transpose(w, (2, 3, 1, 0))                       # (ky, kx, Cin, Cout)
        w = jnp.pad(w, ((0, 0), (0, 0), (0, Cp - C), (0, Cp - C)))
        return w.reshape(3, 3 * Cp, Cp).astype(jnp.bfloat16)     # dy-grouped K layout

    def prep_v(v):                            # (C,) -> (1, Cp) f32 (zero-padded lanes)
        return jnp.pad(v.astype(jnp.float32), (0, Cp - C)).reshape(1, Cp)

    w1, w2 = prep_w(params["w1"]), prep_w(params["w2"])
    g1, b1 = prep_v(params["g1"]), prep_v(params["b1"])
    g2, b2 = prep_v(params["g2"]), prep_v(params["b2"])

    # ---- VMEM budget: scratch + double-buffered I/O + constant operands (+ headroom),
    #      capped below the physical per-core VMEM (64 MiB on v7x, 128 MiB on v5e/v6e).
    xpad_shape = (HW, Cp) if Cp != C else (8, 128)
    scratch_b = (xpad_shape[0] * xpad_shape[1] * 4          # xpad f32
                 + pad_rows * Cp * 4                        # row-padded activations f32
                 + HW * 3 * Cp * 2)                         # dy-group slab bf16
    io_b = 2 * 2 * HW * C * 4                               # x + out blocks, double-buf
    const_b = 2 * (HW * 2 * 4 + 4 * Cp * 4 + 2 * 3 * (3 * Cp) * Cp * 2)
    need = scratch_b + io_b + const_b
    try:
        cap = int(pltpu.get_tpu_info().vmem_capacity_bytes) * 7 // 8
    except Exception:
        cap = 56 * 1024 * 1024                              # safe on every generation
    vmem_limit = int(min(cap, max(need * 5 // 4 + (4 << 20), 16 << 20)))

    kernel = functools.partial(_res_block_kernel, H=H, W=W, C=C, Cp=Cp, top=top)
    out = pl.pallas_call(
        kernel,
        out_shape=jax.ShapeDtypeStruct((N, HW, C), jnp.float32),
        grid_spec=pltpu.PrefetchScalarGridSpec(
            num_scalar_prefetch=0,
            grid=(N,),
            in_specs=[
                # grid-invariant operands: constant index_map -> fetched once; all small.
                pl.BlockSpec((HW, 2), lambda n: (0, 0)),              # column masks
                pl.BlockSpec((1, Cp), lambda n: (0, 0)),              # gamma1
                pl.BlockSpec((1, Cp), lambda n: (0, 0)),              # beta1
                pl.BlockSpec((3, 3 * Cp, Cp), lambda n: (0, 0, 0)),   # w1 (dy-grouped)
                pl.BlockSpec((1, Cp), lambda n: (0, 0)),              # gamma2
                pl.BlockSpec((1, Cp), lambda n: (0, 0)),              # beta2
                pl.BlockSpec((3, 3 * Cp, Cp), lambda n: (0, 0, 0)),   # w2 (dy-grouped)
                pl.BlockSpec((1, HW, C), lambda n: (n, 0, 0)),        # x, per sample
            ],
            out_specs=pl.BlockSpec((1, HW, C), lambda n: (n, 0, 0)),
            scratch_shapes=[
                pltpu.VMEM(xpad_shape, jnp.float32),                  # lane-padded input
                pltpu.VMEM((pad_rows, Cp), jnp.float32),              # row-padded acts
                pltpu.VMEM((HW, 3 * Cp), jnp.bfloat16),               # dy-group slab
            ],
        ),
        compiler_params=pltpu.CompilerParams(
            dimension_semantics=("parallel",),
            vmem_limit_bytes=vmem_limit,
        ),
    )(cmask, g1, b1, w1, g2, b2, w2, x)

    return out.reshape(N, H, W, C)


# ----------------------------------------------------------------------------
# WaveBottleNeckBlock forward: Haar DWT / IDWT glue in NCHW (scalings folded,
# only the quarter-size LL band is transposed for the channels-last kernel).
# ----------------------------------------------------------------------------
def wave_bottleneck_forward(x_nchw, params):
    N, C, H, W = x_nchw.shape
    assert H % 2 == 0 and W % 2 == 0, "haar + 'symmetric' handled only for even H, W"
    x = x_nchw.astype(jnp.float32)
    a = x[:, :, 0::2, 0::2]
    b = x[:, :, 0::2, 1::2]
    c = x[:, :, 1::2, 0::2]
    d = x[:, :, 1::2, 1::2]

    # DWTForward(J=1,'haar'): ll = (a+b+c+d)/2, details pass through unchanged.
    # The module computes res(ll/2)*2 and the IDWT multiplies every band by 0.5, so all
    # scalings fold into a single 0.25 per band here and cancel afterwards.
    r_in = (a + b + c + d) * 0.25        # = ll / 2
    e1 = (a - b + c - d) * 0.25          # = d1 / 2
    e2 = (a + b - c - d) * 0.25          # = d2 / 2
    e3 = (a - b - c + d) * 0.25          # = d3 / 2

    # Only the LL band goes through the Pallas resblock (quarter-size transposes only).
    r = residual_block_pallas(jnp.transpose(r_in, (0, 2, 3, 1)), params)   # NHWC
    r = jnp.transpose(r, (0, 3, 1, 2))                                     # NCHW

    y00 = r + e1 + e2 + e3               # == (ll_new + d1 + d2 + d3) / 2, etc.
    y01 = r - e1 + e2 - e3
    y10 = r + e1 - e2 - e3
    y11 = r - e1 - e2 + e3
    y = jnp.stack([jnp.stack([y00, y01], axis=-1),
                   jnp.stack([y10, y11], axis=-1)], axis=3)     # (N, C, H/2, 2, W/2, 2)
    return y.reshape(N, C, H, W)


# ----------------------------------------------------------------------------
# Pure-JAX reference (independent path: NCHW, lax conv, unfused DWT/IDWT)
# ----------------------------------------------------------------------------
def _groupnorm_ref(x, g, b):
    mu = jnp.mean(x, axis=(1, 2, 3), keepdims=True)
    var = jnp.mean((x - mu) ** 2, axis=(1, 2, 3), keepdims=True)
    return (x - mu) / jnp.sqrt(var + 1e-5) * g[None, :, None, None] + b[None, :, None, None]


def _gelu_ref(x):
    return 0.5 * x * (1.0 + _erf_ref(x * _SQRT1_2))


def _conv3x3_ref(x, w):
    return jax.lax.conv_general_dilated(
        x, w, window_strides=(1, 1), padding=((1, 1), (1, 1)),
        dimension_numbers=("NCHW", "OIHW", "NCHW"))


def _residual_block_ref(x, p):
    h = _conv3x3_ref(_gelu_ref(_groupnorm_ref(x, p["g1"], p["b1"])), p["w1"])
    h = _conv3x3_ref(_gelu_ref(_groupnorm_ref(h, p["g2"], p["b2"])), p["w2"])
    return (h + x) / math.sqrt(2.0)


def _wave_forward_ref(x, params):
    a = x[:, :, 0::2, 0::2]
    b = x[:, :, 0::2, 1::2]
    c = x[:, :, 1::2, 0::2]
    d = x[:, :, 1::2, 1::2]
    ll = (a + b + c + d) * 0.5
    d1 = (a - b + c - d) * 0.5
    d2 = (a + b - c - d) * 0.5
    d3 = (a - b - c + d) * 0.5
    ll_new = _residual_block_ref(ll * 0.5, params) * 2.0
    y00 = (ll_new + d1 + d2 + d3) * 0.5
    y01 = (ll_new - d1 + d2 - d3) * 0.5
    y10 = (ll_new + d1 - d2 - d3) * 0.5
    y11 = (ll_new - d1 - d2 + d3) * 0.5
    N, C, Hh, Wh = ll.shape
    y = jnp.zeros((N, C, 2 * Hh, 2 * Wh), jnp.float32)
    y = y.at[:, :, 0::2, 0::2].set(y00)
    y = y.at[:, :, 0::2, 1::2].set(y01)
    y = y.at[:, :, 1::2, 0::2].set(y10)
    y = y.at[:, :, 1::2, 1::2].set(y11)
    return y


# ----------------------------------------------------------------------------
if __name__ == "__main__":
    N, C, H, W = 2, 4, 16, 16
    key = jax.random.PRNGKey(0)
    kx, kw1, kw2, kg1, kb1, kg2, kb2 = jax.random.split(key, 7)
    x = jax.random.normal(kx, (N, C, H, W), dtype=jnp.float32)
    params = {
        "w1": 0.2 * jax.random.normal(kw1, (C, C, 3, 3), dtype=jnp.float32),
        "w2": 0.2 * jax.random.normal(kw2, (C, C, 3, 3), dtype=jnp.float32),
        "g1": 1.0 + 0.1 * jax.random.normal(kg1, (C,), dtype=jnp.float32),
        "b1": 0.1 * jax.random.normal(kb1, (C,), dtype=jnp.float32),
        "g2": 1.0 + 0.1 * jax.random.normal(kg2, (C,), dtype=jnp.float32),
        "b2": 0.1 * jax.random.normal(kb2, (C,), dtype=jnp.float32),
    }

    y = jax.jit(wave_bottleneck_forward)(x, params)
    jax.block_until_ready(y)
    assert y.shape == x.shape and y.dtype == jnp.float32

    # Error budget: bf16 MXU operands (f32 accumulation) plus the EUP approximate
    # reciprocal inside the GELU erf polynomial; GN stats, GELU core and the residual
    # add stay in f32, so expected max abs error at these scales is ~1e-2.
    y_ref = _wave_forward_ref(x, params)
    np.testing.assert_allclose(np.asarray(y), np.asarray(y_ref), rtol=2.5e-2, atol=2.5e-2)

    print("KERNEL_OK")
</pallas_src>

<mosaic_0001>
module attributes {stable_mosaic.version = 11 : i64} {
  func.func @_res_block_kernel(%arg0: i32, %arg1: memref<64x2xf32, #tpu.memory_space<vmem>>, %arg2: memref<1x128xf32, #tpu.memory_space<vmem>>, %arg3: memref<1x128xf32, #tpu.memory_space<vmem>>, %arg4: memref<3x384x128xbf16, #tpu.memory_space<vmem>>, %arg5: memref<1x128xf32, #tpu.memory_space<vmem>>, %arg6: memref<1x128xf32, #tpu.memory_space<vmem>>, %arg7: memref<3x384x128xbf16, #tpu.memory_space<vmem>>, %arg8: memref<1x64x4xf32, #tpu.memory_space<vmem>>, %arg9: memref<1x64x4xf32, #tpu.memory_space<vmem>>, %arg10: memref<64x128xf32, #tpu.memory_space<vmem>>, %arg11: memref<96x128xf32, #tpu.memory_space<vmem>>, %arg12: memref<64x384xbf16, #tpu.memory_space<vmem>>) attributes {dimension_semantics = [#tpu.dimension_semantics<parallel>], iteration_bounds = array<i64: 2>, scalar_prefetch = 0 : i64, scratch_operands = 3 : i64, tpu.core_type = #tpu.core_type<tc>, window_params = [{pipeline_mode = #tpu.pipeline_mode<synchronous>, transform_indices = @transform_0, window_bounds = array<i64: 64, 2>}, {pipeline_mode = #tpu.pipeline_mode<synchronous>, transform_indices = @transform_1, window_bounds = array<i64: 1, 128>}, {pipeline_mode = #tpu.pipeline_mode<synchronous>, transform_indices = @transform_2, window_bounds = array<i64: 1, 128>}, {pipeline_mode = #tpu.pipeline_mode<synchronous>, transform_indices = @transform_3, window_bounds = array<i64: 3, 384, 128>}, {pipeline_mode = #tpu.pipeline_mode<synchronous>, transform_indices = @transform_4, window_bounds = array<i64: 1, 128>}, {pipeline_mode = #tpu.pipeline_mode<synchronous>, transform_indices = @transform_5, window_bounds = array<i64: 1, 128>}, {pipeline_mode = #tpu.pipeline_mode<synchronous>, transform_indices = @transform_6, window_bounds = array<i64: 3, 384, 128>}, {transform_indices = @transform_7, window_bounds = array<i64: 1, 64, 4>}, {transform_indices = @transform_8, window_bounds = array<i64: 1, 64, 4>}]} {
    %cst = arith.constant 0.000000e+00 : f32
    %0 = vector.broadcast %cst : f32 to vector<64x128xf32>
    %c0 = arith.constant 0 : index
    %c0_0 = arith.constant 0 : index
    %1 = vector.load %arg10[%c0, %c0_0] : memref<64x128xf32, #tpu.memory_space<vmem>>, vector<64x128xf32>
    tpu.vector_store %arg10[%c0, %c0_0], %0 {strides = array<i32>} : memref<64x128xf32, #tpu.memory_space<vmem>>, vector<64x128xf32>,
    %c0_1 = arith.constant 0 : index
    %c0_2 = arith.constant 0 : index
    %c0_3 = arith.constant 0 : index
    %2 = vector.load %arg8[%c0_1, %c0_2, %c0_3] : memref<1x64x4xf32, #tpu.memory_space<vmem>>, vector<1x64x4xf32>
    %3 = vector.shape_cast %2 : vector<1x64x4xf32> to vector<64x4xf32>
    %c0_4 = arith.constant 0 : index
    %c0_5 = arith.constant 0 : index
    %4 = vector.load %arg10[%c0_4, %c0_5] : memref<64x128xf32, #tpu.memory_space<vmem>>, vector<64x4xf32>
    tpu.vector_store %arg10[%c0_4, %c0_5], %3 {strides = array<i32>} : memref<64x128xf32, #tpu.memory_space<vmem>>, vector<64x4xf32>,
    %c0_6 = arith.constant 0 : index
    %c0_7 = arith.constant 0 : index
    %5 = vector.load %arg10[%c0_6, %c0_7] : memref<64x128xf32, #tpu.memory_space<vmem>>, vector<64x128xf32>
    %6 = tpu.iota {dimensions = array<i32: 1>} : vector<1x128xi32>
    %c4_i32 = arith.constant 4 : i32
    %7 = vector.broadcast %c4_i32 : i32 to vector<1x128xi32>
    %8 = arith.cmpi slt, %6, %7 : vector<1x128xi32>
    %9 = arith.extui %8 : vector<1x128xi1> to vector<1x128xi32>
    %10 = arith.sitofp %9 : vector<1x128xi32> to vector<1x128xf32>
    %cst_8 = arith.constant 0.000000e+00 : f32
    %11 = vector.broadcast %cst_8 : f32 to vector<16x128xf32>
    %c0_9 = arith.constant 0 : index
    %c0_10 = arith.constant 0 : index
    %12 = vector.load %arg11[%c0_9, %c0_10] : memref<96x128xf32, #tpu.memory_space<vmem>>, vector<16x128xf32>
    tpu.vector_store %arg11[%c0_9, %c0_10], %11 {strides = array<i32>} : memref<96x128xf32, #tpu.memory_space<vmem>>, vector<16x128xf32>,
    %c80 = arith.constant 80 : index
    %c0_11 = arith.constant 0 : index
    %13 = vector.load %arg11[%c80, %c0_11] : memref<96x128xf32, #tpu.memory_space<vmem>>, vector<16x128xf32>
    tpu.vector_store %arg11[%c80, %c0_11], %11 {strides = array<i32>} : memref<96x128xf32, #tpu.memory_space<vmem>>, vector<16x128xf32>,
    %c0_12 = arith.constant 0 : index
    %c0_13 = arith.constant 0 : index
    %14 = vector.load %arg1[%c0_12, %c0_13] : memref<64x2xf32, #tpu.memory_space<vmem>>, vector<64x1xf32>
    %c0_14 = arith.constant 0 : index
    %c1 = arith.constant 1 : index
    %15 = vector.load %arg1[%c0_14, %c1] : memref<64x2xf32, #tpu.memory_space<vmem>>, vector<64x1xf32>
    %16 = vector.shape_cast %5 : vector<64x128xf32> to vector<1x64x128xf32>
    %cst_15 = arith.constant dense<0.000000e+00> : vector<1xf32>
    %17 = vector.multi_reduction <add>, %16, %cst_15 [1, 2] : vector<1x64x128xf32> to vector<1xf32>
    %18 = vector.shape_cast %17 : vector<1xf32> to vector<1x1x1xf32>
    %19 = vector.extract %18[0, 0, 0] : f32 from vector<1x1x1xf32>
    %cst_16 = arith.constant 3.906250e-03 : f32
    %20 = arith.mulf %19, %cst_16 : f32
    %21 = vector.broadcast %20 : f32 to vector<1x128xf32>
    %22 = arith.mulf %21, %10 : vector<1x128xf32>
    %23 = vector.broadcast %22 : vector<1x128xf32> to vector<64x128xf32>
    %24 = arith.subf %5, %23 : vector<64x128xf32>
    %25 = arith.mulf %24, %24 : vector<64x128xf32>
    %26 = vector.shape_cast %25 : vector<64x128xf32> to vector<1x64x128xf32>
    %cst_17 = arith.constant dense<0.000000e+00> : vector<1xf32>
    %27 = vector.multi_reduction <add>, %26, %cst_17 [1, 2] : vector<1x64x128xf32> to vector<1xf32>
    %28 = vector.shape_cast %27 : vector<1xf32> to vector<1x1x1xf32>
    %29 = vector.extract %28[0, 0, 0] : f32 from vector<1x1x1xf32>
    %cst_18 = arith.constant 3.906250e-03 : f32
    %30 = arith.mulf %29, %cst_18 : f32
    %cst_19 = arith.constant 9.99999974E-6 : f32
    %31 = arith.addf %30, %cst_19 : f32
    %32 = math.rsqrt %31 : f32
    %c0_20 = arith.constant 0 : index
    %c0_21 = arith.constant 0 : index
    %33 = vector.load %arg2[%c0_20, %c0_21] : memref<1x128xf32, #tpu.memory_space<vmem>>, vector<1x128xf32>
    %34 = vector.broadcast %32 : f32 to vector<1x128xf32>
    %35 = arith.mulf %34, %33 : vector<1x128xf32>
    %36 = vector.broadcast %35 : vector<1x128xf32> to vector<64x128xf32>
    %37 = arith.mulf %24, %36 : vector<64x128xf32>
    %c0_22 = arith.constant 0 : index
    %c0_23 = arith.constant 0 : index
    %38 = vector.load %arg3[%c0_22, %c0_23] : memref<1x128xf32, #tpu.memory_space<vmem>>, vector<1x128xf32>
    %39 = vector.broadcast %38 : vector<1x128xf32> to vector<64x128xf32>
    %40 = arith.addf %37, %39 : vector<64x128xf32>
    %cst_24 = arith.constant 0.707106769 : f32
    %41 = vector.broadcast %cst_24 : f32 to vector<64x128xf32>
    %42 = arith.mulf %40, %41 : vector<64x128xf32>
    %43 = math.absf %42 : vector<64x128xf32>
    %cst_25 = arith.constant 0.327591091 : f32
    %44 = vector.broadcast %cst_25 : f32 to vector<64x128xf32>
    %45 = arith.mulf %44, %43 : vector<64x128xf32>
    %cst_26 = arith.constant 1.000000e+00 : f32
    %46 = vector.broadcast %cst_26 : f32 to vector<64x128xf32>
    %47 = arith.addf %46, %45 : vector<64x128xf32>
    %48 = tpu.reciprocal %47 {approx = true} : vector<64x128xf32> -> vector<64x128xf32>
    %cst_27 = arith.constant 1.06140542 : f32
    %49 = vector.broadcast %cst_27 : f32 to vector<64x128xf32>
    %50 = arith.mulf %48, %49 : vector<64x128xf32>
    %cst_28 = arith.constant -1.45315206 : f32
    %51 = vector.broadcast %cst_28 : f32 to vector<64x128xf32>
    %52 = arith.addf %51, %50 : vector<64x128xf32>
    %53 = arith.mulf %48, %52 : vector<64x128xf32>
    %cst_29 = arith.constant 1.42141378 : f32
    %54 = vector.broadcast %cst_29 : f32 to vector<64x128xf32>
    %55 = arith.addf %54, %53 : vector<64x128xf32>
    %56 = arith.mulf %48, %55 : vector<64x128xf32>
    %cst_30 = arith.constant -0.284496725 : f32
    %57 = vector.broadcast %cst_30 : f32 to vector<64x128xf32>
    %58 = arith.addf %57, %56 : vector<64x128xf32>
    %59 = arith.mulf %48, %58 : vector<64x128xf32>
    %cst_31 = arith.constant 0.254829586 : f32
    %60 = vector.broadcast %cst_31 : f32 to vector<64x128xf32>
    %61 = arith.addf %60, %59 : vector<64x128xf32>
    %62 = arith.mulf %48, %61 : vector<64x128xf32>
    %cst_32 = arith.constant 0.000000e+00 : f32
    %63 = vector.broadcast %cst_32 : f32 to vector<64x128xf32>
    %64 = arith.subf %63, %43 : vector<64x128xf32>
    %65 = arith.mulf %64, %43 : vector<64x128xf32>
    %66 = math.exp %65 : vector<64x128xf32>
    %67 = arith.mulf %62, %66 : vector<64x128xf32>
    %cst_33 = arith.constant 1.000000e+00 : f32
    %68 = vector.broadcast %cst_33 : f32 to vector<64x128xf32>
    %69 = arith.subf %68, %67 : vector<64x128xf32>
    %cst_34 = arith.constant 0.000000e+00 : f32
    %70 = vector.broadcast %cst_34 : f32 to vector<64x128xf32>
    %71 = arith.cmpf oge, %42, %70 : vector<64x128xf32>
    %cst_35 = arith.constant 0.000000e+00 : f32
    %72 = vector.broadcast %cst_35 : f32 to vector<64x128xf32>
    %73 = arith.subf %72, %69 : vector<64x128xf32>
    %74 = arith.select %71, %69, %73 : vector<64x128xi1>, vector<64x128xf32>
    %cst_36 = arith.constant 5.000000e-01 : f32
    %75 = vector.broadcast %cst_36 : f32 to vector<64x128xf32>
    %76 = arith.mulf %75, %40 : vector<64x128xf32>
    %cst_37 = arith.constant 1.000000e+00 : f32
    %77 = vector.broadcast %cst_37 : f32 to vector<64x128xf32>
    %78 = arith.addf %77, %74 : vector<64x128xf32>
    %79 = arith.mulf %76, %78 : vector<64x128xf32>
    %c16 = arith.constant 16 : index
    %c0_38 = arith.constant 0 : index
    %80 = vector.load %arg11[%c16, %c0_38] : memref<96x128xf32, #tpu.memory_space<vmem>>, vector<64x128xf32>
    tpu.vector_store %arg11[%c16, %c0_38], %79 {strides = array<i32>} : memref<96x128xf32, #tpu.memory_space<vmem>>, vector<64x128xf32>,
    %c7 = arith.constant 7 : index
    %c0_39 = arith.constant 0 : index
    %81 = vector.load %arg11[%c7, %c0_39] : memref<96x128xf32, #tpu.memory_space<vmem>>, vector<64x128xf32>
    %82 = vector.broadcast %14 : vector<64x1xf32> to vector<64x128xf32>
    %83 = arith.mulf %81, %82 : vector<64x128xf32>
    %84 = arith.truncf %83 : vector<64x128xf32> to vector<64x128xbf16>
    %c0_40 = arith.constant 0 : index
    %c0_41 = arith.constant 0 : index
    %85 = vector.load %arg12[%c0_40, %c0_41] : memref<64x384xbf16, #tpu.memory_space<vmem>>, vector<64x128xbf16>
    tpu.vector_store %arg12[%c0_40, %c0_41], %84 {strides = array<i32>} : memref<64x384xbf16, #tpu.memory_space<vmem>>, vector<64x128xbf16>,
    %c8 = arith.constant 8 : index
    %c0_42 = arith.constant 0 : index
    %86 = vector.load %arg11[%c8, %c0_42] : memref<96x128xf32, #tpu.memory_space<vmem>>, vector<64x128xf32>
    %87 = arith.truncf %86 : vector<64x128xf32> to vector<64x128xbf16>
    %c0_43 = arith.constant 0 : index
    %c128 = arith.constant 128 : index
    %88 = vector.load %arg12[%c0_43, %c128] : memref<64x384xbf16, #tpu.memory_space<vmem>>, vector<64x128xbf16>
    tpu.vector_store %arg12[%c0_43, %c128], %87 {strides = array<i32>} : memref<64x384xbf16, #tpu.memory_space<vmem>>, vector<64x128xbf16>,
    %c9 = arith.constant 9 : index
    %c0_44 = arith.constant 0 : index
    %89 = vector.load %arg11[%c9, %c0_44] : memref<96x128xf32, #tpu.memory_space<vmem>>, vector<64x128xf32>
    %90 = vector.broadcast %15 : vector<64x1xf32> to vector<64x128xf32>
    %91 = arith.mulf %89, %90 : vector<64x128xf32>
    %92 = arith.truncf %91 : vector<64x128xf32> to vector<64x128xbf16>
    %c0_45 = arith.constant 0 : index
    %c256 = arith.constant 256 : index
    %93 = vector.load %arg12[%c0_45, %c256] : memref<64x384xbf16, #tpu.memory_space<vmem>>, vector<64x128xbf16>
    tpu.vector_store %arg12[%c0_45, %c256], %92 {strides = array<i32>} : memref<64x384xbf16, #tpu.memory_space<vmem>>, vector<64x128xbf16>,
    %c0_46 = arith.constant 0 : index
    %c0_47 = arith.constant 0 : index
    %94 = vector.load %arg12[%c0_46, %c0_47] : memref<64x384xbf16, #tpu.memory_space<vmem>>, vector<64x384xbf16>
    %c0_48 = arith.constant 0 : index
    %c0_49 = arith.constant 0 : index
    %c0_50 = arith.constant 0 : index
    %95 = vector.load %arg4[%c0_48, %c0_49, %c0_50] : memref<3x384x128xbf16, #tpu.memory_space<vmem>>, vector<1x384x128xbf16>
    %96 = vector.shape_cast %95 : vector<1x384x128xbf16> to vector<384x128xbf16>
    %cst_51 = arith.constant dense<0.000000e+00> : vector<64x128xf32>
    %97 = tpu.matmul %94, %96, %cst_51 {dimension_numbers = #tpu.dot_dimension_numbers<[1], [0], [0], [1], [0, 0, 1, 1], [], []>} : vector<64x384xbf16>, vector<384x128xbf16>, vector<64x128xf32> -> vector<64x128xf32>
    %c15 = arith.constant 15 : index
    %c0_52 = arith.constant 0 : index
    %98 = vector.load %arg11[%c15, %c0_52] : memref<96x128xf32, #tpu.memory_space<vmem>>, vector<64x128xf32>
    %99 = vector.broadcast %14 : vector<64x1xf32> to vector<64x128xf32>
    %100 = arith.mulf %98, %99 : vector<64x128xf32>
    %101 = arith.truncf %100 : vector<64x128xf32> to vector<64x128xbf16>
    %c0_53 = arith.constant 0 : index
    %c0_54 = arith.constant 0 : index
    %102 = vector.load %arg12[%c0_53, %c0_54] : memref<64x384xbf16, #tpu.memory_space<vmem>>, vector<64x128xbf16>
    tpu.vector_store %arg12[%c0_53, %c0_54], %101 {strides = array<i32>} : memref<64x384xbf16, #tpu.memory_space<vmem>>, vector<64x128xbf16>,
    %103 = arith.truncf %79 : vector<64x128xf32> to vector<64x128xbf16>
    %c0_55 = arith.constant 0 : index
    %c128_56 = arith.constant 128 : index
    %104 = vector.load %arg12[%c0_55, %c128_56] : memref<64x384xbf16, #tpu.memory_space<vmem>>, vector<64x128xbf16>
    tpu.vector_store %arg12[%c0_55, %c128_56], %103 {strides = array<i32>} : memref<64x384xbf16, #tpu.memory_space<vmem>>, vector<64x128xbf16>,
    %c17 = arith.constant 17 : index
    %c0_57 = arith.constant 0 : index
    %105 = vector.load %arg11[%c17, %c0_57] : memref<96x128xf32, #tpu.memory_space<vmem>>, vector<64x128xf32>
    %106 = vector.broadcast %15 : vector<64x1xf32> to vector<64x128xf32>
    %107 = arith.mulf %105, %106 : vector<64x128xf32>
    %108 = arith.truncf %107 : vector<64x128xf32> to vector<64x128xbf16>
    %c0_58 = arith.constant 0 : index
    %c256_59 = arith.constant 256 : index
    %109 = vector.load %arg12[%c0_58, %c256_59] : memref<64x384xbf16, #tpu.memory_space<vmem>>, vector<64x128xbf16>
    tpu.vector_store %arg12[%c0_58, %c256_59], %108 {strides = array<i32>} : memref<64x384xbf16, #tpu.memory_space<vmem>>, vector<64x128xbf16>,
    %c0_60 = arith.constant 0 : index
    %c0_61 = arith.constant 0 : index
    %110 = vector.load %arg12[%c0_60, %c0_61] : memref<64x384xbf16, #tpu.memory_space<vmem>>, vector<64x384xbf16>
    %c1_62 = arith.constant 1 : index
    %c0_63 = arith.constant 0 : index
    %c0_64 = arith.constant 0 : index
    %111 = vector.load %arg4[%c1_62, %c0_63, %c0_64] : memref<3x384x128xbf16, #tpu.memory_space<vmem>>, vector<1x384x128xbf16>
    %112 = vector.shape_cast %111 : vector<1x384x128xbf16> to vector<384x128xbf16>
    %cst_65 = arith.constant dense<0.000000e+00> : vector<64x128xf32>
    %113 = tpu.matmul %110, %112, %cst_65 {dimension_numbers = #tpu.dot_dimension_numbers<[1], [0], [0], [1], [0, 0, 1, 1], [], []>} : vector<64x384xbf16>, vector<384x128xbf16>, vector<64x128xf32> -> vector<64x128xf32>
    %114 = arith.addf %97, %113 : vector<64x128xf32>
    %c23 = arith.constant 23 : index
    %c0_66 = arith.constant 0 : index
    %115 = vector.load %arg11[%c23, %c0_66] : memref<96x128xf32, #tpu.memory_space<vmem>>, vector<64x128xf32>
    %116 = vector.broadcast %14 : vector<64x1xf32> to vector<64x128xf32>
    %117 = arith.mulf %115, %116 : vector<64x128xf32>
    %118 = arith.truncf %117 : vector<64x128xf32> to vector<64x128xbf16>
    %c0_67 = arith.constant 0 : index
    %c0_68 = arith.constant 0 : index
    %119 = vector.load %arg12[%c0_67, %c0_68] : memref<64x384xbf16, #tpu.memory_space<vmem>>, vector<64x128xbf16>
    tpu.vector_store %arg12[%c0_67, %c0_68], %118 {strides = array<i32>} : memref<64x384xbf16, #tpu.memory_space<vmem>>, vector<64x128xbf16>,
    %c24 = arith.constant 24 : index
    %c0_69 = arith.constant 0 : index
    %120 = vector.load %arg11[%c24, %c0_69] : memref<96x128xf32, #tpu.memory_space<vmem>>, vector<64x128xf32>
    %121 = arith.truncf %120 : vector<64x128xf32> to vector<64x128xbf16>
    %c0_70 = arith.constant 0 : index
    %c128_71 = arith.constant 128 : index
    %122 = vector.load %arg12[%c0_70, %c128_71] : memref<64x384xbf16, #tpu.memory_space<vmem>>, vector<64x128xbf16>
    tpu.vector_store %arg12[%c0_70, %c128_71], %121 {strides = array<i32>} : memref<64x384xbf16, #tpu.memory_space<vmem>>, vector<64x128xbf16>,
    %c25 = arith.constant 25 : index
    %c0_72 = arith.constant 0 : index
    %123 = vector.load %arg11[%c25, %c0_72] : memref<96x128xf32, #tpu.memory_space<vmem>>, vector<64x128xf32>
    %124 = vector.broadcast %15 : vector<64x1xf32> to vector<64x128xf32>
    %125 = arith.mulf %123, %124 : vector<64x128xf32>
    %126 = arith.truncf %125 : vector<64x128xf32> to vector<64x128xbf16>
    %c0_73 = arith.constant 0 : index
    %c256_74 = arith.constant 256 : index
    %127 = vector.load %arg12[%c0_73, %c256_74] : memref<64x384xbf16, #tpu.memory_space<vmem>>, vector<64x128xbf16>
    tpu.vector_store %arg12[%c0_73, %c256_74], %126 {strides = array<i32>} : memref<64x384xbf16, #tpu.memory_space<vmem>>, vector<64x128xbf16>,
    %c0_75 = arith.constant 0 : index
    %c0_76 = arith.constant 0 : index
    %128 = vector.load %arg12[%c0_75, %c0_76] : memref<64x384xbf16, #tpu.memory_space<vmem>>, vector<64x384xbf16>
    %c2 = arith.constant 2 : index
    %c0_77 = arith.constant 0 : index
    %c0_78 = arith.constant 0 : index
    %129 = vector.load %arg4[%c2, %c0_77, %c0_78] : memref<3x384x128xbf16, #tpu.memory_space<vmem>>, vector<1x384x128xbf16>
    %130 = vector.shape_cast %129 : vector<1x384x128xbf16> to vector<384x128xbf16>
    %cst_79 = arith.constant dense<0.000000e+00> : vector<64x128xf32>
    %131 = tpu.matmul %128, %130, %cst_79 {dimension_numbers = #tpu.dot_dimension_numbers<[1], [0], [0], [1], [0, 0, 1, 1], [], []>} : vector<64x384xbf16>, vector<384x128xbf16>, vector<64x128xf32> -> vector<64x128xf32>
    %132 = arith.addf %114, %131 : vector<64x128xf32>
    %133 = vector.shape_cast %132 : vector<64x128xf32> to vector<1x64x128xf32>
    %cst_80 = arith.constant dense<0.000000e+00> : vector<1xf32>
    %134 = vector.multi_reduction <add>, %133, %cst_80 [1, 2] : vector<1x64x128xf32> to vector<1xf32>
    %135 = vector.shape_cast %134 : vector<1xf32> to vector<1x1x1xf32>
    %136 = vector.extract %135[0, 0, 0] : f32 from vector<1x1x1xf32>
    %cst_81 = arith.constant 3.906250e-03 : f32
    %137 = arith.mulf %136, %cst_81 : f32
    %138 = vector.broadcast %137 : f32 to vector<1x128xf32>
    %139 = arith.mulf %138, %10 : vector<1x128xf32>
    %140 = vector.broadcast %139 : vector<1x128xf32> to vector<64x128xf32>
    %141 = arith.subf %132, %140 : vector<64x128xf32>
    %142 = arith.mulf %141, %141 : vector<64x128xf32>
    %143 = vector.shape_cast %142 : vector<64x128xf32> to vector<1x64x128xf32>
    %cst_82 = arith.constant dense<0.000000e+00> : vector<1xf32>
    %144 = vector.multi_reduction <add>, %143, %cst_82 [1, 2] : vector<1x64x128xf32> to vector<1xf32>
    %145 = vector.shape_cast %144 : vector<1xf32> to vector<1x1x1xf32>
    %146 = vector.extract %145[0, 0, 0] : f32 from vector<1x1x1xf32>
    %cst_83 = arith.constant 3.906250e-03 : f32
    %147 = arith.mulf %146, %cst_83 : f32
    %cst_84 = arith.constant 9.99999974E-6 : f32
    %148 = arith.addf %147, %cst_84 : f32
    %149 = math.rsqrt %148 : f32
    %c0_85 = arith.constant 0 : index
    %c0_86 = arith.constant 0 : index
    %150 = vector.load %arg5[%c0_85, %c0_86] : memref<1x128xf32, #tpu.memory_space<vmem>>, vector<1x128xf32>
    %151 = vector.broadcast %149 : f32 to vector<1x128xf32>
    %152 = arith.mulf %151, %150 : vector<1x128xf32>
    %153 = vector.broadcast %152 : vector<1x128xf32> to vector<64x128xf32>
    %154 = arith.mulf %141, %153 : vector<64x128xf32>
    %c0_87 = arith.constant 0 : index
    %c0_88 = arith.constant 0 : index
    %155 = vector.load %arg6[%c0_87, %c0_88] : memref<1x128xf32, #tpu.memory_space<vmem>>, vector<1x128xf32>
    %156 = vector.broadcast %155 : vector<1x128xf32> to vector<64x128xf32>
    %157 = arith.addf %154, %156 : vector<64x128xf32>
    %cst_89 = arith.constant 0.707106769 : f32
    %158 = vector.broadcast %cst_89 : f32 to vector<64x128xf32>
    %159 = arith.mulf %157, %158 : vector<64x128xf32>
    %160 = math.absf %159 : vector<64x128xf32>
    %cst_90 = arith.constant 0.327591091 : f32
    %161 = vector.broadcast %cst_90 : f32 to vector<64x128xf32>
    %162 = arith.mulf %161, %160 : vector<64x128xf32>
    %cst_91 = arith.constant 1.000000e+00 : f32
    %163 = vector.broadcast %cst_91 : f32 to vector<64x128xf32>
    %164 = arith.addf %163, %162 : vector<64x128xf32>
    %165 = tpu.reciprocal %164 {approx = true} : vector<64x128xf32> -> vector<64x128xf32>
    %cst_92 = arith.constant 1.06140542 : f32
    %166 = vector.broadcast %cst_92 : f32 to vector<64x128xf32>
    %167 = arith.mulf %165, %166 : vector<64x128xf32>
    %cst_93 = arith.constant -1.45315206 : f32
    %168 = vector.broadcast %cst_93 : f32 to vector<64x128xf32>
    %169 = arith.addf %168, %167 : vector<64x128xf32>
    %170 = arith.mulf %165, %169 : vector<64x128xf32>
    %cst_94 = arith.constant 1.42141378 : f32
    %171 = vector.broadcast %cst_94 : f32 to vector<64x128xf32>
    %172 = arith.addf %171, %170 : vector<64x128xf32>
    %173 = arith.mulf %165, %172 : vector<64x128xf32>
    %cst_95 = arith.constant -0.284496725 : f32
    %174 = vector.broadcast %cst_95 : f32 to vector<64x128xf32>
    %175 = arith.addf %174, %173 : vector<64x128xf32>
    %176 = arith.mulf %165, %175 : vector<64x128xf32>
    %cst_96 = arith.constant 0.254829586 : f32
    %177 = vector.broadcast %cst_96 : f32 to vector<64x128xf32>
    %178 = arith.addf %177, %176 : vector<64x128xf32>
    %179 = arith.mulf %165, %178 : vector<64x128xf32>
    %cst_97 = arith.constant 0.000000e+00 : f32
    %180 = vector.broadcast %cst_97 : f32 to vector<64x128xf32>
    %181 = arith.subf %180, %160 : vector<64x128xf32>
    %182 = arith.mulf %181, %160 : vector<64x128xf32>
    %183 = math.exp %182 : vector<64x128xf32>
    %184 = arith.mulf %179, %183 : vector<64x128xf32>
    %cst_98 = arith.constant 1.000000e+00 : f32
    %185 = vector.broadcast %cst_98 : f32 to vector<64x128xf32>
    %186 = arith.subf %185, %184 : vector<64x128xf32>
    %cst_99 = arith.constant 0.000000e+00 : f32
    %187 = vector.broadcast %cst_99 : f32 to vector<64x128xf32>
    %188 = arith.cmpf oge, %159, %187 : vector<64x128xf32>
    %cst_100 = arith.constant 0.000000e+00 : f32
    %189 = vector.broadcast %cst_100 : f32 to vector<64x128xf32>
    %190 = arith.subf %189, %186 : vector<64x128xf32>
    %191 = arith.select %188, %186, %190 : vector<64x128xi1>, vector<64x128xf32>
    %cst_101 = arith.constant 5.000000e-01 : f32
    %192 = vector.broadcast %cst_101 : f32 to vector<64x128xf32>
    %193 = arith.mulf %192, %157 : vector<64x128xf32>
    %cst_102 = arith.constant 1.000000e+00 : f32
    %194 = vector.broadcast %cst_102 : f32 to vector<64x128xf32>
    %195 = arith.addf %194, %191 : vector<64x128xf32>
    %196 = arith.mulf %193, %195 : vector<64x128xf32>
    %c16_103 = arith.constant 16 : index
    %c0_104 = arith.constant 0 : index
    %197 = vector.load %arg11[%c16_103, %c0_104] : memref<96x128xf32, #tpu.memory_space<vmem>>, vector<64x128xf32>
    tpu.vector_store %arg11[%c16_103, %c0_104], %196 {strides = array<i32>} : memref<96x128xf32, #tpu.memory_space<vmem>>, vector<64x128xf32>,
    %c7_105 = arith.constant 7 : index
    %c0_106 = arith.constant 0 : index
    %198 = vector.load %arg11[%c7_105, %c0_106] : memref<96x128xf32, #tpu.memory_space<vmem>>, vector<64x128xf32>
    %199 = vector.broadcast %14 : vector<64x1xf32> to vector<64x128xf32>
    %200 = arith.mulf %198, %199 : vector<64x128xf32>
    %201 = arith.truncf %200 : vector<64x128xf32> to vector<64x128xbf16>
    %c0_107 = arith.constant 0 : index
    %c0_108 = arith.constant 0 : index
    %202 = vector.load %arg12[%c0_107, %c0_108] : memref<64x384xbf16, #tpu.memory_space<vmem>>, vector<64x128xbf16>
    tpu.vector_store %arg12[%c0_107, %c0_108], %201 {strides = array<i32>} : memref<64x384xbf16, #tpu.memory_space<vmem>>, vector<64x128xbf16>,
    %c8_109 = arith.constant 8 : index
    %c0_110 = arith.constant 0 : index
    %203 = vector.load %arg11[%c8_109, %c0_110] : memref<96x128xf32, #tpu.memory_space<vmem>>, vector<64x128xf32>
    %204 = arith.truncf %203 : vector<64x128xf32> to vector<64x128xbf16>
    %c0_111 = arith.constant 0 : index
    %c128_112 = arith.constant 128 : index
    %205 = vector.load %arg12[%c0_111, %c128_112] : memref<64x384xbf16, #tpu.memory_space<vmem>>, vector<64x128xbf16>
    tpu.vector_store %arg12[%c0_111, %c128_112], %204 {strides = array<i32>} : memref<64x384xbf16, #tpu.memory_space<vmem>>, vector<64x128xbf16>,
    %c9_113 = arith.constant 9 : index
    %c0_114 = arith.constant 0 : index
    %206 = vector.load %arg11[%c9_113, %c0_114] : memref<96x128xf32, #tpu.memory_space<vmem>>, vector<64x128xf32>
    %207 = vector.broadcast %15 : vector<64x1xf32> to vector<64x128xf32>
    %208 = arith.mulf %206, %207 : vector<64x128xf32>
    %209 = arith.truncf %208 : vector<64x128xf32> to vector<64x128xbf16>
    %c0_115 = arith.constant 0 : index
    %c256_116 = arith.constant 256 : index
    %210 = vector.load %arg12[%c0_115, %c256_116] : memref<64x384xbf16, #tpu.memory_space<vmem>>, vector<64x128xbf16>
    tpu.vector_store %arg12[%c0_115, %c256_116], %209 {strides = array<i32>} : memref<64x384xbf16, #tpu.memory_space<vmem>>, vector<64x128xbf16>,
    %c0_117 = arith.constant 0 : index
    %c0_118 = arith.constant 0 : index
    %211 = vector.load %arg12[%c0_117, %c0_118] : memref<64x384xbf16, #tpu.memory_space<vmem>>, vector<64x384xbf16>
    %c0_119 = arith.constant 0 : index
    %c0_120 = arith.constant 0 : index
    %c0_121 = arith.constant 0 : index
    %212 = vector.load %arg7[%c0_119, %c0_120, %c0_121] : memref<3x384x128xbf16, #tpu.memory_space<vmem>>, vector<1x384x128xbf16>
    %213 = vector.shape_cast %212 : vector<1x384x128xbf16> to vector<384x128xbf16>
    %cst_122 = arith.constant dense<0.000000e+00> : vector<64x128xf32>
    %214 = tpu.matmul %211, %213, %cst_122 {dimension_numbers = #tpu.dot_dimension_numbers<[1], [0], [0], [1], [0, 0, 1, 1], [], []>} : vector<64x384xbf16>, vector<384x128xbf16>, vector<64x128xf32> -> vector<64x128xf32>
    %c15_123 = arith.constant 15 : index
    %c0_124 = arith.constant 0 : index
    %215 = vector.load %arg11[%c15_123, %c0_124] : memref<96x128xf32, #tpu.memory_space<vmem>>, vector<64x128xf32>
    %216 = vector.broadcast %14 : vector<64x1xf32> to vector<64x128xf32>
    %217 = arith.mulf %215, %216 : vector<64x128xf32>
    %218 = arith.truncf %217 : vector<64x128xf32> to vector<64x128xbf16>
    %c0_125 = arith.constant 0 : index
    %c0_126 = arith.constant 0 : index
    %219 = vector.load %arg12[%c0_125, %c0_126] : memref<64x384xbf16, #tpu.memory_space<vmem>>, vector<64x128xbf16>
    tpu.vector_store %arg12[%c0_125, %c0_126], %218 {strides = array<i32>} : memref<64x384xbf16, #tpu.memory_space<vmem>>, vector<64x128xbf16>,
    %220 = arith.truncf %196 : vector<64x128xf32> to vector<64x128xbf16>
    %c0_127 = arith.constant 0 : index
    %c128_128 = arith.constant 128 : index
    %221 = vector.load %arg12[%c0_127, %c128_128] : memref<64x384xbf16, #tpu.memory_space<vmem>>, vector<64x128xbf16>
    tpu.vector_store %arg12[%c0_127, %c128_128], %220 {strides = array<i32>} : memref<64x384xbf16, #tpu.memory_space<vmem>>, vector<64x128xbf16>,
    %c17_129 = arith.constant 17 : index
    %c0_130 = arith.constant 0 : index
    %222 = vector.load %arg11[%c17_129, %c0_130] : memref<96x128xf32, #tpu.memory_space<vmem>>, vector<64x128xf32>
    %223 = vector.broadcast %15 : vector<64x1xf32> to vector<64x128xf32>
    %224 = arith.mulf %222, %223 : vector<64x128xf32>
    %225 = arith.truncf %224 : vector<64x128xf32> to vector<64x128xbf16>
    %c0_131 = arith.constant 0 : index
    %c256_132 = arith.constant 256 : index
    %226 = vector.load %arg12[%c0_131, %c256_132] : memref<64x384xbf16, #tpu.memory_space<vmem>>, vector<64x128xbf16>
    tpu.vector_store %arg12[%c0_131, %c256_132], %225 {strides = array<i32>} : memref<64x384xbf16, #tpu.memory_space<vmem>>, vector<64x128xbf16>,
    %c0_133 = arith.constant 0 : index
    %c0_134 = arith.constant 0 : index
    %227 = vector.load %arg12[%c0_133, %c0_134] : memref<64x384xbf16, #tpu.memory_space<vmem>>, vector<64x384xbf16>
    %c1_135 = arith.constant 1 : index
    %c0_136 = arith.constant 0 : index
    %c0_137 = arith.constant 0 : index
    %228 = vector.load %arg7[%c1_135, %c0_136, %c0_137] : memref<3x384x128xbf16, #tpu.memory_space<vmem>>, vector<1x384x128xbf16>
    %229 = vector.shape_cast %228 : vector<1x384x128xbf16> to vector<384x128xbf16>
    %cst_138 = arith.constant dense<0.000000e+00> : vector<64x128xf32>
    %230 = tpu.matmul %227, %229, %cst_138 {dimension_numbers = #tpu.dot_dimension_numbers<[1], [0], [0], [1], [0, 0, 1, 1], [], []>} : vector<64x384xbf16>, vector<384x128xbf16>, vector<64x128xf32> -> vector<64x128xf32>
    %231 = arith.addf %214, %230 : vector<64x128xf32>
    %c23_139 = arith.constant 23 : index
    %c0_140 = arith.constant 0 : index
    %232 = vector.load %arg11[%c23_139, %c0_140] : memref<96x128xf32, #tpu.memory_space<vmem>>, vector<64x128xf32>
    %233 = vector.broadcast %14 : vector<64x1xf32> to vector<64x128xf32>
    %234 = arith.mulf %232, %233 : vector<64x128xf32>
    %235 = arith.truncf %234 : vector<64x128xf32> to vector<64x128xbf16>
    %c0_141 = arith.constant 0 : index
    %c0_142 = arith.constant 0 : index
    %236 = vector.load %arg12[%c0_141, %c0_142] : memref<64x384xbf16, #tpu.memory_space<vmem>>, vector<64x128xbf16>
    tpu.vector_store %arg12[%c0_141, %c0_142], %235 {strides = array<i32>} : memref<64x384xbf16, #tpu.memory_space<vmem>>, vector<64x128xbf16>,
    %c24_143 = arith.constant 24 : index
    %c0_144 = arith.constant 0 : index
    %237 = vector.load %arg11[%c24_143, %c0_144] : memref<96x128xf32, #tpu.memory_space<vmem>>, vector<64x128xf32>
    %238 = arith.truncf %237 : vector<64x128xf32> to vector<64x128xbf16>
    %c0_145 = arith.constant 0 : index
    %c128_146 = arith.constant 128 : index
    %239 = vector.load %arg12[%c0_145, %c128_146] : memref<64x384xbf16, #tpu.memory_space<vmem>>, vector<64x128xbf16>
    tpu.vector_store %arg12[%c0_145, %c128_146], %238 {strides = array<i32>} : memref<64x384xbf16, #tpu.memory_space<vmem>>, vector<64x128xbf16>,
    %c25_147 = arith.constant 25 : index
    %c0_148 = arith.constant 0 : index
    %240 = vector.load %arg11[%c25_147, %c0_148] : memref<96x128xf32, #tpu.memory_space<vmem>>, vector<64x128xf32>
    %241 = vector.broadcast %15 : vector<64x1xf32> to vector<64x128xf32>
    %242 = arith.mulf %240, %241 : vector<64x128xf32>
    %243 = arith.truncf %242 : vector<64x128xf32> to vector<64x128xbf16>
    %c0_149 = arith.constant 0 : index
    %c256_150 = arith.constant 256 : index
    %244 = vector.load %arg12[%c0_149, %c256_150] : memref<64x384xbf16, #tpu.memory_space<vmem>>, vector<64x128xbf16>
    tpu.vector_store %arg12[%c0_149, %c256_150], %243 {strides = array<i32>} : memref<64x384xbf16, #tpu.memory_space<vmem>>, vector<64x128xbf16>,
    %c0_151 = arith.constant 0 : index
    %c0_152 = arith.constant 0 : index
    %245 = vector.load %arg12[%c0_151, %c0_152] : memref<64x384xbf16, #tpu.memory_space<vmem>>, vector<64x384xbf16>
    %c2_153 = arith.constant 2 : index
    %c0_154 = arith.constant 0 : index
    %c0_155 = arith.constant 0 : index
    %246 = vector.load %arg7[%c2_153, %c0_154, %c0_155] : memref<3x384x128xbf16, #tpu.memory_space<vmem>>, vector<1x384x128xbf16>
    %247 = vector.shape_cast %246 : vector<1x384x128xbf16> to vector<384x128xbf16>
    %cst_156 = arith.constant dense<0.000000e+00> : vector<64x128xf32>
    %248 = tpu.matmul %245, %247, %cst_156 {dimension_numbers = #tpu.dot_dimension_numbers<[1], [0], [0], [1], [0, 0, 1, 1], [], []>} : vector<64x384xbf16>, vector<384x128xbf16>, vector<64x128xf32> -> vector<64x128xf32>
    %249 = arith.addf %231, %248 : vector<64x128xf32>
    %250 = vector.extract_strided_slice %249 {offsets = [0, 0], sizes = [64, 4], strides = [1, 1]} : vector<64x128xf32> to vector<64x4xf32>
    %c0_157 = arith.constant 0 : index
    %c0_158 = arith.constant 0 : index
    %c0_159 = arith.constant 0 : index
    %251 = vector.load %arg8[%c0_157, %c0_158, %c0_159] : memref<1x64x4xf32, #tpu.memory_space<vmem>>, vector<1x64x4xf32>
    %252 = vector.shape_cast %251 : vector<1x64x4xf32> to vector<64x4xf32>
    %253 = arith.addf %250, %252 : vector<64x4xf32>
    %cst_160 = arith.constant 0.707106769 : f32
    %254 = vector.broadcast %cst_160 : f32 to vector<64x4xf32>
    %255 = arith.mulf %253, %254 : vector<64x4xf32>
    %c0_161 = arith.constant 0 : index
    %c0_162 = arith.constant 0 : index
    %c0_163 = arith.constant 0 : index
    %256 = vector.load %arg9[%c0_161, %c0_162, %c0_163] : memref<1x64x4xf32, #tpu.memory_space<vmem>>, vector<1x64x4xf32>
    %257 = vector.shape_cast %256 : vector<1x64x4xf32> to vector<64x4xf32>
    %258 = vector.shape_cast %255 : vector<64x4xf32> to vector<1x64x4xf32>
    tpu.vector_store %arg9[%c0_161, %c0_162, %c0_163], %258 {strides = array<i32>} : memref<1x64x4xf32, #tpu.memory_space<vmem>>, vector<1x64x4xf32>,
    return
  }
  func.func @transform_0(%arg0: i32) -> (i32, i32) {
    %c0_i32 = arith.constant 0 : i32
    %c0_i32_0 = arith.constant 0 : i32
    %c0_i32_1 = arith.constant 0 : i32
    return %c0_i32, %c0_i32_0 : i32, i32
  }
  func.func @transform_1(%arg0: i32) -> (i32, i32) {
    %c0_i32 = arith.constant 0 : i32
    %c0_i32_0 = arith.constant 0 : i32
    %c0_i32_1 = arith.constant 0 : i32
    return %c0_i32, %c0_i32_0 : i32, i32
  }
  func.func @transform_2(%arg0: i32) -> (i32, i32) {
    %c0_i32 = arith.constant 0 : i32
    %c0_i32_0 = arith.constant 0 : i32
    %c0_i32_1 = arith.constant 0 : i32
    return %c0_i32, %c0_i32_0 : i32, i32
  }
  func.func @transform_3(%arg0: i32) -> (i32, i32, i32) {
    %c0_i32 = arith.constant 0 : i32
    %c0_i32_0 = arith.constant 0 : i32
    %c0_i32_1 = arith.constant 0 : i32
    %c0_i32_2 = arith.constant 0 : i32
    return %c0_i32, %c0_i32_0, %c0_i32_1 : i32, i32, i32
  }
  func.func @transform_4(%arg0: i32) -> (i32, i32) {
    %c0_i32 = arith.constant 0 : i32
    %c0_i32_0 = arith.constant 0 : i32
    %c0_i32_1 = arith.constant 0 : i32
    return %c0_i32, %c0_i32_0 : i32, i32
  }
  func.func @transform_5(%arg0: i32) -> (i32, i32) {
    %c0_i32 = arith.constant 0 : i32
    %c0_i32_0 = arith.constant 0 : i32
    %c0_i32_1 = arith.constant 0 : i32
    return %c0_i32, %c0_i32_0 : i32, i32
  }
  func.func @transform_6(%arg0: i32) -> (i32, i32, i32) {
    %c0_i32 = arith.constant 0 : i32
    %c0_i32_0 = arith.constant 0 : i32
    %c0_i32_1 = arith.constant 0 : i32
    %c0_i32_2 = arith.constant 0 : i32
    return %c0_i32, %c0_i32_0, %c0_i32_1 : i32, i32, i32
  }
  func.func @transform_7(%arg0: i32) -> (i32, i32, i32) {
    %c0_i32 = arith.constant 0 : i32
    %c0_i32_0 = arith.constant 0 : i32
    %c0_i32_1 = arith.constant 0 : i32
    return %arg0, %c0_i32, %c0_i32_0 : i32, i32, i32
  }
  func.func @transform_8(%arg0: i32) -> (i32, i32, i32) {
    %c0_i32 = arith.constant 0 : i32
    %c0_i32_0 = arith.constant 0 : i32
    %c0_i32_1 = arith.constant 0 : i32
    return %arg0, %c0_i32, %c0_i32_0 : i32, i32, i32
  }
}

</mosaic_0001>

<bundles_post_ra>
// kernel: wave_bottleneck_forward.1
= control target key start
LH: loop header
LB: loop body
LE: loop exit
PB: predicated region body
PF: predicated region fallthrough
CT: control target
= control target key end

     0   :  { %s4704_s27 = smov 0   ;;  %s6030_s0 = inlined_call_operand.vmem [shape: f32[64,2], index: 0, kind: input, shape index: {}]   ;;  %s6031_s1 = inlined_call_operand.vmem [shape: f32[1,128], index: 1, kind: input, shape index: {}]   ;;  %s6032_s2 = inlined_call_operand.vmem [shape: f32[1,128], index: 2, kind: input, shape index: {}]   ;;  %s6033_s3 = inlined_call_operand.vmem [shape: bf16[3,384,128], index: 3, kind: input, shape index: {}]   ;;  %s6034_s4 = inlined_call_operand.vmem [shape: f32[1,128], index: 4, kind: input, shape index: {}]   ;;  %s6035_s5 = inlined_call_operand.vmem [shape: f32[1,128], index: 5, kind: input, shape index: {}]   ;;  %s6036_s6 = inlined_call_operand.vmem [shape: bf16[3,384,128], index: 6, kind: input, shape index: {}]   ;;  %s6037_s7 = inlined_call_operand.vmem [shape: f32[2,64,4], index: 7, kind: input, shape index: {}]   ;;  %s6038_s8 = inlined_call_operand.vmem [shape: f32[2,64,4], index: 8, kind: output, shape index: {}]  }
   0x1 LB: > { %s3516_s28 = sadd.s32 4294967295, %s4654_s27   ;;  %p3520_p0 = scmp.ge.s32.totalorder %s4654_s27, 1  ;;  %s4654_s27 = sphi %s4704_s27, %s18_s27  }
   0x2   : > { %p262_p1 = scmp.lt.s32.totalorder %s4654_s27, 3 }
   0x4   : > { %p263_p2 = pnand %p3520_p0, %p262_p1 }
   0x6   : > { %266 = sbr.rel (%p263_p2) target bundleno = 1821 (0x71d), region = 52 }
   0xd   : > { %p4712_p3 = scmp.lt.s32.totalorder %s3516_s28, 1  ;;  %v4656_v0 = vmov 0.0   ;;  %vm323_vm0 = vcmask 31744   ;;  %v340_v31 = vlaneseq  ;;  %v349_v59 = vld [vmem:[%s6030_s0] sm:$0xff]  ;;  %v4657_v60 = vmov 0   ;;  %v350_v61 = vld [vmem:[%s6030_s0 + $0x8] sm:$0xff] }
   0xe   : > { %307 = vst [vmem:[#allocation2] sm:$0xff] %v4656_v0  ;;  %308 = vst [vmem:[#allocation2 + $0x8] sm:$0xff] %v4656_v0  ;;  %4427 = vset.pattern.permute.xlu1 %v4657_v60  ;;  %4428 = vset.pattern.permute.xlu0 %v4657_v60  ;;  %v351_v62 = vld [vmem:[%s6030_s0 + $0x10] sm:$0xff]  ;;  %v352_v63 = vld [vmem:[%s6030_s0 + $0x18] sm:$0xff] }
   0xf   : > { %309 = vst [vmem:[#allocation2 + $0x10] sm:$0xff] %v4656_v0  ;;  %310 = vst [vmem:[#allocation2 + $0x18] sm:$0xff] %v4656_v0  ;;  %s6053_s28 = smov (!%p4712_p3, %s3516_s28), 1  ;;  %v341_v32 = vand.u32 127, %v340_v31  ;;  %671 = vperm.xlu1 %4427, %v349_v59  }
  0x10   : > { %311 = vst [vmem:[#allocation2 + $0x20] sm:$0xff] %v4656_v0  ;;  %312 = vst [vmem:[#allocation2 + $0x28] sm:$0xff] %v4656_v0  ;;  %s3866_s30 = sshll.u32 %s6053_s28, 6 }
  0x11   : > { %313 = vst [vmem:[#allocation2 + $0x30] sm:$0xff] %v4656_v0  ;;  %314 = vst [vmem:[#allocation2 + $0x38] sm:$0xff] %v4656_v0  ;;  %s4726_s11 = scalar_lea.vmem %s6037_s7, %s3866_s30  ;;  %vm342_vm1 = vcmp.lt.s32.totalorder %v341_v32, 4  ;;  %v4453_v32 = vld [vmem:[%s6033_s3 + $0x170] sm:$0xff]  }
  0x12   : > { %345 = vst [vmem:[#allocation3] sm:$0xff] %v4656_v0  ;;  %346 = vst [vmem:[#allocation3 + $0x8] sm:$0xff] %v4656_v0  ;;  %v315_v1 = vld [vmem:[%s4726_s11] sm:$0xff]  ;;  %v316_v2 = vld [vmem:[%s4726_s11 + $0x8] sm:$0xff]  ;;  %v4745_v33 = vsel %vm342_vm1, 1.0, %v4656_v0 }
  0x13   : > { %347 = vst [vmem:[#allocation3 + $0x50] sm:$0xff] %v4656_v0  ;;  %348 = vst [vmem:[#allocation3 + $0x58] sm:$0xff] %v4656_v0  ;;  %v317_v3 = vld [vmem:[%s4726_s11 + $0x10] sm:$0xff]  ;;  %v318_v4 = vld [vmem:[%s4726_s11 + $0x18] sm:$0xff]  ;;  %676 = vperm.xlu1 %4427, %v350_v61  }
  0x14   : > { %v319_v5 = vld [vmem:[%s4726_s11 + $0x20] sm:$0xff]  ;;  %v320_v6 = vld [vmem:[%s4726_s11 + $0x28] sm:$0xff]  ;;  %324 = vst.msk [vmem:[#allocation2] sm:$0xff] %vm323_vm0, %v315_v1  ;;  %325 = vst.msk [vmem:[#allocation2 + $0x8] sm:$0xff] %vm323_vm0, %v316_v2  ;;  %v4658_v2 = vmov 1  }
  0x15   : > { %326 = vst.msk [vmem:[#allocation2 + $0x10] sm:$0xff] %vm323_vm0, %v317_v3  ;;  %v321_v7 = vld [vmem:[%s4726_s11 + $0x30] sm:$0xff]  ;;  %v322_v8 = vld [vmem:[%s4726_s11 + $0x38] sm:$0xff]  ;;  %327 = vst.msk [vmem:[#allocation2 + $0x18] sm:$0xff] %vm323_vm0, %v318_v4 }
  0x16   : > { %328 = vst.msk [vmem:[#allocation2 + $0x20] sm:$0xff] %vm323_vm0, %v319_v5  ;;  %329 = vst.msk [vmem:[#allocation2 + $0x28] sm:$0xff] %vm323_vm0, %v320_v6  ;;  %v353_v0 = vld [vmem:[%s6030_s0 + $0x20] sm:$0xff]  ;;  %v355_v1 = vld [vmem:[%s6030_s0 + $0x30] sm:$0xff] }
  0x17   : > { %330 = vst.msk [vmem:[#allocation2 + $0x30] sm:$0xff] %vm323_vm0, %v321_v7  ;;  %331 = vst.msk [vmem:[#allocation2 + $0x38] sm:$0xff] %vm323_vm0, %v322_v8  ;;  %686 = vperm.xlu1 %4427, %v352_v63   ;;  %v354_v3 = vld [vmem:[%s6030_s0 + $0x28] sm:$0xff]  ;;  %v356_v4 = vld [vmem:[%s6030_s0 + $0x38] sm:$0xff] }
  0x1b   : > { %v332_v9 = vld [vmem:[#allocation2] sm:$0xff]  ;;  %v333_v10 = vld [vmem:[#allocation2 + $0x8] sm:$0xff]  ;;  %691 = vperm.xlu1 %4427, %v353_v0  }
  0x1c   : > { %v334_v11 = vld [vmem:[#allocation2 + $0x10] sm:$0xff]  ;;  %v357_v12 = vadd.f32 %v333_v10, %v332_v9  ;;  %v335_v13 = vld [vmem:[#allocation2 + $0x18] sm:$0xff] }
  0x1d   : > { %v336_v14 = vld [vmem:[#allocation2 + $0x20] sm:$0xff]  ;;  %v337_v16 = vld [vmem:[#allocation2 + $0x28] sm:$0xff] }
  0x1e   : > { %v358_v15 = vadd.f32 %v357_v12, %v334_v11  ;;  %v338_v18 = vld [vmem:[#allocation2 + $0x30] sm:$0xff]  ;;  %v339_v20 = vld [vmem:[#allocation2 + $0x38] sm:$0xff]  ;;  %v4435_v12 = vld [vmem:[%s6033_s3 + $0x140] sm:$0xff]  }
  0x1f   : > { %696 = vperm.xlu1 %4427, %v354_v3   ;;  %4180 = vmatprep.subr.bf16.mxu1 %v4435_v12 }
  0x20   : > { %v359_v17 = vadd.f32 %v358_v15, %v335_v13  ;;  %v4438_v15 = vld [vmem:[%s6033_s3 + $0x148] sm:$0xff]   ;;  %4181 = vmatpush3.bf16.msra.mxu1 %v4435_v12 }
  0x21   : > { %4182 = vmatprep.subr.bf16.mxu1 %v4438_v15 }
  0x22   : > { %v360_v19 = vadd.f32 %v359_v17, %v336_v14 }
  0x23   : > { %4429 = vset.pattern.permute.xlu1 %v4658_v2 }
  0x24   : > { %v361_v21 = vadd.f32 %v360_v19, %v337_v16  ;;  %750 = vperm.xlu1 %4429, %v349_v59   ;;  %4183 = vmatpush3.bf16.msra.mxu1 %v4438_v15  ;;  %v4441_v19 = vld [vmem:[%s6033_s3 + $0x150] sm:$0xff]  }
  0x25   : > { %4184 = vmatprep.subr.bf16.mxu1 %v4441_v19 }
  0x26   : > { %v362_v22 = vadd.f32 %v361_v21, %v338_v18  ;;  %v4442_v21 = vld [vmem:[%s6033_s3 + $0x118] sm:$0xff]  }
  0x28   : > { %v363_v23 = vadd.f32 %v362_v22, %v339_v20  ;;  %754 = vperm.xlu1 %4429, %v350_v61   ;;  %4185 = vmatpush3.bf16.msra.mxu1 %v4441_v19  ;;  %v4444_v22 = vld [vmem:[%s6033_s3 + $0x158] sm:$0xff]  }
  0x29   : > { %4186 = vmatprep.subr.bf16.mxu1 %v4444_v22 }
  0x2a   : > { %364 = vadd.xlane.f32.xlu0 %v363_v23  ;;  %v4443_v23 = vld [vmem:[%s6033_s3 + $0xd8] sm:$0xff]  }
  0x2c   : > { %758 = vperm.xlu1 %4429, %v351_v62   ;;  %4187 = vmatpush3.bf16.msra.mxu1 %v4444_v22 }
  0x30   : > { %762 = vperm.xlu1 %4429, %v352_v63  }
  0x34   : > { %4430 = vset.pattern.permute.xlu1 %v4657_v60 }
  0x35   : > { %701 = vperm.xlu1 %4430, %v355_v1  }
  0x39   : > { %706 = vperm.xlu1 %4430, %v356_v4  }
  0x3d   : > { %4431 = vset.pattern.permute.xlu1 %v4658_v2 }
  0x3e   : > { %766 = vperm.xlu1 %4431, %v353_v0  }
  0x42   : > { %770 = vperm.xlu1 %4431, %v354_v3  }
  0x46   : > { %778 = vperm.xlu1 %4431, %v356_v4  }
  0xb7   : > { %v365_v24 = vpop.xlane.xlu0 %364 }
  0xb8   : > { %v366_v25 = vrot.slane %v365_v24, 4 }
  0xba   : > { %v367_v26 = vadd.f32 %v366_v25, %v365_v24  ;;  %v4445_v24 = vld [vmem:[%s6033_s3 + $0x120] sm:$0xff]  }
  0xbb   : > { %v4447_v25 = vld [vmem:[%s6033_s3 + $0x160] sm:$0xff]  }
  0xbc   : > { %v368_v27 = vrot.slane %v367_v26, 2  ;;  %4188 = vmatprep.subr.bf16.mxu1 %v4447_v25 }
  0xbd   : > { %4189 = vmatpush3.bf16.msra.mxu1 %v4447_v25 }
  0xbe   : > { %v369_v28 = vadd.f32 %v368_v27, %v367_v26  ;;  %v4446_v26 = vld [vmem:[%s6033_s3 + $0xe0] sm:$0xff]   ;;  %v4448_v27 = vld [vmem:[%s6033_s3 + $0x128] sm:$0xff]  }
  0xc0   : > { %v370_v29 = vrot.slane %v369_v28, 1 }
  0xc2   : > { %v371_v30 = vadd.f32 %v370_v29, %v369_v28  ;;  %v4450_v28 = vld [vmem:[%s6033_s3 + $0x168] sm:$0xff]  }
  0xc3   : > { %v4449_v29 = vld [vmem:[%s6033_s3 + $0xe8] sm:$0xff]   ;;  %4190 = vmatprep.subr.bf16.mxu1 %v4450_v28 }
  0xc4   : > { %4404 = vpush %v371_v30  ;;  %4191 = vmatpush3.bf16.msra.mxu1 %v4450_v28  ;;  %v4451_v30 = vld [vmem:[%s6033_s3 + $0x130] sm:$0xff]  }
  0xc5   : > { %4192 = vmatprep.subr.bf16.mxu1 %v4453_v32 }
  0xc8   : > { %4193 = vmatpush3.bf16.msra.mxu1 %v4453_v32 }
  0xf5   : > { %s4405_s12 = spop %4404 }
  0xf6   : > { %s373_s13 = smul.f32 0.00390625, %s4405_s12 }
  0xf8   : > { %v374_v34 = vstv %s373_s13 }
  0xf9   : > { %v375_v35 = vmul.f32 %v4745_v33, %v374_v34  ;;  %v4452_v34 = vld [vmem:[%s6033_s3 + $0xf0] sm:$0xff]  }
  0xfb   : > { %v4748_v36 = vsub.f32 %v332_v9, %v375_v35  ;;  %v4750_v37 = vsub.f32 %v333_v10, %v375_v35  ;;  %v4752_v38 = vsub.f32 %v334_v11, %v375_v35  ;;  %v4754_v39 = vsub.f32 %v335_v13, %v375_v35  ;;  %v4433_v10 = vld [vmem:[%s6033_s3 + $0x100] sm:$0xff]   ;;  %v4436_v13 = vld [vmem:[%s6033_s3 + $0x108] sm:$0xff]  }
  0xfc   : > { %v4760_v42 = vsub.f32 %v336_v14, %v375_v35  ;;  %v4764_v45 = vsub.f32 %v337_v16, %v375_v35  ;;  %v4768_v48 = vsub.f32 %v338_v18, %v375_v35  ;;  %v4772_v51 = vsub.f32 %v339_v20, %v375_v35  ;;  %v4434_v11 = vld [vmem:[%s6033_s3 + $0xc0] sm:$0xff]   ;;  %3868 = vmatprep.subr.bf16.mxu0 %v4433_v10  ;;  %v4437_v16 = vld [vmem:[%s6033_s3 + $0xc8] sm:$0xff]   ;;  %v4439_v18 = vld [vmem:[%s6033_s3 + $0x110] sm:$0xff]  }
  0xfd   : > { %v384_v40 = vmul.f32 %v4748_v36, %v4748_v36  ;;  %v385_v41 = vmul.f32 %v4750_v37, %v4750_v37  ;;  %v386_v43 = vmul.f32 %v4752_v38, %v4752_v38  ;;  %v387_v46 = vmul.f32 %v4754_v39, %v4754_v39  ;;  %3869 = vmatpush3.bf16.msra.mxu0 %v4434_v11  ;;  %v4440_v20 = vld [vmem:[%s6033_s3 + $0xd0] sm:$0xff]  }
  0xfe   : > { %v388_v49 = vmul.f32 %v4760_v42, %v4760_v42  ;;  %v389_v52 = vmul.f32 %v4764_v45, %v4764_v45  ;;  %v390_v54 = vmul.f32 %v4768_v48, %v4768_v48  ;;  %v391_v56 = vmul.f32 %v4772_v51, %v4772_v51  ;;  %3870 = vmatprep.subr.bf16.mxu0 %v4436_v13 }
  0xff   : > { %v392_v44 = vadd.f32 %v385_v41, %v384_v40  ;;  %v4454_v40 = vld [vmem:[%s6033_s3 + $0x138] sm:$0xff]  }
 0x100   : > { %v4456_v41 = vld [vmem:[%s6033_s3 + $0x178] sm:$0xff]  }
 0x101   : > { %v393_v47 = vadd.f32 %v392_v44, %v386_v43  ;;  %3871 = vmatpush3.bf16.msra.mxu0 %v4437_v16  ;;  %v4455_v43 = vld [vmem:[%s6033_s3 + $0xf8] sm:$0xff]   ;;  %4194 = vmatprep.subr.bf16.mxu1 %v4456_v41  ;;  %v4457_v44 = vld [vmem:[%s6033_s3 + $0x40] sm:$0xff]  }
 0x102   : > { %3872 = vmatprep.subr.bf16.mxu0 %v4439_v18  ;;  %4195 = vmatpush3.bf16.msra.mxu1 %v4456_v41 }
 0x103   : > { %v394_v50 = vadd.f32 %v393_v47, %v387_v46  ;;  %v4882_v46 = vld [vmem:[%s6033_s3 + $0x80] sm:$0xff]  }
 0x104   : > { %4204 = vmatprep.subr.bf16.mxu1 %v4882_v46 }
 0x105   : > { %v395_v53 = vadd.f32 %v394_v50, %v388_v49  ;;  %3873 = vmatpush3.bf16.msra.mxu0 %v4440_v20  ;;  %v4886_v49 = vshrl.u32 %v340_v31, 7  ;;  %v413_v50 = vld [vmem:[%s6031_s1] sm:$0x1] }
 0x106   : > { %3874 = vmatprep.subr.bf16.mxu0 %v4442_v21 }
 0x107   : > { %v396_v55 = vadd.f32 %v395_v53, %v389_v52  ;;  %v419_v52 = vsub.s32 0, %v4886_v49 }
 0x109   : > { %v397_v57 = vadd.f32 %v396_v55, %v390_v54  ;;  %3875 = vmatpush3.bf16.msra.mxu0 %v4443_v23  ;;  %v4892_v55 = vpop.permute.xlu1 %671 }
 0x10a   : > { %3876 = vmatprep.subr.bf16.mxu0 %v4445_v24 }
 0x10b   : > { %v398_v58 = vadd.f32 %v397_v57, %v391_v56  ;;  %v3526_v57 = vld [vmem:[%s6032_s2] ss:$0 sm:$0xff] }
 0x10d   : > { %399 = vadd.xlane.f32.xlu0 %v398_v58  ;;  %3877 = vmatpush3.bf16.msra.mxu0 %v4446_v26  ;;  %v4903_v61 = vpop.permute.xlu1 %676 }
 0x10e   : > { %3878 = vmatprep.subr.bf16.mxu0 %v4448_v27 }
 0x111   : > { %3879 = vmatpush3.bf16.msra.mxu0 %v4449_v29 }
 0x112   : > { %3880 = vmatprep.subr.bf16.mxu0 %v4451_v30 }
 0x115   : > { %3881 = vmatpush3.bf16.msra.mxu0 %v4452_v34 }
 0x116   : > { %3882 = vmatprep.subr.bf16.mxu0 %v4454_v40 }
 0x119   : > { %3883 = vmatpush3.bf16.msra.mxu0 %v4455_v43 }
 0x11a   : > { %3920 = vmatprep.subr.bf16.mxu0 %v4457_v44 }
 0x123   : > { %681 = vperm.xlu0 %4428, %v351_v62  }
 0x127   : > { %4432 = vset.pattern.permute.xlu0 %v4658_v2 }
 0x128   : > { %774 = vperm.xlu0 %4432, %v355_v1  }
 0x19a   : > { %v400_v5 = vpop.xlane.xlu0 %399 }
 0x19b   : > { %v401_v6 = vrot.slane %v400_v5, 4 }
 0x19d   : > { %v402_v7 = vadd.f32 %v401_v6, %v400_v5 }
 0x19f   : > { %v403_v8 = vrot.slane %v402_v7, 2 }
 0x1a1   : > { %v404_v9 = vadd.f32 %v403_v8, %v402_v7  ;;  %v4923_v8 = vpop.permute.xlu1 %686 }
 0x1a3   : > { %v405_v14 = vrot.slane %v404_v9, 1 }
 0x1a5   : > { %v406_v17 = vadd.f32 %v405_v14, %v404_v9  ;;  %v4935_v20 = vpop.permute.xlu1 %691 }
 0x1a6   : > { %6046 = vst [vmem:[#allocation5_spill] sm:$0xff] %v4935_v20 }
 0x1a7   : > { %4406 = vpush %v406_v17 }
 0x1a9   : > { %v4950_v43 = vpop.permute.xlu1 %696 }
 0x1d8   : > { %s4407_s12 = spop %4406 }
 0x1d9   : > { %s408_s13 = smul.f32 0.00390625, %s4407_s12 }
 0x1db   : > { %s409_s14 = sadd.f32 1e-05, %s408_s13 }
 0x1dd   : > { %v410_v35 = vstv %s409_s14  ;;  %s6000_s14 = scalar_lea.vmem %s6038_s8, %s3866_s30 }
 0x1de   : > { %4577 = vrsqrt.f32 %v410_v35 }
 0x1e8   : > { %v4578_v47 = vpop.eup %4577 }
 0x1e9   : > { %4408 = vpush %v4578_v47 }
 0x21a   : > { %s4409_s15 = spop %4408 }
 0x21b   : > { %v414_v53 = vstv %s4409_s15 }
 0x21c   : > { %v415_v54 = vmul.f32 %v414_v53, %v413_v50 }
 0x21e   : > { %v420_v56 = vrot.slane %v415_v54, %v419_v52 }
 0x220   : > { %v426_v31 = vmul.f32 %v420_v56, %v4760_v42  ;;  %v427_v58 = vmul.f32 %v420_v56, %v4764_v45  ;;  %v422_v59 = vmul.f32 %v420_v56, %v4748_v36  ;;  %v423_v60 = vmul.f32 %v420_v56, %v4750_v37 }
 0x221   : > { %v424_v2 = vmul.f32 %v420_v56, %v4752_v38  ;;  %v425_v5 = vmul.f32 %v420_v56, %v4754_v39  ;;  %v428_v6 = vmul.f32 %v420_v56, %v4768_v48  ;;  %v429_v39 = vmul.f32 %v420_v56, %v4772_v51 }
 0x222   : > { %v441_v62 = vadd.f32 %v3526_v57, %v426_v31  ;;  %v442_v63 = vadd.f32 %v3526_v57, %v427_v58  ;;  %v437_v0 = vadd.f32 %v3526_v57, %v422_v59  ;;  %v4905_v1 = vadd.f32 %v3526_v57, %v423_v60 }
 0x223   : > { %v4925_v11 = vadd.f32 %v3526_v57, %v424_v2  ;;  %v4927_v16 = vadd.f32 %v3526_v57, %v425_v5  ;;  %v4929_v17 = vadd.f32 %v3526_v57, %v428_v6  ;;  %v4945_v26 = vadd.f32 %v3526_v57, %v429_v39 }
 0x224   : > { %v4908_v3 = vmul.f32 0.70710677, %v441_v62  ;;  %v4910_v4 = vmul.f32 0.70710677, %v442_v63  ;;  %v4912_v42 = vmul.f32 0.70710677, %v437_v0 }
 0x225   : > { %v4915_v45 = vmul.f32 0.70710677, %v4905_v1  ;;  %v4933_v18 = vmul.f32 0.70710677, %v4925_v11  ;;  %v4939_v22 = vmul.f32 0.70710677, %v4927_v16 }
 0x226   : > { %v457_v36 = vand.u32 2147483647, %v4908_v3  ;;  %v458_v37 = vand.u32 2147483647, %v4910_v4  ;;  %v453_v7 = vand.u32 2147483647, %v4912_v42 }
 0x227   : > { %v454_v38 = vand.u32 2147483647, %v4915_v45  ;;  %v455_v21 = vand.u32 2147483647, %v4933_v18  ;;  %v4942_v24 = vmul.f32 0.70710677, %v4929_v17 }
 0x228   : > { %v465_v9 = vmul.f32 0.3275911, %v457_v36  ;;  %v466_v10 = vmul.f32 0.3275911, %v458_v37  ;;  %v461_v12 = vmul.f32 0.3275911, %v453_v7 }
 0x229   : > { %v462_v13 = vmul.f32 0.3275911, %v454_v38  ;;  %v561_v23 = vsub.f32 0.0, %v457_v36  ;;  %v463_v51 = vmul.f32 0.3275911, %v455_v21  ;;  %v562_v27 = vsub.f32 0.0, %v458_v37 }
 0x22a   : > { %v473_v14 = vadd.f32 1.0, %v465_v9  ;;  %v474_v15 = vadd.f32 1.0, %v466_v10  ;;  %v469_v48 = vadd.f32 1.0, %v461_v12  ;;  %v456_v25 = vand.u32 2147483647, %v4939_v22 }
 0x22b   : > { %v470_v19 = vadd.f32 1.0, %v462_v13  ;;  %v557_v28 = vsub.f32 0.0, %v453_v7  ;;  %v459_v29 = vand.u32 2147483647, %v4942_v24  ;;  %v558_v30 = vsub.f32 0.0, %v454_v38  ;;  %v4968_v13 = vpop.permute.xlu1 %750 }
 0x22c   : > { %4579 = vrcp.f32 %v473_v14  ;;  %v471_v32 = vadd.f32 1.0, %v463_v51  ;;  %v464_v34 = vmul.f32 0.3275911, %v456_v25  ;;  %v569_v35 = vmul.f32 %v561_v23, %v457_v36 }
 0x22d   : > { %4581 = vrcp.f32 %v474_v15  ;;  %v4948_v40 = vmul.f32 0.5, %v441_v62  ;;  %v467_v41 = vmul.f32 0.3275911, %v459_v29  ;;  %v4952_v44 = vmul.f32 0.5, %v442_v63 }
 0x22e   : > { %4583 = vrcp.f32 %v469_v48  ;;  %v472_v47 = vadd.f32 1.0, %v464_v34  ;;  %v4955_v50 = vmul.f32 0.70710677, %v4945_v26  ;;  %v570_v53 = vmul.f32 %v562_v27, %v458_v37 }
 0x22f   : > { %4585 = vrcp.f32 %v470_v19  ;;  %v565_v54 = vmul.f32 %v557_v28, %v453_v7  ;;  %v559_v56 = vsub.f32 0.0, %v455_v21  ;;  %v475_v57 = vadd.f32 1.0, %v467_v41 }
 0x230   : > { %4587 = vrcp.f32 %v471_v32  ;;  %v566_v58 = vmul.f32 %v558_v30, %v454_v38  ;;  %v4959_v59 = vmul.f32 0.5, %v437_v0  ;;  %v560_v60 = vsub.f32 0.0, %v456_v25 }
 0x231   : > { %v460_v62 = vand.u32 2147483647, %v4955_v50  ;;  %v581_v36 = vmul.f32 1.442695, %v569_v35  ;;  %4589 = vrcp.f32 %v472_v47  ;;  %v563_v5 = vsub.f32 0.0, %v459_v29 }
 0x232   : > { %4591 = vrcp.f32 %v475_v57  ;;  %v583_v10 = vmul.f32 1.442695, %v570_v53  ;;  %v573_v38 = vmul.f32 1.442695, %v565_v54  ;;  %v567_v0 = vmul.f32 %v559_v56, %v455_v21  ;;  %v4981_v57 = vpop.permute.xlu1 %754 }
 0x233   : > { %v468_v6 = vmul.f32 0.3275911, %v460_v62  ;;  %v564_v7 = vsub.f32 0.0, %v460_v62  ;;  %v575_v15 = vmul.f32 1.442695, %v566_v58  ;;  %v568_v39 = vmul.f32 %v560_v60, %v456_v25 }
 0x234   : > { %4593 = vpow2.f32 %v581_v36  ;;  %v571_v27 = vmul.f32 %v563_v5, %v459_v29  ;;  %v577_v35 = vmul.f32 1.442695, %v567_v0  ;;  %vm609_vm2 = vcmp.ge.f32.partialorder %v4908_v3, 0.0 }
 0x235   : > { %v476_v48 = vadd.f32 1.0, %v468_v6  ;;  %v572_v30 = vmul.f32 %v564_v7, %v460_v62  ;;  %v579_v53 = vmul.f32 1.442695, %v568_v39  ;;  %vm610_vm3 = vcmp.ge.f32.partialorder %v4910_v4, 0.0 }
 0x236   : > { %v4957_v31 = vpop.eup %4579  ;;  %v585_v62 = vmul.f32 1.442695, %v571_v27  ;;  %vm605_vm4 = vcmp.ge.f32.partialorder %v4912_v42, 0.0  ;;  %vm606_vm5 = vcmp.ge.f32.partialorder %v4915_v45, 0.0  ;;  %vm607_vm6 = vcmp.ge.f32.partialorder %v4933_v18, 0.0 }
 0x237   : > { %v4962_v2 = vpop.eup %4581  ;;  %v489_v63 = vmul.f32 1.0614054, %v4957_v31  ;;  %4595 = vrcp.f32 %v476_v48  ;;  %vm608_vm7 = vcmp.ge.f32.partialorder %v4939_v22, 0.0  ;;  %vm611_vm8 = vcmp.ge.f32.partialorder %v4942_v24, 0.0 }
 0x238   : > { %v490_v37 = vmul.f32 1.0614054, %v4962_v2  ;;  %v4966_v12 = vpop.eup %4583  ;;  %4597 = vpow2.f32 %v583_v10  ;;  %v635_v22 = vmul.f32 0.5, %v4929_v17  ;;  %vm612_vm9 = vcmp.ge.f32.partialorder %v4955_v50, 0.0  ;;  %v4458_v50 = vld [vmem:[%s6033_s3] sm:$0xff]  }
 0x239   : > { %v497_v9 = vadd.f32 -1.4531521, %v489_v63  ;;  %v4970_v19 = vpop.eup %4585  ;;  %v485_v51 = vmul.f32 1.0614054, %v4966_v12  ;;  %4599 = vpow2.f32 %v573_v38  ;;  %v587_v63 = vmul.f32 1.442695, %v572_v30 }
 0x23a   : > { %v498_v14 = vadd.f32 -1.4531521, %v490_v37  ;;  %v486_v21 = vmul.f32 1.0614054, %v4970_v19  ;;  %v4976_v25 = vpop.eup %4587  ;;  %4601 = vpow2.f32 %v575_v15 }
 0x23b   : > { %v505_v23 = vmul.f32 %v4957_v31, %v497_v9  ;;  %v493_v34 = vadd.f32 -1.4531521, %v485_v51  ;;  %v487_v56 = vmul.f32 1.0614054, %v4976_v25  ;;  %v4985_v36 = vpop.eup %4589  ;;  %4603 = vpow2.f32 %v577_v35 }
 0x23c   : > { %v506_v28 = vmul.f32 %v4962_v2, %v498_v14  ;;  %v494_v47 = vadd.f32 -1.4531521, %v486_v21  ;;  %v4987_v7 = vpop.eup %4591  ;;  %v488_v38 = vmul.f32 1.0614054, %v4985_v36  ;;  %4605 = vpow2.f32 %v579_v53 }
 0x23d   : > { %v513_v32 = vadd.f32 1.4214138, %v505_v23  ;;  %v501_v29 = vmul.f32 %v4966_v12, %v493_v34  ;;  %v495_v6 = vadd.f32 -1.4531521, %v487_v56  ;;  %v491_v39 = vmul.f32 1.0614054, %v4987_v7  ;;  %v4998_v34 = vpop.permute.xlu1 %758 }
 0x23e   : > { %v514_v41 = vadd.f32 1.4214138, %v506_v28  ;;  %v502_v60 = vmul.f32 %v4970_v19, %v494_v47  ;;  %v496_v51 = vadd.f32 -1.4531521, %v488_v38  ;;  %4607 = vpow2.f32 %v585_v62  ;;  %v4594_v27 = vpop.eup %4593 }
 0x23f   : > { %v521_v54 = vmul.f32 %v4957_v31, %v513_v32  ;;  %v509_v37 = vadd.f32 1.4214138, %v501_v29  ;;  %v503_v15 = vmul.f32 %v4976_v25, %v495_v6  ;;  %4609 = vpow2.f32 %v587_v63 }
 0x240   : > { %v522_v58 = vmul.f32 %v4962_v2, %v514_v41  ;;  %v510_v10 = vadd.f32 1.4214138, %v502_v60  ;;  %v504_v47 = vmul.f32 %v4985_v36, %v496_v51  ;;  %v499_v53 = vadd.f32 -1.4531521, %v491_v39 }
 0x241   : > { %v529_v5 = vadd.f32 -0.28449672, %v521_v54  ;;  %v517_v14 = vmul.f32 %v4966_v12, %v509_v37  ;;  %v511_v30 = vadd.f32 1.4214138, %v503_v15  ;;  %v4996_v32 = vpop.eup %4595 }
 0x242   : > { %v530_v9 = vadd.f32 -0.28449672, %v522_v58  ;;  %v518_v23 = vmul.f32 %v4970_v19, %v510_v10  ;;  %v4598_v54 = vpop.eup %4597  ;;  %v492_v60 = vmul.f32 1.0614054, %v4996_v32  ;;  %v512_v37 = vadd.f32 1.4214138, %v504_v47 }
 0x243   : > { %v537_v0 = vmul.f32 %v4957_v31, %v529_v5  ;;  %v525_v21 = vadd.f32 -0.28449672, %v517_v14  ;;  %v519_v58 = vmul.f32 %v4976_v25, %v511_v30  ;;  %v4600_v62 = vpop.eup %4599  ;;  %v507_v6 = vmul.f32 %v4987_v7, %v499_v53  ;;  %v5016_v30 = vpop.permute.xlu1 %762 }
 0x244   : > { %v538_v48 = vmul.f32 %v4962_v2, %v530_v9  ;;  %v526_v41 = vadd.f32 -0.28449672, %v518_v23  ;;  %v4602_v9 = vpop.eup %4601  ;;  %v520_v39 = vmul.f32 %v4985_v36, %v512_v37 }
 0x245   : > { %v545_v28 = vadd.f32 0.2548296, %v537_v0  ;;  %v533_v56 = vmul.f32 %v4966_v12, %v525_v21  ;;  %v500_v0 = vadd.f32 -1.4531521, %v492_v60  ;;  %v4604_v23 = vpop.eup %4603 }
 0x246   : > { %v546_v35 = vadd.f32 0.2548296, %v538_v48  ;;  %v534_v5 = vmul.f32 %v4970_v19, %v526_v41  ;;  %v515_v48 = vadd.f32 1.4214138, %v507_v6  ;;  %v4606_v21 = vpop.eup %4605  ;;  %v528_v47 = vadd.f32 -0.28449672, %v520_v39 }
 0x247   : > { %v553_v29 = vmul.f32 %v4957_v31, %v545_v28  ;;  %v541_v38 = vadd.f32 0.2548296, %v533_v56  ;;  %v527_v31 = vadd.f32 -0.28449672, %v519_v58  ;;  %v5031_v3 = vpop.permute.xlu1 %701 }
 0x248   : > { %v554_v63 = vmul.f32 %v4962_v2, %v546_v35  ;;  %v542_v15 = vadd.f32 0.2548296, %v534_v5  ;;  %v523_v53 = vmul.f32 %v4987_v7, %v515_v48  ;;  %v536_v5 = vmul.f32 %v4985_v36, %v528_v47  ;;  %6047 = vst [vmem:[#allocation6_spill] sm:$0xff] %v5031_v3 }
 0x249   : > { %v593_v10 = vmul.f32 %v4594_v27, %v553_v29  ;;  %v549_v2 = vmul.f32 %v4966_v12, %v541_v38  ;;  %v535_v28 = vmul.f32 %v4976_v25, %v527_v31  ;;  %v508_v27 = vmul.f32 %v4996_v32, %v500_v0  ;;  %v4608_v12 = vpop.eup %4607 }
 0x24a   : > { %v594_v14 = vmul.f32 %v4598_v54, %v554_v63  ;;  %v550_v41 = vmul.f32 %v4970_v19, %v542_v15  ;;  %v531_v37 = vadd.f32 -0.28449672, %v523_v53  ;;  %v4610_v6 = vpop.eup %4609  ;;  %v544_v15 = vadd.f32 0.2548296, %v536_v5 }
 0x24b   : > { %v601_v51 = vsub.f32 1.0, %v593_v10  ;;  %v589_v29 = vmul.f32 %v4600_v62, %v549_v2  ;;  %v543_v56 = vadd.f32 0.2548296, %v535_v28  ;;  %v516_v58 = vadd.f32 1.4214138, %v508_v27  ;;  %v5052_v5 = vpop.permute.xlu1 %706 }
 0x24c   : > { %v602_v35 = vsub.f32 1.0, %v594_v14  ;;  %v590_v63 = vmul.f32 %v4602_v9, %v550_v41  ;;  %v539_v2 = vmul.f32 %v4987_v7, %v531_v37  ;;  %6048 = vst [vmem:[#allocation7_spill] sm:$0xff] %v5052_v5 }
 0x24d   : > { %v617_v54 = vsub.f32 0.0, %v601_v51  ;;  %v597_v38 = vsub.f32 1.0, %v589_v29  ;;  %v551_v19 = vmul.f32 %v4976_v25, %v543_v56  ;;  %v524_v31 = vmul.f32 %v4996_v32, %v516_v58 }
 0x24e   : > { %v618_v60 = vsub.f32 0.0, %v602_v35  ;;  %v598_v14 = vsub.f32 1.0, %v590_v63  ;;  %v552_v25 = vmul.f32 %v4985_v36, %v544_v15  ;;  %v547_v47 = vadd.f32 0.2548296, %v539_v2 }
 0x24f   : > { %v625_v10 = vsel %vm609_vm2, %v601_v51, %v617_v54  ;;  %v613_v9 = vsub.f32 0.0, %v597_v38  ;;  %v591_v48 = vmul.f32 %v4604_v23, %v551_v19  ;;  %v532_v27 = vadd.f32 -0.28449672, %v524_v31  ;;  %v5068_v15 = vpop.permute.xlu1 %766 }
 0x250   : > { %v626_v62 = vsel %vm610_vm3, %v602_v35, %v618_v60  ;;  %v641_v0 = vadd.f32 1.0, %v625_v10  ;;  %v614_v51 = vsub.f32 0.0, %v598_v14  ;;  %v592_v53 = vmul.f32 %v4606_v21, %v552_v25 }
 0x251   : > { %v642_v39 = vadd.f32 1.0, %v626_v62  ;;  %v621_v35 = vsel %vm605_vm4, %v597_v38, %v613_v9  ;;  %v599_v41 = vsub.f32 1.0, %v591_v48  ;;  %v540_v54 = vmul.f32 %v4996_v32, %v532_v27 }
 0x252   : > { %v5029_v28 = vmul.f32 %v641_v0, %v4948_v40  ;;  %v622_v40 = vsel %vm606_vm5, %v598_v14, %v614_v51  ;;  %v637_v23 = vadd.f32 1.0, %v621_v35  ;;  %v630_v36 = vmul.f32 0.5, %v4905_v1 }
 0x253   : > { %v5035_v4 = vmul.f32 %v642_v39, %v4952_v44  ;;  %v638_v44 = vadd.f32 1.0, %v622_v40  ;;  %v615_v29 = vsub.f32 0.0, %v599_v41  ;;  %v555_v42 = vmul.f32 %v4987_v7, %v547_v47  ;;  %v4460_v40 = vld [vmem:[%s6033_s3 + $0x48] sm:$0xff]  }
 0x254   : > { %657 = vst [vmem:[#allocation3 + $0x30] sm:$0xff] %v5029_v28  ;;  %v5047_v56 = vmul.f32 %v637_v23, %v4959_v59  ;;  %v600_v58 = vsub.f32 1.0, %v592_v53  ;;  %v548_v45 = vadd.f32 0.2548296, %v540_v54  ;;  %v631_v1 = vmul.f32 0.5, %v4925_v11  ;;  %v5101_v53 = vpop.permute.xlu0 %681 }
 0x255   : > { %658 = vst [vmem:[#allocation3 + $0x38] sm:$0xff] %v5035_v4  ;;  %v5050_v60 = vmul.f32 %v638_v44, %v630_v36  ;;  %v623_v21 = vsel %vm607_vm6, %v599_v41, %v615_v29  ;;  %v595_v63 = vmul.f32 %v4608_v12, %v555_v42  ;;  %v632_v31 = vmul.f32 0.5, %v4927_v16  ;;  %v4461_v42 = vld [vmem:[%s6033_s3 + $0x8] sm:$0xff]  }
 0x256   : > { %653 = vst [vmem:[#allocation3 + $0x10] sm:$0xff] %v5047_v56  ;;  %v639_v37 = vadd.f32 1.0, %v623_v21  ;;  %v616_v10 = vsub.f32 0.0, %v600_v58  ;;  %v556_v7 = vmul.f32 %v4996_v32, %v548_v45  ;;  %v636_v25 = vmul.f32 0.5, %v4945_v26  ;;  %v5099_v26 = vpop.permute.xlu1 %770 }
 0x257   : > { %654 = vst [vmem:[#allocation3 + $0x18] sm:$0xff] %v5050_v60  ;;  %v881_v18 = vpack.c.bf16 %v5050_v60, %v5047_v56  ;;  %v603_v59 = vsub.f32 1.0, %v595_v63 }
 0x258   : > { %v5061_v38 = vmul.f32 %v639_v37, %v631_v1  ;;  %v624_v12 = vsel %vm608_vm7, %v600_v58, %v616_v10  ;;  %v596_v19 = vmul.f32 %v4610_v6, %v556_v7  ;;  %v4463_v10 = vld [vmem:[%s6033_s3 + $0x50] sm:$0xff]  }
 0x259   : > { %1150 = vmatprep.mubr.bf16.mxu0 %v881_v18  ;;  %v640_v11 = vadd.f32 1.0, %v624_v12  ;;  %v619_v62 = vsub.f32 0.0, %v603_v59 }
 0x25a   : > { %655 = vst [vmem:[#allocation3 + $0x20] sm:$0xff] %v5061_v38  ;;  %v604_v32 = vsub.f32 1.0, %v596_v19 }
 0x25b   : > { %v5066_v0 = vmul.f32 %v640_v11, %v632_v31  ;;  %v627_v14 = vsel %vm611_vm8, %v603_v59, %v619_v62  ;;  %v4462_v31 = vld [vmem:[%s6033_s3 + $0x88] sm:$0xff]   ;;  %v5139_v11 = vpop.permute.xlu1 %778  ;;  %v5141_v62 = vpop.permute.xlu0 %774 }
 0x25c   : > { %v643_v39 = vadd.f32 1.0, %v627_v14  ;;  %v620_v9 = vsub.f32 0.0, %v604_v32  ;;  %v5109_v29 = vld [vmem:[#allocation3 + $0x31] sm:$0xff] }
 0x25d   : > { %v5071_v6 = vld [vmem:[#allocation3 + $0xf] sm:$0xff]  ;;  %656 = vst [vmem:[#allocation3 + $0x28] sm:$0xff] %v5066_v0  ;;  %v882_v36 = vpack.c.bf16 %v5066_v0, %v5061_v38  ;;  %v901_v59 = vmul.f32 %v5109_v29, %v5068_v15 }
 0x25e   : > { %v5075_v16 = vld [vmem:[#allocation3 + $0x17] sm:$0xff]  ;;  %v865_v24 = vmul.f32 %v5071_v6, %v4892_v55  ;;  %v5081_v2 = vmul.f32 %v643_v39, %v635_v22  ;;  %v628_v51 = vsel %vm612_vm9, %v604_v32, %v620_v9  ;;  %v741_v39 = vld [vmem:[#allocation3 + $0x9] sm:$0xff] }
 0x25f   : > { %v5079_v48 = vld [vmem:[#allocation3 + $0x11] sm:$0xff]  ;;  %v866_v17 = vmul.f32 %v5075_v16, %v4903_v61  ;;  %v644_v27 = vadd.f32 1.0, %v628_v51 }
 0x260   : > { %v897_v35 = vmul.f32 %v5079_v48, %v4968_v13  ;;  %659 = vst [vmem:[#allocation3 + $0x40] sm:$0xff] %v5081_v2  ;;  %v4464_v14 = vld [vmem:[%s6033_s3 + $0x10] sm:$0xff]   ;;  %v4466_v9 = vld [vmem:[%s6033_s3 + $0x58] sm:$0xff]  }
 0x261   : > { %v873_v41 = vpack.c.bf16 %v866_v17, %v865_v24  ;;  %v5092_v47 = vld [vmem:[#allocation3 + $0x19] sm:$0xff]  ;;  %v5097_v23 = vmul.f32 %v644_v27, %v636_v25 }
 0x262   : > { %v898_v54 = vmul.f32 %v5092_v47, %v4981_v57  ;;  %v5107_v44 = vld [vmem:[#allocation3 + $0x1f] sm:$0xff]  ;;  %v5151_v24 = vld [vmem:[#allocation3 + $0x37] sm:$0xff] }
 0x263   : > { %1151 = vmatmul.mubr.bf16.vlgmr.msra.gmra.mrb[0].mxu0 %v873_v41  ;;  %660 = vst [vmem:[#allocation3 + $0x48] sm:$0xff] %v5097_v23  ;;  %v867_v7 = vmul.f32 %v5107_v44, %v5101_v53 }
 0x264   : > { %v905_v58 = vpack.c.bf16 %v898_v54, %v897_v35  ;;  %3921 = vmatpush3.bf16.msra.mxu0 %v4458_v50  ;;  %1158 = vmatprep.mubr.bf16.mxu0 %v882_v36  ;;  %v5115_v45 = vld [vmem:[#allocation3 + $0x21] sm:$0xff]  ;;  %v5117_v21 = vld [vmem:[#allocation3 + $0x29] sm:$0xff]  ;;  %v883_v50 = vpack.c.bf16 %v5035_v4, %v5029_v28  ;;  %v782_v54 = vmul.f32 %v5079_v48, %v4981_v57  ;;  %v4467_v36 = vld [vmem:[%s6033_s3 + $0x18] sm:$0xff]  }
 0x265   : > { %v5119_v63 = vld [vmem:[#allocation3 + $0x27] sm:$0xff]  ;;  %v899_v1 = vmul.f32 %v5115_v45, %v4998_v34  ;;  %v900_v37 = vmul.f32 %v5117_v21, %v5016_v30  ;;  %3922 = vmatprep.subr.bf16.mxu0 %v4460_v40  ;;  %v5158_v27 = vld [vmem:[#allocation3 + $0x2f] sm:$0xff]  ;;  %v781_v40 = vmul.f32 %v4968_v13, %v741_v39  ;;  %v4468_v48 = vld [vmem:[%s6033_s3 + $0x98] sm:$0xff]  }
 0x266   : > { %v868_v18 = vmul.f32 %v5119_v63, %v4923_v8  ;;  %4196 = vmatprep.mubr.bf16.mxu1 %v905_v58  ;;  %v4465_v35 = vld [vmem:[%s6033_s3 + $0x90] sm:$0xff]   ;;  %v4469_v4 = vld [vmem:[%s6033_s3 + $0x60] sm:$0xff]   ;;  %v870_v58 = vmul.f32 %v5151_v24, %v4950_v43 }
 0x267   : > { %v906_v12 = vpack.c.bf16 %v900_v37, %v899_v1  ;;  %v5134_v19 = vld [vmem:[#allocation3 + $0x39] sm:$0xff]  ;;  %v789_v37 = vpack.c.bf16 %v782_v54, %v781_v40  ;;  %v4477_v54 = vld [vmem:[%s6033_s3 + $0xb0] sm:$0xff]  }
 0x268   : > { %v902_v32 = vmul.f32 %v5134_v19, %v5099_v26  ;;  %3923 = vmatpush3.bf16.msra.mxu0 %v4461_v42  ;;  %v874_v22 = vpack.c.bf16 %v868_v18, %v867_v7  ;;  %v869_v42 = vmul.f32 %v5158_v27, %v4935_v20  ;;  %v4472_v18 = vld [vmem:[%s6033_s3 + $0x68] sm:$0xff]  }
 0x269   : > { %4197 = vmatmul.mubr.bf16.vlgmr.msra.gmra.mrb[0].mxu1 %v906_v12  ;;  %3924 = vmatprep.subr.bf16.mxu0 %v4463_v10  ;;  %v4470_v10 = vld [vmem:[%s6033_s3 + $0x20] sm:$0xff]  }
 0x26a   : > { %4205 = vmatpush3.bf16.msra.mxu1 %v4882_v46  ;;  %v907_v51 = vpack.c.bf16 %v902_v32, %v901_v59  ;;  %v5154_v17 = vld [vmem:[#allocation3 + $0x41] sm:$0xff]  ;;  %v5156_v25 = vld [vmem:[#allocation3 + $0x49] sm:$0xff]  ;;  %v875_v7 = vpack.c.bf16 %v870_v58, %v869_v42  ;;  %v884_v59 = vpack.c.bf16 %v5097_v23, %v5081_v2 }
 0x26b   : > { %4206 = vmatprep.subr.bf16.mxu1 %v4462_v31  ;;  %1159 = vmatmul.mubr.bf16.gmra.mrb[4].mxu0 %v874_v22  ;;  %v903_v41 = vmul.f32 %v5154_v17, %v5141_v62  ;;  %v904_v46 = vmul.f32 %v5156_v25, %v5139_v11  ;;  %v5193_v12 = vld [vmem:[#allocation3 + $0x3f] sm:$0xff]  ;;  %v4475_v22 = vld [vmem:[%s6033_s3 + $0x70] sm:$0xff]  }
 0x26c   : > { %4200 = vmatprep.mubr.bf16.mxu1 %v907_v51  ;;  %3925 = vmatpush3.bf16.msra.mxu0 %v4464_v14  ;;  %v4471_v32 = vld [vmem:[%s6033_s3 + $0xa0] sm:$0xff]   ;;  %v4473_v14 = vld [vmem:[%s6033_s3 + $0x28] sm:$0xff]   ;;  %v871_v39 = vmul.f32 %v5193_v12, %v5031_v3 }
 0x26d   : > { %1166 = vmatprep.mubr.bf16.mxu0 %v883_v50  ;;  %3926 = vmatprep.subr.bf16.mxu0 %v4466_v9  ;;  %v908_v1 = vpack.c.bf16 %v904_v46, %v903_v41  ;;  %v4474_v51 = vld [vmem:[%s6033_s3 + $0xa8] sm:$0xff]   ;;  %v4478_v41 = vld [vmem:[%s6033_s3 + $0x78] sm:$0xff]   ;;  %v5219_v46 = vld [vmem:[#allocation3] sm:$0xff] }
 0x26e   : > { %4207 = vmatpush3.bf16.msra.mxu1 %v4462_v31  ;;  %v5195_v31 = vld [vmem:[#allocation3 + $0x47] sm:$0xff]  ;;  %v733_v40 = vpack.c.bf16 %v5047_v56, %v5219_v46  ;;  %v710_v56 = vmul.f32 %v5071_v6, %v4903_v61  ;;  %v5246_v6 = vpack.c.bf16 %v5061_v38, %v5050_v60  ;;  %v786_v60 = vmul.f32 %v5109_v29, %v5099_v26 }
 0x26f   : > { %4208 = vmatprep.subr.bf16.mxu1 %v4465_v35  ;;  %v872_v9 = vmul.f32 %v5195_v31, %v5052_v5  ;;  %v4481_v42 = vld [vmem:[%s6033_s3 + $0x1c0] sm:$0xff]   ;;  %v4485_v38 = vld [vmem:[%s6033_s3 + $0x188] sm:$0xff]  }
 0x270   : > { %3927 = vmatpush3.bf16.msra.mxu0 %v4467_v36  ;;  %v661_v36 = vld [vmem:[#allocation3 + $0x7] sm:$0xff] }
 0x271   : > { %4201 = vmatmul.mubr.bf16.gmra.mrb[4].mxu1 %v908_v1  ;;  %3928 = vmatprep.subr.bf16.mxu0 %v4469_v4  ;;  %v876_v50 = vpack.c.bf16 %v872_v9, %v871_v39  ;;  %v4479_v4 = vld [vmem:[%s6033_s3 + $0x38] sm:$0xff]   ;;  %v709_v58 = vmul.f32 %v4892_v55, %v661_v36  ;;  %v712_v39 = vmul.f32 %v5107_v44, %v4923_v8 }
 0x272   : > { %4209 = vmatpush3.bf16.msra.mxu1 %v4465_v35  ;;  %4220 = vmatprep.mubr.bf16.mxu1 %v789_v37  ;;  %v4476_v35 = vld [vmem:[%s6033_s3 + $0x30] sm:$0xff]   ;;  %v4480_v1 = vld [vmem:[%s6033_s3 + $0xb8] sm:$0xff]   ;;  %v787_v36 = vmul.f32 %v5134_v19, %v5141_v62 }
 0x273   : > { %4210 = vmatprep.subr.bf16.mxu1 %v4468_v48  ;;  %1167 = vmatmul.mubr.bf16.gmra.mrb[8].mxu0 %v875_v7  ;;  %v717_v37 = vpack.c.bf16 %v710_v56, %v709_v58  ;;  %v783_v7 = vmul.f32 %v5092_v47, %v4998_v34  ;;  %v1570_v56 = vmul.f32 %v5092_v47, %v4968_v13  ;;  %v4491_v58 = vld [vmem:[%s6033_s3 + $0x198] sm:$0xff]  }
 0x274   : > { %3929 = vmatpush3.bf16.msra.mxu0 %v4470_v10  ;;  %1174 = vmatprep.mubr.bf16.mxu0 %v884_v59  ;;  %v4484_v10 = vld [vmem:[%s6033_s3 + $0x1c8] sm:$0xff]   ;;  %v4483_v59 = vld [vmem:[%s6033_s3 + $0x200] sm:$0xff]  }
 0x275   : > { %3930 = vmatprep.subr.bf16.mxu0 %v4472_v18  ;;  %v784_v18 = vmul.f32 %v5115_v45, %v5016_v30 }
 0x276   : > { %4211 = vmatpush3.bf16.msra.mxu1 %v4468_v48  ;;  %v4482_v48 = vld [vmem:[%s6033_s3 + $0x180] sm:$0xff]  }
 0x277   : > { %4212 = vmatprep.subr.bf16.mxu1 %v4471_v32  ;;  %v790_v9 = vpack.c.bf16 %v784_v18, %v783_v7  ;;  %v4494_v18 = vld [vmem:[%s6033_s3 + $0x1a0] sm:$0xff]  }
 0x278   : > { %3931 = vmatpush3.bf16.msra.mxu0 %v4473_v14  ;;  %v4487_v14 = vld [vmem:[%s6033_s3 + $0x1d0] sm:$0xff]  }
 0x279   : > { %3932 = vmatprep.subr.bf16.mxu0 %v4475_v22  ;;  %v711_v22 = vmul.f32 %v5075_v16, %v5101_v53 }
 0x27a   : > { %4213 = vmatpush3.bf16.msra.mxu1 %v4471_v32  ;;  %v785_v32 = vmul.f32 %v5117_v21, %v5068_v15 }
 0x27b   : > { %4214 = vmatprep.subr.bf16.mxu1 %v4474_v51  ;;  %1175 = vmatmul.mubr.bf16.gmra.mrb[12].mxu0 %v876_v50  ;;  %v4488_v50 = vld [vmem:[%s6033_s3 + $0x190] sm:$0xff]  }
 0x27c   : > { %3933 = vmatpush3.bf16.msra.mxu0 %v4476_v35  ;;  %1424 = vmatprep.mubr.bf16.mxu0 %v733_v40  ;;  %v791_v35 = vpack.c.bf16 %v786_v60, %v785_v32  ;;  %v4490_v40 = vld [vmem:[%s6033_s3 + $0x1d8] sm:$0xff]   ;;  %v4496_v32 = vld [vmem:[%s6033_s3 + $0x1e8] sm:$0xff]  }
 0x27d   : > { %3934 = vmatprep.subr.bf16.mxu0 %v4478_v41  ;;  %v718_v41 = vpack.c.bf16 %v712_v39, %v711_v22  ;;  %v4499_v22 = vld [vmem:[%s6033_s3 + $0x1f0] sm:$0xff]   ;;  %v716_v39 = vmul.f32 %v5193_v12, %v5052_v5 }
 0x27e   : > { %4215 = vmatpush3.bf16.msra.mxu1 %v4474_v51  ;;  %v4486_v51 = vld [vmem:[%s6033_s3 + $0x208] sm:$0xff]  }
 0x27f   : > { %4216 = vmatprep.subr.bf16.mxu1 %v4477_v54 }
 0x280   : > { %3935 = vmatpush3.bf16.msra.mxu0 %v4479_v4  ;;  %v788_v4 = vmul.f32 %v5154_v17, %v5139_v11 }
 0x281   : > { %3972 = vmatprep.subr.bf16.mxu0 %v4481_v42  ;;  %v4489_v42 = vld [vmem:[%s6033_s3 + $0x210] sm:$0xff]  }
 0x282   : > { %4217 = vmatpush3.bf16.msra.mxu1 %v4477_v54  ;;  %v735_v54 = vpack.c.bf16 %v5029_v28, %v5066_v0  ;;  %v1571_v28 = vmul.f32 %v5115_v45, %v4981_v57  ;;  %v792_v47 = vpack.c.bf16 %v788_v4, %v787_v36  ;;  %v4492_v45 = vld [vmem:[%s6033_s3 + $0x218] sm:$0xff]   ;;  %v1531_v36 = vmul.f32 %v5107_v44, %v4903_v61 }
 0x283   : > { %4218 = vmatprep.subr.bf16.mxu1 %v4480_v1  ;;  %1425 = vmatmul.mubr.bf16.vlgmr.msra.gmra.mrb[16].mxu0 %v717_v37  ;;  %v714_v37 = vmul.f32 %v5158_v27, %v4950_v43  ;;  %v4504_v4 = vld [vmem:[%s6033_s3 + $0x238] sm:$0xff]   ;;  %v1574_v44 = vmul.f32 %v5134_v19, %v5068_v15 }
 0x284   : > { %3973 = vmatpush3.bf16.msra.mxu0 %v4482_v48  ;;  %1432 = vmatprep.mubr.bf16.mxu0 %v5246_v6  ;;  %v713_v48 = vmul.f32 %v5119_v63, %v4935_v20  ;;  %v1578_v7 = vpack.c.bf16 %v1571_v28, %v1570_v56  ;;  %v1573_v28 = vmul.f32 %v5109_v29, %v5016_v30 }
 0x285   : > { %3974 = vmatprep.subr.bf16.mxu0 %v4484_v10  ;;  %v731_v10 = vld [vmem:[#allocation3 + $0x38] sm:$0xff] }
 0x286   : > { %4219 = vmatpush3.bf16.msra.mxu1 %v4480_v1  ;;  %v4493_v1 = vld [vmem:[%s6033_s3 + $0x1e0] sm:$0xff]   ;;  %v736_v60 = vpack.c.bf16 %v5081_v2, %v731_v10  ;;  %v715_v2 = vmul.f32 %v5151_v24, %v5031_v3  ;;  %v1557_v10 = vpack.c.bf16 %v5219_v46, %v5097_v23 }
 0x287   : > { %4228 = vmatprep.subr.bf16.mxu1 %v4483_v59 }
 0x288   : > { %3975 = vmatpush3.bf16.msra.mxu0 %v4485_v38  ;;  %v4495_v38 = vld [vmem:[%s6033_s3 + $0x220] sm:$0xff]  }
 0x289   : > { %4221 = vmatmul.mubr.bf16.vlgmr.msra.gmra.mrb[0].mxu1 %v790_v9  ;;  %3976 = vmatprep.subr.bf16.mxu0 %v4487_v14  ;;  %v4497_v14 = vld [vmem:[%s6033_s3 + $0x1a8] sm:$0xff]  }
 0x28a   : > { %4224 = vmatprep.mubr.bf16.mxu1 %v791_v35  ;;  %4229 = vmatpush3.bf16.msra.mxu1 %v4483_v59  ;;  %v719_v59 = vpack.c.bf16 %v714_v37, %v713_v48  ;;  %v4498_v9 = vld [vmem:[%s6033_s3 + $0x228] sm:$0xff]   ;;  %v720_v35 = vpack.c.bf16 %v716_v39, %v715_v2  ;;  %v1569_v37 = vld [vmem:[#allocation3 + $0x51] sm:$0xff] }
 0x28b   : > { %4230 = vmatprep.subr.bf16.mxu1 %v4486_v51  ;;  %1433 = vmatmul.mubr.bf16.gmra.mrb[20].mxu0 %v718_v41  ;;  %v4501_v41 = vld [vmem:[%s6033_s3 + $0x230] sm:$0xff]   ;;  %v1577_v19 = vmul.f32 %v1569_v37, %v5139_v11 }
 0x28c   : > { %3977 = vmatpush3.bf16.msra.mxu0 %v4488_v50  ;;  %1440 = vmatprep.mubr.bf16.mxu0 %v735_v54  ;;  %v4502_v50 = vld [vmem:[%s6033_s3 + $0x1f8] sm:$0xff]   ;;  %v1530_v54 = vmul.f32 %v5075_v16, %v4892_v55  ;;  %v1572_v16 = vmul.f32 %v5117_v21, %v4998_v34  ;;  %v1576_v21 = vmul.f32 %v5156_v25, %v5141_v62 }
 0x28d   : > { %3978 = vmatprep.subr.bf16.mxu0 %v4490_v40  ;;  %v4503_v40 = vld [vmem:[%s6033_s3 + $0x1b8] sm:$0xff]   ;;  %v1536_v25 = vmul.f32 %v5195_v31, %v5031_v3 }
 0x28e   : > { %4231 = vmatpush3.bf16.msra.mxu1 %v4486_v51  ;;  %v4500_v51 = vld [vmem:[%s6033_s3 + $0x1b0] sm:$0xff]   ;;  %v1579_v29 = vpack.c.bf16 %v1573_v28, %v1572_v16 }
 0x28f   : > { %4232 = vmatprep.subr.bf16.mxu1 %v4489_v42 }
 0x290   : > { %3979 = vmatpush3.bf16.msra.mxu0 %v4491_v58  ;;  %v1575_v58 = vmul.f32 %v5154_v17, %v5099_v26  ;;  %v1535_v17 = vmul.f32 %v5193_v12, %v4950_v43 }
 0x291   : > { %4225 = vmatmul.mubr.bf16.gmra.mrb[4].mxu1 %v792_v47  ;;  %3980 = vmatprep.subr.bf16.mxu0 %v4493_v1  ;;  %v1532_v1 = vmul.f32 %v5119_v63, %v5101_v53  ;;  %v1534_v63 = vmul.f32 %v5151_v24, %v4935_v20 }
 0x292   : > { %4233 = vmatpush3.bf16.msra.mxu1 %v4489_v42  ;;  %4244 = vmatprep.mubr.bf16.mxu1 %v1578_v7  ;;  %v1549_v42 = vld [vmem:[#allocation3 + $0x30] sm:$0xff]  ;;  %v1580_v48 = vpack.c.bf16 %v1575_v58, %v1574_v44 }
 0x293   : > { %4234 = vmatprep.subr.bf16.mxu1 %v4492_v45  ;;  %1441 = vmatmul.mubr.bf16.gmra.mrb[24].mxu0 %v719_v59  ;;  %v1555_v56 = vpack.c.bf16 %v1549_v42, %v5066_v0  ;;  %v1533_v0 = vmul.f32 %v5158_v27, %v4923_v8  ;;  %v1581_v27 = vpack.c.bf16 %v1577_v19, %v1576_v21  ;;  %v1529_v7 = vld [vmem:[#allocation3 + $0x4f] sm:$0xff] }
 0x294   : > { %3981 = vmatpush3.bf16.msra.mxu0 %v4494_v18  ;;  %1448 = vmatprep.mubr.bf16.mxu0 %v736_v60  ;;  %v1537_v18 = vmul.f32 %v1529_v7, %v5052_v5 }
 0x295   : > { %3982 = vmatprep.subr.bf16.mxu0 %v4496_v32  ;;  %v1539_v47 = vpack.c.bf16 %v1533_v0, %v1532_v1 }
 0x296   : > { %4235 = vmatpush3.bf16.msra.mxu1 %v4492_v45  ;;  %v1540_v45 = vpack.c.bf16 %v1535_v17, %v1534_v63  ;;  %v1541_v59 = vpack.c.bf16 %v1537_v18, %v1536_v25 }
 0x297   : > { %4236 = vmatprep.subr.bf16.mxu1 %v4495_v38 }
 0x298   : > { %3983 = vmatpush3.bf16.msra.mxu0 %v4497_v14 }
 0x299   : > { %3984 = vmatprep.subr.bf16.mxu0 %v4499_v22 }
 0x29a   : > { %4237 = vmatpush3.bf16.msra.mxu1 %v4495_v38 }
 0x29b   : > { %4238 = vmatprep.subr.bf16.mxu1 %v4498_v9  ;;  %1449 = vmatmul.mubr.bf16.gmra.mrb[28].mxu0 %v720_v35 }
 0x29c   : > { %3985 = vmatpush3.bf16.msra.mxu0 %v4500_v51  ;;  %1823 = vmatprep.mubr.bf16.mxu0 %v5246_v6  ;;  %v1538_v6 = vpack.c.bf16 %v1531_v36, %v1530_v54 }
 0x29d   : > { %3986 = vmatprep.subr.bf16.mxu0 %v4502_v50 }
 0x29e   : > { %4239 = vmatpush3.bf16.msra.mxu1 %v4498_v9 }
 0x29f   : > { %4240 = vmatprep.subr.bf16.mxu1 %v4501_v41 }
 0x2a0   : > { %3987 = vmatpush3.bf16.msra.mxu0 %v4503_v40 }
 0x2a2   : > { %4241 = vmatpush3.bf16.msra.mxu1 %v4501_v41 }
 0x2a3   : > { %4242 = vmatprep.subr.bf16.mxu1 %v4504_v4  ;;  %1824 = vmatmul.mubr.bf16.vlgmr.msra.gmra.mrb[32].mxu0 %v1538_v6 }
 0x2a4   : > { %1831 = vmatprep.mubr.bf16.mxu0 %v1555_v56 }
 0x2a6   : > { %4243 = vmatpush3.bf16.msra.mxu1 %v4504_v4 }
 0x2a9   : > { %4245 = vmatmul.mubr.bf16.vlgmr.msra.gmra.mrb[0].mxu1 %v1579_v29 }
 0x2aa   : > { %4248 = vmatprep.mubr.bf16.mxu1 %v1580_v48 }
 0x2ab   : > { %1832 = vmatmul.mubr.bf16.gmra.mrb[36].mxu0 %v1539_v47 }
 0x2ac   : > { %1839 = vmatprep.mubr.bf16.mxu0 %v736_v60 }
 0x2b1   : > { %4249 = vmatmul.mubr.bf16.gmra.mrb[4].mxu1 %v1581_v27 }
 0x2b3   : > { %1840 = vmatmul.mubr.bf16.gmra.mrb[40].mxu0 %v1540_v45 }
 0x2b4   : > { %1847 = vmatprep.mubr.bf16.mxu0 %v1557_v10 }
 0x2bb   : > { %1848 = vmatmul.mubr.bf16.gmra.mrb[44].mxu0 %v1541_v59 }
 0x336   : > { %v3884_v24 = vpop.f32.mrb[0].mxu0 }
 0x337   : > { %v3885_v32 = vpop.f32.mrb[1].mxu0 }
 0x338   : > { %v3886_v60 = vadd.f32 %v3885_v32, %v3884_v24  ;;  %v3887_v12 = vpop.f32.mrb[2].mxu0 }
 0x339   : > { %v3888_v38 = vpop.f32.mrb[3].mxu0 }
 0x33a   : > { %v3889_v14 = vadd.f32 %v3888_v38, %v3887_v12 }
 0x33e   : > { %v3890_v22 = vpop.f32.mrb[4].mxu0 }
 0x33f   : > { %v3891_v2 = vpop.f32.mrb[5].mxu0 }
 0x340   : > { %v3892_v39 = vadd.f32 %v3891_v2, %v3890_v22  ;;  %v3893_v23 = vpop.f32.mrb[6].mxu0 }
 0x341   : > { %v3894_v46 = vpop.f32.mrb[7].mxu0 }
 0x342   : > { %v3895_v9 = vadd.f32 %v3894_v46, %v3893_v23 }
 0x346   : > { %v3896_v51 = vpop.f32.mrb[8].mxu0 }
 0x347   : > { %v3897_v35 = vpop.f32.mrb[9].mxu0 }
 0x348   : > { %v3898_v50 = vadd.f32 %v3897_v35, %v3896_v51  ;;  %v3899_v31 = vpop.f32.mrb[10].mxu0 }
 0x349   : > { %v3900_v41 = vpop.f32.mrb[11].mxu0 }
 0x34a   : > { %v3901_v40 = vadd.f32 %v3900_v41, %v3899_v31 }
 0x34e   : > { %v3902_v54 = vpop.f32.mrb[12].mxu0 }
 0x34f   : > { %v3903_v36 = vpop.f32.mrb[13].mxu0 }
 0x350   : > { %v3904_v4 = vadd.f32 %v3903_v36, %v3902_v54  ;;  %v3905_v42 = vpop.f32.mrb[14].mxu0 }
 0x351   : > { %v3906_v6 = vpop.f32.mrb[15].mxu0 }
 0x352   : > { %v3907_v56 = vadd.f32 %v3906_v6, %v3905_v42 }
 0x356   : > { %v3936_v28 = vpop.f32.mrb[16].mxu0 }
 0x357   : > { %v3937_v16 = vpop.f32.mrb[17].mxu0 }
 0x358   : > { %v3938_v44 = vadd.f32 %v3937_v16, %v3936_v28  ;;  %v3939_v58 = vpop.f32.mrb[18].mxu0 }
 0x359   : > { %v3940_v1 = vpop.f32.mrb[19].mxu0 }
 0x35a   : > { %v4327_v0 = vadd.f32 %v3938_v44, %v3886_v60  ;;  %v3941_v29 = vadd.f32 %v3940_v1, %v3939_v58 }
 0x35c   : > { %v4333_v48 = vadd.f32 %v3941_v29, %v3889_v14 }
 0x35e   : > { %v3942_v37 = vpop.f32.mrb[20].mxu0 }
 0x35f   : > { %v3943_v47 = vpop.f32.mrb[21].mxu0 }
 0x360   : > { %v3944_v21 = vadd.f32 %v3943_v47, %v3942_v37  ;;  %v3945_v19 = vpop.f32.mrb[22].mxu0 }
 0x361   : > { %v3946_v63 = vpop.f32.mrb[23].mxu0 }
 0x362   : > { %v4324_v17 = vadd.f32 %v3944_v21, %v3892_v39  ;;  %v3947_v27 = vadd.f32 %v3946_v63, %v3945_v19 }
 0x364   : > { %v4330_v45 = vadd.f32 %v3947_v27, %v3895_v9 }
 0x366   : > { %v3948_v10 = vpop.f32.mrb[24].mxu0 }
 0x367   : > { %v3949_v7 = vpop.f32.mrb[25].mxu0 }
 0x368   : > { %v3950_v25 = vadd.f32 %v3949_v7, %v3948_v10  ;;  %v3951_v18 = vpop.f32.mrb[26].mxu0 }
 0x369   : > { %v3952_v59 = vpop.f32.mrb[27].mxu0 }
 0x36a   : > { %v4339_v24 = vadd.f32 %v3950_v25, %v3898_v50  ;;  %v3953_v32 = vadd.f32 %v3952_v59, %v3951_v18 }
 0x36c   : > { %v4345_v12 = vadd.f32 %v3953_v32, %v3901_v40 }
 0x36e   : > { %v3954_v38 = vpop.f32.mrb[28].mxu0 }
 0x36f   : > { %v3955_v60 = vpop.f32.mrb[29].mxu0 }
 0x370   : > { %v3956_v22 = vadd.f32 %v3955_v60, %v3954_v38  ;;  %v3957_v14 = vpop.f32.mrb[30].mxu0 }
 0x371   : > { %v3958_v2 = vpop.f32.mrb[31].mxu0 }
 0x372   : > { %v4336_v23 = vadd.f32 %v3956_v22, %v3904_v4  ;;  %v3959_v46 = vadd.f32 %v3958_v2, %v3957_v14 }
 0x374   : > { %v4342_v51 = vadd.f32 %v3959_v46, %v3907_v56 }
 0x376   : > { %v3988_v35 = vpop.f32.mrb[32].mxu0 }
 0x377   : > { %v3989_v39 = vpop.f32.mrb[33].mxu0 }
 0x378   : > { %v3990_v31 = vadd.f32 %v3989_v39, %v3988_v35  ;;  %v3991_v9 = vpop.f32.mrb[34].mxu0 }
 0x379   : > { %v3992_v41 = vpop.f32.mrb[35].mxu0 }
 0x37a   : > { %v4328_v54 = vadd.f32 %v4327_v0, %v3990_v31  ;;  %v3993_v36 = vadd.f32 %v3992_v41, %v3991_v9 }
 0x37c   : > { %v4246_v42 = vpop.f32.mrb[0].mxu1  ;;  %v4334_v6 = vadd.f32 %v4333_v48, %v3993_v36 }
 0x37d   : > { %v1890_v50 = vpop.f32.mrb[1].mxu1 }
 0x37e   : > { %v4329_v28 = vadd.f32 %v4328_v54, %v1890_v50  ;;  %v4247_v40 = vpop.f32.mrb[2].mxu1  ;;  %v3994_v16 = vpop.f32.mrb[36].mxu0 }
 0x37f   : > { %v1893_v44 = vpop.f32.mrb[3].mxu1  ;;  %v3995_v58 = vpop.f32.mrb[37].mxu0 }
 0x380   : > { %v4335_v1 = vadd.f32 %v4334_v6, %v1893_v44  ;;  %v3996_v29 = vadd.f32 %v3995_v58, %v3994_v16  ;;  %v3997_v4 = vpop.f32.mrb[38].mxu0 }
 0x381   : > { %v3998_v37 = vpop.f32.mrb[39].mxu0 }
 0x382   : > { %v4325_v56 = vadd.f32 %v4324_v17, %v3996_v29  ;;  %v3999_v47 = vadd.f32 %v3998_v37, %v3997_v4  ;;  %v1929_v18 = vadd.f32 %v4335_v1, %v4329_v28 }
 0x384   : > { %v4250_v21 = vpop.f32.mrb[4].mxu1  ;;  %v4326_v19 = vadd.f32 %v4325_v56, %v4246_v42  ;;  %v4331_v63 = vadd.f32 %v4330_v45, %v3999_v47 }
 0x385   : > { %v1906_v27 = vpop.f32.mrb[5].mxu1 }
 0x386   : > { %v4251_v0 = vpop.f32.mrb[6].mxu1  ;;  %v4332_v10 = vadd.f32 %v4331_v63, %v4247_v40  ;;  %v4000_v7 = vpop.f32.mrb[40].mxu0  ;;  %v1930_v60 = vadd.f32 %v4326_v19, %v1929_v18 }
 0x387   : > { %v1909_v48 = vpop.f32.mrb[7].mxu1  ;;  %v4001_v25 = vpop.f32.mrb[41].mxu0 }
 0x388   : > { %v4002_v59 = vadd.f32 %v4001_v25, %v4000_v7  ;;  %v4003_v32 = vpop.f32.mrb[42].mxu0  ;;  %v1931_v17 = vadd.f32 %v4332_v10, %v1930_v60 }
 0x389   : > { %v4004_v38 = vpop.f32.mrb[43].mxu0 }
 0x38a   : > { %v4340_v22 = vadd.f32 %v4339_v24, %v4002_v59  ;;  %v4005_v14 = vadd.f32 %v4004_v38, %v4003_v32 }
 0x38c   : > { %v4341_v2 = vadd.f32 %v4340_v22, %v1906_v27  ;;  %v4346_v46 = vadd.f32 %v4345_v12, %v4005_v14 }
 0x38e   : > { %v4347_v35 = vadd.f32 %v4346_v46, %v1909_v48  ;;  %v4006_v39 = vpop.f32.mrb[44].mxu0  ;;  %v1932_v45 = vadd.f32 %v4341_v2, %v1931_v17 }
 0x38f   : > { %v4007_v31 = vpop.f32.mrb[45].mxu0 }
 0x390   : > { %v4008_v9 = vadd.f32 %v4007_v31, %v4006_v39  ;;  %v4009_v41 = vpop.f32.mrb[46].mxu0  ;;  %v1933_v40 = vadd.f32 %v4347_v35, %v1932_v45 }
 0x391   : > { %v4010_v54 = vpop.f32.mrb[47].mxu0 }
 0x392   : > { %v4337_v36 = vadd.f32 %v4336_v23, %v4008_v9  ;;  %v4011_v42 = vadd.f32 %v4010_v54, %v4009_v41  ;;  %v4505_v54 = vld [vmem:[%s6036_s6 + $0x100] sm:$0xff]  }
 0x393   : > { %4024 = vmatprep.subr.bf16.mxu0 %v4505_v54 }
 0x394   : > { %v4338_v6 = vadd.f32 %v4337_v36, %v4250_v21  ;;  %v4343_v50 = vadd.f32 %v4342_v51, %v4011_v42  ;;  %v4506_v36 = vld [vmem:[%s6036_s6 + $0xc0] sm:$0xff]  }
 0x395   : > { %v4507_v42 = vld [vmem:[%s6036_s6 + $0x140] sm:$0xff]   ;;  %4025 = vmatpush3.bf16.msra.mxu0 %v4506_v36 }
 0x396   : > { %v4344_v16 = vadd.f32 %v4343_v50, %v4251_v0  ;;  %v1934_v44 = vadd.f32 %v4338_v6, %v1933_v40  ;;  %v4510_v50 = vld [vmem:[%s6036_s6 + $0x148] sm:$0xff]   ;;  %4252 = vmatprep.subr.bf16.mxu1 %v4507_v42 }
 0x397   : > { %4253 = vmatpush3.bf16.msra.mxu1 %v4507_v42 }
 0x398   : > { %v1935_v58 = vadd.f32 %v4344_v16, %v1934_v44  ;;  %4254 = vmatprep.subr.bf16.mxu1 %v4510_v50 }
 0x39a   : > { %1936 = vadd.xlane.f32.xlu1 %v1935_v58  ;;  %v4511_v58 = vld [vmem:[%s6036_s6 + $0x110] sm:$0xff]  }
 0x39b   : > { %4255 = vmatpush3.bf16.msra.mxu1 %v4510_v50 }
 0x427   : > { %v1937_v24 = vpop.xlane.xlu1 %1936 }
 0x428   : > { %v1938_v29 = vrot.slane %v1937_v24, 4 }
 0x42a   : > { %v1939_v12 = vadd.f32 %v1938_v29, %v1937_v24  ;;  %v4513_v24 = vld [vmem:[%s6036_s6 + $0x150] sm:$0xff]  }
 0x42b   : > { %v4512_v29 = vld [vmem:[%s6036_s6 + $0xd0] sm:$0xff]   ;;  %4256 = vmatprep.subr.bf16.mxu1 %v4513_v24 }
 0x42c   : > { %v1940_v4 = vrot.slane %v1939_v12, 2  ;;  %4257 = vmatpush3.bf16.msra.mxu1 %v4513_v24 }
 0x42e   : > { %v1941_v37 = vadd.f32 %v1940_v4, %v1939_v12  ;;  %v4514_v12 = vld [vmem:[%s6036_s6 + $0x118] sm:$0xff]  }
 0x42f   : > { %v4516_v4 = vld [vmem:[%s6036_s6 + $0x158] sm:$0xff]  }
 0x430   : > { %v1942_v56 = vrot.slane %v1941_v37, 1  ;;  %4258 = vmatprep.subr.bf16.mxu1 %v4516_v4 }
 0x431   : > { %4259 = vmatpush3.bf16.msra.mxu1 %v4516_v4 }
 0x432   : > { %v1943_v47 = vadd.f32 %v1942_v56, %v1941_v37  ;;  %v4515_v37 = vld [vmem:[%s6036_s6 + $0xd8] sm:$0xff]   ;;  %v4517_v56 = vld [vmem:[%s6036_s6 + $0x120] sm:$0xff]  }
 0x434   : > { %4410 = vpush %v1943_v47  ;;  %v4519_v47 = vld [vmem:[%s6036_s6 + $0x160] sm:$0xff]  }
 0x435   : > { %4260 = vmatprep.subr.bf16.mxu1 %v4519_v47 }
 0x436   : > { %4261 = vmatpush3.bf16.msra.mxu1 %v4519_v47 }
 0x465   : > { %s4411_s20 = spop %4410 }
 0x466   : > { %s1945_s21 = smul.f32 0.00390625, %s4411_s20 }
 0x468   : > { %v1946_v63 = vstv %s1945_s21 }
 0x469   : > { %v1947_v23 = vmul.f32 %v4745_v33, %v1946_v63  ;;  %v4518_v63 = vld [vmem:[%s6036_s6 + $0xe0] sm:$0xff]  }
 0x46b   : > { %v5374_v21 = vsub.f32 %v4329_v28, %v1947_v23  ;;  %v5376_v51 = vsub.f32 %v4335_v1, %v1947_v23  ;;  %v5378_v27 = vsub.f32 %v4326_v19, %v1947_v23  ;;  %v5380_v0 = vsub.f32 %v4332_v10, %v1947_v23 }
 0x46c   : > { %v5386_v25 = vsub.f32 %v4341_v2, %v1947_v23  ;;  %v5390_v28 = vsub.f32 %v4347_v35, %v1947_v23  ;;  %v5394_v10 = vsub.f32 %v4338_v6, %v1947_v23  ;;  %v5398_v38 = vsub.f32 %v4344_v16, %v1947_v23  ;;  %v4508_v6 = vld [vmem:[%s6036_s6 + $0x108] sm:$0xff]  }
 0x46d   : > { %v1956_v7 = vmul.f32 %v5374_v21, %v5374_v21  ;;  %v1957_v48 = vmul.f32 %v5376_v51, %v5376_v51  ;;  %v1958_v18 = vmul.f32 %v5378_v27, %v5378_v27  ;;  %v1959_v1 = vmul.f32 %v5380_v0, %v5380_v0  ;;  %v4509_v16 = vld [vmem:[%s6036_s6 + $0xc8] sm:$0xff]   ;;  %4026 = vmatprep.subr.bf16.mxu0 %v4508_v6 }
 0x46e   : > { %v1960_v59 = vmul.f32 %v5386_v25, %v5386_v25  ;;  %v1961_v60 = vmul.f32 %v5390_v28, %v5390_v28  ;;  %v1962_v14 = vmul.f32 %v5394_v10, %v5394_v10  ;;  %v1963_v46 = vmul.f32 %v5398_v38, %v5398_v38  ;;  %4027 = vmatpush3.bf16.msra.mxu0 %v4509_v16  ;;  %v4520_v23 = vld [vmem:[%s6036_s6 + $0x128] sm:$0xff]  }
 0x46f   : > { %v1964_v33 = vadd.f32 %v1957_v48, %v1956_v7  ;;  %4028 = vmatprep.subr.bf16.mxu0 %v4511_v58  ;;  %v4522_v7 = vld [vmem:[%s6036_s6 + $0x168] sm:$0xff]  }
 0x470   : > { %v4521_v48 = vld [vmem:[%s6036_s6 + $0xe8] sm:$0xff]   ;;  %4262 = vmatprep.subr.bf16.mxu1 %v4522_v7 }
 0x471   : > { %v1965_v19 = vadd.f32 %v1964_v33, %v1958_v18  ;;  %4263 = vmatpush3.bf16.msra.mxu1 %v4522_v7  ;;  %v4523_v18 = vld [vmem:[%s6036_s6 + $0x130] sm:$0xff]  }
 0x472   : > { %4029 = vmatpush3.bf16.msra.mxu0 %v4512_v29  ;;  %v4524_v33 = vld [vmem:[%s6036_s6 + $0xf0] sm:$0xff]  }
 0x473   : > { %v1966_v32 = vadd.f32 %v1965_v19, %v1959_v1  ;;  %4030 = vmatprep.subr.bf16.mxu0 %v4514_v12  ;;  %v4525_v1 = vld [vmem:[%s6036_s6 + $0x170] sm:$0xff]   ;;  %v4526_v19 = vld [vmem:[%s6036_s6 + $0x138] sm:$0xff]  }
 0x474   : > { %4264 = vmatprep.subr.bf16.mxu1 %v4525_v1 }
 0x475   : > { %v1967_v22 = vadd.f32 %v1966_v32, %v1960_v59  ;;  %v4528_v59 = vld [vmem:[%s6036_s6 + $0x178] sm:$0xff]   ;;  %4265 = vmatpush3.bf16.msra.mxu1 %v4525_v1 }
 0x476   : > { %4031 = vmatpush3.bf16.msra.mxu0 %v4515_v37  ;;  %4266 = vmatprep.subr.bf16.mxu1 %v4528_v59 }
 0x477   : > { %v1968_v2 = vadd.f32 %v1967_v22, %v1961_v60  ;;  %4032 = vmatprep.subr.bf16.mxu0 %v4517_v56  ;;  %v4527_v60 = vld [vmem:[%s6036_s6 + $0xf8] sm:$0xff]   ;;  %v4529_v22 = vld [vmem:[%s6036_s6 + $0x40] sm:$0xff]  }
 0x479   : > { %v1969_v17 = vadd.f32 %v1968_v2, %v1962_v14  ;;  %4267 = vmatpush3.bf16.msra.mxu1 %v4528_v59  ;;  %v5484_v14 = vld [vmem:[%s6036_s6 + $0x80] sm:$0xff]  }
 0x47a   : > { %4033 = vmatpush3.bf16.msra.mxu0 %v4518_v63  ;;  %4276 = vmatprep.subr.bf16.mxu1 %v5484_v14 }
 0x47b   : > { %v1970_v35 = vadd.f32 %v1969_v17, %v1963_v46  ;;  %4034 = vmatprep.subr.bf16.mxu0 %v4520_v23  ;;  %v1985_v46 = vld [vmem:[%s6034_s4] sm:$0x1] }
 0x47d   : > { %1971 = vadd.xlane.f32.xlu0 %v1970_v35 }
 0x47e   : > { %4035 = vmatpush3.bf16.msra.mxu0 %v4521_v48 }
 0x47f   : > { %4036 = vmatprep.subr.bf16.mxu0 %v4523_v18 }
 0x482   : > { %4037 = vmatpush3.bf16.msra.mxu0 %v4524_v33 }
 0x483   : > { %4038 = vmatprep.subr.bf16.mxu0 %v4526_v19 }
 0x486   : > { %4039 = vmatpush3.bf16.msra.mxu0 %v4527_v60 }
 0x487   : > { %4076 = vmatprep.subr.bf16.mxu0 %v4529_v22 }
 0x50a   : > { %v1972_v39 = vpop.xlane.xlu0 %1971 }
 0x50b   : > { %v1973_v31 = vrot.slane %v1972_v39, 4 }
 0x50d   : > { %v1974_v45 = vadd.f32 %v1973_v31, %v1972_v39  ;;  %v5495_v31 = vld [vmem:[%s6035_s5] ss:$0 sm:$0xff] }
 0x50f   : > { %v1975_v9 = vrot.slane %v1974_v45, 2 }
 0x511   : > { %v1976_v41 = vadd.f32 %v1975_v9, %v1974_v45 }
 0x513   : > { %v1977_v40 = vrot.slane %v1976_v41, 1 }
 0x515   : > { %v1978_v44 = vadd.f32 %v1977_v40, %v1976_v41 }
 0x517   : > { %4412 = vpush %v1978_v44 }
 0x548   : > { %s4413_s22 = spop %4412 }
 0x549   : > { %s1980_s23 = smul.f32 0.00390625, %s4413_s22 }
 0x54b   : > { %s1981_s24 = sadd.f32 1e-05, %s1980_s23 }
 0x54d   : > { %v1982_v32 = vstv %s1981_s24 }
 0x54e   : > { %4611 = vrsqrt.f32 %v1982_v32 }
 0x558   : > { %v4612_v2 = vpop.eup %4611 }
 0x559   : > { %4414 = vpush %v4612_v2 }
 0x58a   : > { %s4415_s25 = spop %4414 }
 0x58b   : > { %v1986_v17 = vstv %s4415_s25 }
 0x58c   : > { %v1987_v35 = vmul.f32 %v1986_v17, %v1985_v46 }
 0x58e   : > { %v1992_v39 = vrot.slane %v1987_v35, %v419_v52 }
 0x590   : > { %v1996_v45 = vmul.f32 %v1992_v39, %v5378_v27  ;;  %v1998_v9 = vmul.f32 %v1992_v39, %v5386_v25  ;;  %v1999_v41 = vmul.f32 %v1992_v39, %v5390_v28  ;;  %v2000_v54 = vmul.f32 %v1992_v39, %v5394_v10 }
 0x591   : > { %v2001_v36 = vmul.f32 %v1992_v39, %v5398_v38  ;;  %v1994_v42 = vmul.f32 %v1992_v39, %v5374_v21  ;;  %v1995_v49 = vmul.f32 %v1992_v39, %v5376_v51 }
 0x592   : > { %v5505_v52 = vadd.f32 %v5495_v31, %v1996_v45  ;;  %v5508_v6 = vadd.f32 %v5495_v31, %v1998_v9  ;;  %v5511_v27 = vadd.f32 %v5495_v31, %v1999_v41  ;;  %v5514_v25 = vadd.f32 %v5495_v31, %v2000_v54 }
 0x593   : > { %v5517_v28 = vadd.f32 %v5495_v31, %v1994_v42  ;;  %v5520_v10 = vadd.f32 %v5495_v31, %v1995_v49  ;;  %v5523_v21 = vadd.f32 %v5495_v31, %v2001_v36 }
 0x594   : > { %v5526_v51 = vmul.f32 0.70710677, %v5505_v52  ;;  %v5529_v38 = vmul.f32 0.70710677, %v5508_v6  ;;  %v5532_v50 = vmul.f32 0.70710677, %v5511_v27 }
 0x595   : > { %v5535_v40 = vmul.f32 0.70710677, %v5517_v28  ;;  %v5538_v16 = vmul.f32 0.70710677, %v5520_v10  ;;  %v5541_v44 = vmul.f32 0.70710677, %v5514_v25 }
 0x596   : > { %v5544_v58 = vmul.f32 0.70710677, %v5523_v21  ;;  %v2027_v24 = vand.u32 2147483647, %v5526_v51  ;;  %v2029_v29 = vand.u32 2147483647, %v5529_v38 }
 0x597   : > { %v2025_v12 = vand.u32 2147483647, %v5535_v40  ;;  %v2026_v4 = vand.u32 2147483647, %v5538_v16  ;;  %v2030_v37 = vand.u32 2147483647, %v5532_v50 }
 0x598   : > { %v2031_v56 = vand.u32 2147483647, %v5541_v44  ;;  %v2032_v47 = vand.u32 2147483647, %v5544_v58  ;;  %v2035_v63 = vmul.f32 0.3275911, %v2027_v24 }
 0x599   : > { %v2033_v23 = vmul.f32 0.3275911, %v2025_v12  ;;  %v2034_v7 = vmul.f32 0.3275911, %v2026_v4  ;;  %v2037_v48 = vmul.f32 0.3275911, %v2029_v29 }
 0x59a   : > { %v2038_v18 = vmul.f32 0.3275911, %v2030_v37  ;;  %v2039_v33 = vmul.f32 0.3275911, %v2031_v56  ;;  %v2040_v1 = vmul.f32 0.3275911, %v2032_v47 }
 0x59b   : > { %v2041_v19 = vadd.f32 1.0, %v2033_v23  ;;  %v2042_v59 = vadd.f32 1.0, %v2034_v7  ;;  %v2043_v32 = vadd.f32 1.0, %v2035_v63  ;;  %v2045_v60 = vadd.f32 1.0, %v2037_v48 }
 0x59c   : > { %v2046_v22 = vadd.f32 1.0, %v2038_v18  ;;  %v2047_v2 = vadd.f32 1.0, %v2039_v33  ;;  %v2129_v46 = vsub.f32 0.0, %v2025_v12  ;;  %v2048_v17 = vadd.f32 1.0, %v2040_v1 }
 0x59d   : > { %4613 = vrcp.f32 %v2041_v19  ;;  %v2130_v35 = vsub.f32 0.0, %v2026_v4  ;;  %v2131_v45 = vsub.f32 0.0, %v2027_v24  ;;  %v2133_v9 = vsub.f32 0.0, %v2029_v29 }
 0x59e   : > { %4615 = vrcp.f32 %v2042_v59  ;;  %v2134_v41 = vsub.f32 0.0, %v2030_v37  ;;  %v2135_v54 = vsub.f32 0.0, %v2031_v56  ;;  %v2136_v36 = vsub.f32 0.0, %v2032_v47 }
 0x59f   : > { %4617 = vrcp.f32 %v2043_v32  ;;  %v2137_v42 = vmul.f32 %v2129_v46, %v2025_v12  ;;  %v2138_v49 = vmul.f32 %v2130_v35, %v2026_v4  ;;  %v2139_v23 = vmul.f32 %v2131_v45, %v2027_v24 }
 0x5a0   : > { %4619 = vrcp.f32 %v2045_v60  ;;  %v1997_v63 = vmul.f32 %v1992_v39, %v5380_v0  ;;  %v2141_v7 = vmul.f32 %v2133_v9, %v2029_v29  ;;  %v2142_v48 = vmul.f32 %v2134_v41, %v2030_v37 }
 0x5a1   : > { %4621 = vrcp.f32 %v2046_v22  ;;  %v2145_v18 = vmul.f32 1.442695, %v2137_v42  ;;  %v2143_v33 = vmul.f32 %v2135_v54, %v2031_v56  ;;  %v2144_v1 = vmul.f32 %v2136_v36, %v2032_v47 }
 0x5a2   : > { %4623 = vrcp.f32 %v2047_v2  ;;  %v2147_v19 = vmul.f32 1.442695, %v2138_v49  ;;  %v2149_v59 = vmul.f32 1.442695, %v2139_v23  ;;  %v5555_v5 = vadd.f32 %v5495_v31, %v1997_v63 }
 0x5a3   : > { %4625 = vrcp.f32 %v2048_v17  ;;  %v2153_v12 = vmul.f32 1.442695, %v2141_v7  ;;  %v2155_v24 = vmul.f32 1.442695, %v2142_v48  ;;  %v2157_v0 = vmul.f32 1.442695, %v2143_v33 }
 0x5a4   : > { %4627 = vpow2.f32 %v2145_v18  ;;  %v5559_v39 = vmul.f32 1.442695, %v2144_v1  ;;  %v5565_v56 = vmul.f32 0.5, %v5517_v28  ;;  %v5568_v31 = vmul.f32 0.70710677, %v5555_v5 }
 0x5a5   : > { %4629 = vpow2.f32 %v2147_v19  ;;  %v5574_v60 = vmul.f32 0.5, %v5520_v10  ;;  %v5577_v22 = vmul.f32 0.5, %v5505_v52  ;;  %v5580_v2 = vmul.f32 0.5, %v5508_v6 }
 0x5a6   : > { %4631 = vpow2.f32 %v2149_v59  ;;  %v2028_v35 = vand.u32 2147483647, %v5568_v31  ;;  %v5590_v52 = vmul.f32 0.5, %v5511_v27  ;;  %vm2177_vm10 = vcmp.ge.f32.partialorder %v5535_v40, 0.0 }
 0x5a7   : > { %v5557_v4 = vpop.eup %4613  ;;  %4633 = vpow2.f32 %v2153_v12  ;;  %vm2178_vm11 = vcmp.ge.f32.partialorder %v5538_v16, 0.0  ;;  %vm2179_vm12 = vcmp.ge.f32.partialorder %v5526_v51, 0.0  ;;  %vm2181_vm13 = vcmp.ge.f32.partialorder %v5529_v38, 0.0 }
 0x5a8   : > { %v5561_v29 = vpop.eup %4615  ;;  %v2057_v37 = vmul.f32 1.0614054, %v5557_v4  ;;  %4635 = vpow2.f32 %v2155_v24  ;;  %v2036_v42 = vmul.f32 0.3275911, %v2028_v35  ;;  %vm2182_vm14 = vcmp.ge.f32.partialorder %v5532_v50, 0.0 }
 0x5a9   : > { %v5570_v47 = vpop.eup %4617  ;;  %v2058_v32 = vmul.f32 1.0614054, %v5561_v29  ;;  %4637 = vpow2.f32 %v2157_v0  ;;  %vm2183_vm15 = vcmp.ge.f32.partialorder %v5541_v44, 0.0  ;;  %vm2184_vm1 = vcmp.ge.f32.partialorder %v5544_v58, 0.0 }
 0x5aa   : > { %v5582_v46 = vpop.eup %4619  ;;  %v2059_v28 = vmul.f32 1.0614054, %v5570_v47  ;;  %v2065_v17 = vadd.f32 -1.4531521, %v2057_v37  ;;  %v2044_v12 = vadd.f32 1.0, %v2036_v42  ;;  %v2208_v44 = vmul.f32 0.5, %v5523_v21 }
 0x5ab   : > { %v5586_v45 = vpop.eup %4621  ;;  %v2061_v9 = vmul.f32 1.0614054, %v5582_v46  ;;  %v2066_v10 = vadd.f32 -1.4531521, %v2058_v32  ;;  %vm2180_vm2 = vcmp.ge.f32.partialorder %v5568_v31, 0.0  ;;  %v4541_v31 = vld [vmem:[%s6036_s6 + $0x60] sm:$0xff]  }
 0x5ac   : > { %v5592_v41 = vpop.eup %4623  ;;  %v2062_v6 = vmul.f32 1.0614054, %v5586_v45  ;;  %v2067_v54 = vadd.f32 -1.4531521, %v2059_v28  ;;  %v2073_v36 = vmul.f32 %v5557_v4, %v2065_v17  ;;  %4639 = vrcp.f32 %v2044_v12 }
 0x5ad   : > { %v5596_v49 = vpop.eup %4625  ;;  %v2063_v23 = vmul.f32 1.0614054, %v5592_v41  ;;  %v2069_v63 = vadd.f32 -1.4531521, %v2061_v9  ;;  %v2074_v7 = vmul.f32 %v5561_v29, %v2066_v10  ;;  %4641 = vpow2.f32 %v5559_v39 }
 0x5ae   : > { %v2064_v48 = vmul.f32 1.0614054, %v5596_v49  ;;  %v2070_v27 = vadd.f32 -1.4531521, %v2062_v6  ;;  %v2075_v18 = vmul.f32 %v5570_v47, %v2067_v54  ;;  %v2081_v33 = vadd.f32 1.4214138, %v2073_v36  ;;  %v4628_v24 = vpop.eup %4627 }
 0x5af   : > { %v2071_v1 = vadd.f32 -1.4531521, %v2063_v23  ;;  %v2077_v19 = vmul.f32 %v5582_v46, %v2069_v63  ;;  %v2082_v59 = vadd.f32 1.4214138, %v2074_v7  ;;  %v4630_v9 = vpop.eup %4629 }
 0x5b0   : > { %v2072_v37 = vadd.f32 -1.4531521, %v2064_v48  ;;  %v2078_v32 = vmul.f32 %v5586_v45, %v2070_v27  ;;  %v2083_v28 = vadd.f32 1.4214138, %v2075_v18  ;;  %v2089_v17 = vmul.f32 %v5557_v4, %v2081_v33  ;;  %v4632_v54 = vpop.eup %4631 }
 0x5b1   : > { %v2079_v0 = vmul.f32 %v5592_v41, %v2071_v1  ;;  %v2085_v10 = vadd.f32 1.4214138, %v2077_v19  ;;  %v2090_v6 = vmul.f32 %v5561_v29, %v2082_v59  ;;  %v2132_v18 = vsub.f32 0.0, %v2028_v35  ;;  %v4634_v33 = vpop.eup %4633 }
 0x5b2   : > { %v2080_v36 = vmul.f32 %v5596_v49, %v2072_v37  ;;  %v2086_v23 = vadd.f32 1.4214138, %v2078_v32  ;;  %v2091_v42 = vmul.f32 %v5570_v47, %v2083_v28  ;;  %v2097_v63 = vadd.f32 -0.28449672, %v2089_v17  ;;  %v4636_v12 = vpop.eup %4635 }
 0x5b3   : > { %v2087_v7 = vadd.f32 1.4214138, %v2079_v0  ;;  %v2093_v48 = vmul.f32 %v5582_v46, %v2085_v10  ;;  %v2098_v27 = vadd.f32 -0.28449672, %v2090_v6  ;;  %v4638_v6 = vpop.eup %4637 }
 0x5b4   : > { %v2088_v3 = vadd.f32 1.4214138, %v2080_v36  ;;  %v2094_v1 = vmul.f32 %v5586_v45, %v2086_v23  ;;  %v2099_v19 = vadd.f32 -0.28449672, %v2091_v42  ;;  %v2105_v59 = vmul.f32 %v5557_v4, %v2097_v63 }
 0x5b5   : > { %v2095_v20 = vmul.f32 %v5592_v41, %v2087_v7  ;;  %v2101_v37 = vadd.f32 -0.28449672, %v2093_v48  ;;  %v2106_v32 = vmul.f32 %v5561_v29, %v2098_v27  ;;  %v2140_v63 = vmul.f32 %v2132_v18, %v2028_v35 }
 0x5b6   : > { %v2096_v28 = vmul.f32 %v5596_v49, %v2088_v3  ;;  %v2102_v17 = vadd.f32 -0.28449672, %v2094_v1  ;;  %v2107_v0 = vmul.f32 %v5570_v47, %v2099_v19  ;;  %v2113_v10 = vadd.f32 0.2548296, %v2105_v59 }
 0x5b7   : > { %v2103_v36 = vadd.f32 -0.28449672, %v2095_v20  ;;  %v2109_v23 = vmul.f32 %v5582_v46, %v2101_v37  ;;  %v2114_v42 = vadd.f32 0.2548296, %v2106_v32  ;;  %v5626_v20 = vmul.f32 0.5, %v5514_v25 }
 0x5b8   : > { %v2104_v7 = vadd.f32 -0.28449672, %v2096_v28  ;;  %v2110_v48 = vmul.f32 %v5586_v45, %v2102_v17  ;;  %v2115_v27 = vadd.f32 0.2548296, %v2107_v0  ;;  %v2121_v39 = vmul.f32 %v5557_v4, %v2113_v10  ;;  %v5631_v4 = vpop.eup %4639 }
 0x5b9   : > { %v2111_v3 = vmul.f32 %v5592_v41, %v2103_v36  ;;  %v2117_v1 = vadd.f32 0.2548296, %v2109_v23  ;;  %v2122_v19 = vmul.f32 %v5561_v29, %v2114_v42  ;;  %v2151_v29 = vmul.f32 1.442695, %v2140_v63 }
 0x5ba   : > { %v2112_v35 = vmul.f32 %v5596_v49, %v2104_v7  ;;  %v2118_v18 = vadd.f32 0.2548296, %v2110_v48  ;;  %v2123_v59 = vmul.f32 %v5570_v47, %v2115_v27  ;;  %v2161_v37 = vmul.f32 %v4628_v24, %v2121_v39  ;;  %v4642_v48 = vpop.eup %4641 }
 0x5bb   : > { %v2119_v32 = vadd.f32 0.2548296, %v2111_v3  ;;  %v2125_v28 = vmul.f32 %v5582_v46, %v2117_v1  ;;  %v2162_v17 = vmul.f32 %v4630_v9, %v2122_v19  ;;  %v2060_v42 = vmul.f32 1.0614054, %v5631_v4 }
 0x5bc   : > { %v2120_v0 = vadd.f32 0.2548296, %v2112_v35  ;;  %v2126_v25 = vmul.f32 %v5586_v45, %v2118_v18  ;;  %v2163_v10 = vmul.f32 %v4632_v54, %v2123_v59  ;;  %v2169_v36 = vsub.f32 1.0, %v2161_v37 }
 0x5bd   : > { %v2127_v47 = vmul.f32 %v5592_v41, %v2119_v32  ;;  %v2165_v24 = vmul.f32 %v4634_v33, %v2125_v28  ;;  %v2170_v23 = vsub.f32 1.0, %v2162_v17  ;;  %v2068_v39 = vadd.f32 -1.4531521, %v2060_v42 }
 0x5be   : > { %v2128_v46 = vmul.f32 %v5596_v49, %v2120_v0  ;;  %v2166_v9 = vmul.f32 %v4636_v12, %v2126_v25  ;;  %v2171_v7 = vsub.f32 1.0, %v2163_v10  ;;  %v2185_v63 = vsub.f32 0.0, %v2169_v36 }
 0x5bf   : > { %v2167_v27 = vmul.f32 %v4638_v6, %v2127_v47  ;;  %v2173_v45 = vsub.f32 1.0, %v2165_v24  ;;  %v2186_v54 = vsub.f32 0.0, %v2170_v23  ;;  %v2076_v38 = vmul.f32 %v5631_v4, %v2068_v39  ;;  %v4530_v39 = vld [vmem:[%s6036_s6] sm:$0xff]  }
 0x5c0   : > { %v2168_v3 = vmul.f32 %v4642_v48, %v2128_v46  ;;  %v2174_v1 = vsub.f32 1.0, %v2166_v9  ;;  %v2187_v19 = vsub.f32 0.0, %v2171_v7  ;;  %v2193_v41 = vsel %vm2177_vm10, %v2169_v36, %v2185_v63 }
 0x5c1   : > { %v2175_v33 = vsub.f32 1.0, %v2167_v27  ;;  %v2189_v35 = vsub.f32 0.0, %v2173_v45  ;;  %v2194_v18 = vsel %vm2178_vm11, %v2170_v23, %v2186_v54  ;;  %v2209_v49 = vadd.f32 1.0, %v2193_v41 }
 0x5c2   : > { %v2176_v12 = vsub.f32 1.0, %v2168_v3  ;;  %v2190_v59 = vsub.f32 0.0, %v2174_v1  ;;  %v2195_v6 = vsel %vm2179_vm12, %v2171_v7, %v2187_v19  ;;  %v2210_v37 = vadd.f32 1.0, %v2194_v18  ;;  %v4532_v19 = vld [vmem:[%s6036_s6 + $0x48] sm:$0xff]  }
 0x5c3   : > { %v2191_v32 = vsub.f32 0.0, %v2175_v33  ;;  %v2197_v28 = vsel %vm2181_vm13, %v2173_v45, %v2189_v35  ;;  %v2211_v17 = vadd.f32 1.0, %v2195_v6  ;;  %v5650_v40 = vmul.f32 %v2209_v49, %v5565_v56  ;;  %v4533_v49 = vld [vmem:[%s6036_s6 + $0x8] sm:$0xff]  }
 0x5c4   : > { %v2192_v0 = vsub.f32 0.0, %v2176_v12  ;;  %v2198_v16 = vsel %vm2182_vm14, %v2174_v1, %v2190_v59  ;;  %v2213_v25 = vadd.f32 1.0, %v2197_v28  ;;  %v5655_v10 = vmul.f32 %v2210_v37, %v5574_v60  ;;  %v4538_v37 = vld [vmem:[%s6036_s6 + $0x58] sm:$0xff]  }
 0x5c5   : > { %v2199_v51 = vsel %vm2183_vm15, %v2175_v33, %v2191_v32  ;;  %v2214_v36 = vadd.f32 1.0, %v2198_v16  ;;  %v5660_v47 = vmul.f32 %v2211_v17, %v5577_v22  ;;  %2225 = vst [vmem:[#allocation3 + $0x10] sm:$0xff] %v5650_v40  ;;  %v2084_v42 = vadd.f32 1.4214138, %v2076_v38 }
 0x5c6   : > { %v2200_v56 = vsel %vm2184_vm1, %v2176_v12, %v2192_v0  ;;  %v2215_v50 = vadd.f32 1.0, %v2199_v51  ;;  %v5667_v24 = vmul.f32 %v2213_v25, %v5580_v2  ;;  %v2381_v60 = vpack.c.bf16 %v5655_v10, %v5650_v40  ;;  %2226 = vst [vmem:[#allocation3 + $0x18] sm:$0xff] %v5655_v10  ;;  %v4535_v12 = vld [vmem:[%s6036_s6 + $0x50] sm:$0xff]   ;;  %v4539_v0 = vld [vmem:[%s6036_s6 + $0x18] sm:$0xff]   ;;  %v4544_v51 = vld [vmem:[%s6036_s6 + $0x68] sm:$0xff]  }
 0x5c7   : > { %v2216_v22 = vadd.f32 1.0, %v2200_v56  ;;  %v5674_v23 = vmul.f32 %v2214_v36, %v5590_v52  ;;  %2227 = vst [vmem:[#allocation3 + $0x20] sm:$0xff] %v5660_v47  ;;  %4643 = vpow2.f32 %v2151_v29  ;;  %v2092_v21 = vmul.f32 %v5631_v4, %v2084_v42 }
 0x5c8   : > { %v5678_v58 = vmul.f32 %v2215_v50, %v5626_v20  ;;  %2650 = vmatprep.mubr.bf16.mxu0 %v2381_v60  ;;  %2229 = vst [vmem:[#allocation3 + $0x30] sm:$0xff] %v5667_v24  ;;  %v2204_v28 = vmul.f32 0.5, %v5555_v5  ;;  %v4542_v5 = vld [vmem:[%s6036_s6 + $0x20] sm:$0xff]   ;;  %v4545_v50 = vld [vmem:[%s6036_s6 + $0x28] sm:$0xff]  }
 0x5c9   : > { %v5681_v2 = vmul.f32 %v2216_v22, %v2208_v44  ;;  %2230 = vst [vmem:[#allocation3 + $0x38] sm:$0xff] %v5674_v23  ;;  %v2100_v20 = vadd.f32 -0.28449672, %v2092_v21  ;;  %v4547_v44 = vld [vmem:[%s6036_s6 + $0x70] sm:$0xff]  }
 0x5ca   : > { %2231 = vst [vmem:[#allocation3 + $0x40] sm:$0xff] %v5678_v58  ;;  %v5688_v52 = vpack.c.bf16 %v5678_v58, %v5674_v23 }
 0x5cb   : > { %2232 = vst [vmem:[#allocation3 + $0x48] sm:$0xff] %v5681_v2  ;;  %v2108_v63 = vmul.f32 %v5631_v4, %v2100_v20 }
 0x5cc   : > { %v5691_v46 = vld [vmem:[#allocation3 + $0xf] sm:$0xff] }
 0x5cd   : > { %v5693_v9 = vld [vmem:[#allocation3 + $0x17] sm:$0xff]  ;;  %v2365_v29 = vmul.f32 %v5691_v46, %v4892_v55  ;;  %v2116_v3 = vadd.f32 0.2548296, %v2108_v63 }
 0x5ce   : > { %v5697_v7 = vld [vmem:[#allocation3 + $0x11] sm:$0xff]  ;;  %v2366_v48 = vmul.f32 %v5693_v9, %v4903_v61  ;;  %v5702_v27 = vld [vmem:[#allocation3 + $0x19] sm:$0xff] }
 0x5cf   : > { %v2397_v45 = vmul.f32 %v5697_v7, %v4968_v13  ;;  %v2398_v54 = vmul.f32 %v5702_v27, %v4981_v57  ;;  %v2124_v33 = vmul.f32 %v5631_v4, %v2116_v3  ;;  %v4536_v4 = vld [vmem:[%s6036_s6 + $0x10] sm:$0xff]   ;;  %v5746_v36 = vld [vmem:[#allocation3 + $0x1f] sm:$0xff] }
 0x5d0   : > { %v2373_v1 = vpack.c.bf16 %v2366_v48, %v2365_v29  ;;  %v5748_v38 = vld [vmem:[#allocation3 + $0x31] sm:$0xff]  ;;  %v2367_v60 = vmul.f32 %v5746_v36, %v5101_v53 }
 0x5d1   : > { %v2405_v41 = vpack.c.bf16 %v2398_v54, %v2397_v45  ;;  %v4644_v35 = vpop.eup %4643  ;;  %v5750_v56 = vld [vmem:[#allocation3 + $0x39] sm:$0xff]  ;;  %v2401_v21 = vmul.f32 %v5748_v38, %v5068_v15 }
 0x5d2   : > { %2651 = vmatmul.mubr.bf16.vlgmr.msra.gmra.mrb[48].mxu0 %v2373_v1  ;;  %v2164_v18 = vmul.f32 %v4644_v35, %v2124_v33  ;;  %v2402_v20 = vmul.f32 %v5750_v56, %v5099_v26  ;;  %v5779_v1 = vld [vmem:[#allocation3 + $0x37] sm:$0xff]  ;;  %v5784_v33 = vld [vmem:[#allocation3 + $0x41] sm:$0xff]  ;;  %v5786_v35 = vld [vmem:[#allocation3 + $0x49] sm:$0xff] }
 0x5d3   : > { %4268 = vmatprep.mubr.bf16.mxu1 %v2405_v41  ;;  %4077 = vmatpush3.bf16.msra.mxu0 %v4530_v39  ;;  %v4534_v39 = vld [vmem:[%s6036_s6 + $0x88] sm:$0xff]  }
 0x5d4   : > { %4078 = vmatprep.subr.bf16.mxu0 %v4532_v19  ;;  %v2172_v59 = vsub.f32 1.0, %v2164_v18  ;;  %v4548_v19 = vld [vmem:[%s6036_s6 + $0x30] sm:$0xff]   ;;  %v2407_v41 = vpack.c.bf16 %v2402_v20, %v2401_v21  ;;  %v4543_v21 = vld [vmem:[%s6036_s6 + $0xa0] sm:$0xff]   ;;  %v6050_v20 = vld [vmem:[#allocation6_spill] sm:$0xff] }
 0x5d6   : > { %v2188_v6 = vsub.f32 0.0, %v2172_v59 }
 0x5d7   : > { %4079 = vmatpush3.bf16.msra.mxu0 %v4533_v49  ;;  %v2383_v49 = vpack.c.bf16 %v5674_v23, %v5667_v24  ;;  %v2403_v23 = vmul.f32 %v5784_v33, %v5141_v62 }
 0x5d8   : > { %4080 = vmatprep.subr.bf16.mxu0 %v4535_v12  ;;  %v2196_v32 = vsel %vm2180_vm2, %v2172_v59, %v2188_v6  ;;  %v2273_v12 = vld [vmem:[#allocation3 + $0x9] sm:$0xff]  ;;  %v4550_v59 = vld [vmem:[%s6036_s6 + $0x78] sm:$0xff]   ;;  %v2370_v6 = vmul.f32 %v5779_v1, %v4950_v43 }
 0x5d9   : > { %v2212_v17 = vadd.f32 1.0, %v2196_v32  ;;  %v6049_v32 = vld [vmem:[#allocation5_spill] sm:$0xff] }
 0x5db   : > { %4081 = vmatpush3.bf16.msra.mxu0 %v4536_v4  ;;  %v5732_v16 = vmul.f32 %v2212_v17, %v2204_v28  ;;  %v4537_v4 = vld [vmem:[%s6036_s6 + $0x90] sm:$0xff]   ;;  %v2282_v17 = vmul.f32 %v5697_v7, %v4981_v57  ;;  %v4553_v7 = vld [vmem:[%s6036_s6 + $0x1c0] sm:$0xff]  }
 0x5dc   : > { %4082 = vmatprep.subr.bf16.mxu0 %v4538_v37  ;;  %v2404_v37 = vmul.f32 %v5786_v35, %v5139_v11 }
 0x5dd   : > { %v2382_v25 = vpack.c.bf16 %v5732_v16, %v5660_v47  ;;  %2228 = vst [vmem:[#allocation3 + $0x28] sm:$0xff] %v5732_v16 }
 0x5df   : > { %4083 = vmatpush3.bf16.msra.mxu0 %v4539_v0  ;;  %2658 = vmatprep.mubr.bf16.mxu0 %v2382_v25  ;;  %v4551_v0 = vld [vmem:[%s6036_s6 + $0x38] sm:$0xff]  }
 0x5e0   : > { %4084 = vmatprep.subr.bf16.mxu0 %v4541_v31  ;;  %v2408_v31 = vpack.c.bf16 %v2404_v37, %v2403_v23  ;;  %v4540_v25 = vld [vmem:[%s6036_s6 + $0x98] sm:$0xff]   ;;  %v4557_v23 = vld [vmem:[%s6036_s6 + $0x188] sm:$0xff]   ;;  %v2243_v37 = vmul.f32 %v5693_v9, %v5101_v53 }
 0x5e3   : > { %4085 = vmatpush3.bf16.msra.mxu0 %v4542_v5 }
 0x5e4   : > { %4086 = vmatprep.subr.bf16.mxu0 %v4544_v51  ;;  %v5760_v22 = vld [vmem:[#allocation3 + $0x21] sm:$0xff]  ;;  %v5762_v42 = vld [vmem:[#allocation3 + $0x29] sm:$0xff] }
 0x5e5   : > { %v5768_v29 = vld [vmem:[#allocation3 + $0x27] sm:$0xff]  ;;  %v2399_v63 = vmul.f32 %v5760_v22, %v4998_v34  ;;  %v2400_v48 = vmul.f32 %v5762_v42, %v5016_v30  ;;  %v5788_v18 = vld [vmem:[#allocation3 + $0x2f] sm:$0xff] }
 0x5e6   : > { %v2368_v45 = vmul.f32 %v5768_v29, %v4923_v8  ;;  %v2369_v28 = vmul.f32 %v5788_v18, %v6049_v32 }
 0x5e7   : > { %4087 = vmatpush3.bf16.msra.mxu0 %v4545_v50  ;;  %v2406_v54 = vpack.c.bf16 %v2400_v48, %v2399_v63  ;;  %v5816_v50 = vld [vmem:[#allocation3 + $0x3f] sm:$0xff]  ;;  %v6051_v48 = vld [vmem:[#allocation7_spill] sm:$0xff] }
 0x5e8   : > { %v2374_v3 = vpack.c.bf16 %v2368_v45, %v2367_v60  ;;  %4088 = vmatprep.subr.bf16.mxu0 %v4547_v44  ;;  %v2375_v5 = vpack.c.bf16 %v2370_v6, %v2369_v28  ;;  %v5818_v60 = vld [vmem:[#allocation3 + $0x47] sm:$0xff]  ;;  %v2384_v44 = vpack.c.bf16 %v5681_v2, %v5678_v58  ;;  %v2371_v63 = vmul.f32 %v5816_v50, %v6050_v20 }
 0x5e9   : > { %4269 = vmatmul.mubr.bf16.vlgmr.msra.gmra.mrb[8].mxu1 %v2406_v54  ;;  %v2372_v45 = vmul.f32 %v5818_v60, %v6051_v48  ;;  %v4546_v58 = vld [vmem:[%s6036_s6 + $0xa8] sm:$0xff]   ;;  %v2283_v28 = vmul.f32 %v5702_v27, %v4998_v34 }
 0x5ea   : > { %2659 = vmatmul.mubr.bf16.gmra.mrb[52].mxu0 %v2374_v3  ;;  %4277 = vmatpush3.bf16.msra.mxu1 %v5484_v14  ;;  %v2281_v14 = vmul.f32 %v2273_v12, %v4968_v13 }
 0x5eb   : > { %4272 = vmatprep.mubr.bf16.mxu1 %v2407_v41  ;;  %4278 = vmatprep.subr.bf16.mxu1 %v4534_v39  ;;  %v2376_v54 = vpack.c.bf16 %v2372_v45, %v2371_v63  ;;  %v2242_v41 = vmul.f32 %v5691_v46, %v4903_v61  ;;  %v5856_v46 = vpack.c.bf16 %v5660_v47, %v5655_v10  ;;  %v4555_v10 = vld [vmem:[%s6036_s6 + $0x200] sm:$0xff]   ;;  %v4559_v47 = vld [vmem:[%s6036_s6 + $0x1d0] sm:$0xff]  }
 0x5ec   : > { %2666 = vmatprep.mubr.bf16.mxu0 %v2383_v49  ;;  %4089 = vmatpush3.bf16.msra.mxu0 %v4548_v19  ;;  %v2289_v51 = vpack.c.bf16 %v2282_v17, %v2281_v14  ;;  %v4549_v19 = vld [vmem:[%s6036_s6 + $0xb0] sm:$0xff]   ;;  %v4647_v49 = vld [vmem:[#allocation3 + $0x7] sm:$0xff]  ;;  %v2284_v14 = vmul.f32 %v5760_v22, %v5016_v30  ;;  %v2244_v17 = vmul.f32 %v5746_v36, %v4923_v8 }
 0x5ed   : > { %4090 = vmatprep.subr.bf16.mxu0 %v4550_v59  ;;  %v2241_v12 = vmul.f32 %v4647_v49, %v4892_v55  ;;  %v4554_v59 = vld [vmem:[%s6036_s6 + $0x180] sm:$0xff]   ;;  %v2287_v63 = vmul.f32 %v5750_v56, %v5141_v62  ;;  %v5893_v45 = vpack.c.bf16 %v5667_v24, %v5732_v16  ;;  %v2246_v24 = vmul.f32 %v5788_v18, %v4950_v43 }
 0x5ee   : > { %4279 = vmatpush3.bf16.msra.mxu1 %v4534_v39  ;;  %v5835_v39 = vld [vmem:[#allocation3] sm:$0xff]  ;;  %v3070_v16 = vmul.f32 %v5702_v27, %v4968_v13 }
 0x5ef   : > { %4280 = vmatprep.subr.bf16.mxu1 %v4537_v4  ;;  %v2265_v3 = vpack.c.bf16 %v5650_v40, %v5835_v39  ;;  %v4552_v40 = vld [vmem:[%s6036_s6 + $0xb8] sm:$0xff]   ;;  %v2249_v6 = vpack.c.bf16 %v2242_v41, %v2241_v12  ;;  %v3071_v41 = vmul.f32 %v5760_v22, %v4981_v57  ;;  %v4565_v49 = vld [vmem:[%s6036_s6 + $0x1e0] sm:$0xff]   ;;  %v4568_v57 = vld [vmem:[%s6036_s6 + $0x1e8] sm:$0xff]  }
 0x5f0   : > { %4091 = vmatpush3.bf16.msra.mxu0 %v4551_v0  ;;  %v2285_v0 = vmul.f32 %v5762_v42, %v5068_v15  ;;  %v4566_v13 = vld [vmem:[%s6036_s6 + $0x1a0] sm:$0xff]  }
 0x5f1   : > { %4273 = vmatmul.mubr.bf16.gmra.mrb[12].mxu1 %v2408_v31  ;;  %4128 = vmatprep.subr.bf16.mxu0 %v4553_v7  ;;  %v2286_v31 = vmul.f32 %v5748_v38, %v5099_v26  ;;  %v4560_v7 = vld [vmem:[%s6036_s6 + $0x190] sm:$0xff]   ;;  %v3078_v27 = vpack.c.bf16 %v3071_v41, %v3070_v16  ;;  %v4567_v22 = vld [vmem:[%s6036_s6 + $0x220] sm:$0xff]  }
 0x5f2   : > { %2667 = vmatmul.mubr.bf16.gmra.mrb[56].mxu0 %v2375_v5  ;;  %4281 = vmatpush3.bf16.msra.mxu1 %v4537_v4  ;;  %v4556_v4 = vld [vmem:[%s6036_s6 + $0x1c8] sm:$0xff]  }
 0x5f3   : > { %4292 = vmatprep.mubr.bf16.mxu1 %v2289_v51  ;;  %4282 = vmatprep.subr.bf16.mxu1 %v4540_v25  ;;  %v4558_v5 = vld [vmem:[%s6036_s6 + $0x208] sm:$0xff]   ;;  %v2250_v51 = vpack.c.bf16 %v2244_v17, %v2243_v37  ;;  %v4571_v37 = vld [vmem:[%s6036_s6 + $0x1f0] sm:$0xff]  }
 0x5f4   : > { %2674 = vmatprep.mubr.bf16.mxu0 %v2384_v44  ;;  %v2291_v44 = vpack.c.bf16 %v2286_v31, %v2285_v0  ;;  %v4573_v17 = vld [vmem:[%s6036_s6 + $0x230] sm:$0xff]   ;;  %v4575_v0 = vld [vmem:[%s6036_s6 + $0x1b8] sm:$0xff]   ;;  %v3030_v31 = vmul.f32 %v5693_v9, %v4892_v55  ;;  %v3073_v55 = vmul.f32 %v5748_v38, %v5016_v30  ;;  %v3075_v9 = vmul.f32 %v5784_v33, %v5099_v26 }
 0x5f5   : > { %v3069_v30 = vld [vmem:[#allocation3 + $0x51] sm:$0xff]  ;;  %v3034_v26 = vmul.f32 %v5779_v1, %v6049_v32 }
 0x5f6   : > { %4283 = vmatpush3.bf16.msra.mxu1 %v4540_v25  ;;  %v2290_v25 = vpack.c.bf16 %v2284_v14, %v2283_v28  ;;  %v4570_v28 = vld [vmem:[%s6036_s6 + $0x228] sm:$0xff]  }
 0x5f7   : > { %4284 = vmatprep.subr.bf16.mxu1 %v4543_v21 }
 0x5fa   : > { %2675 = vmatmul.mubr.bf16.gmra.mrb[60].mxu0 %v2376_v54  ;;  %4285 = vmatpush3.bf16.msra.mxu1 %v4543_v21  ;;  %v4562_v21 = vld [vmem:[%s6036_s6 + $0x1d8] sm:$0xff]   ;;  %v4561_v54 = vld [vmem:[%s6036_s6 + $0x210] sm:$0xff]  }
 0x5fb   : > { %2924 = vmatprep.mubr.bf16.mxu0 %v2265_v3  ;;  %4286 = vmatprep.subr.bf16.mxu1 %v4546_v58  ;;  %v4563_v3 = vld [vmem:[%s6036_s6 + $0x198] sm:$0xff]  }
 0x5fe   : > { %4287 = vmatpush3.bf16.msra.mxu1 %v4546_v58  ;;  %v2288_v58 = vmul.f32 %v5784_v33, %v5139_v11  ;;  %v3029_v33 = vld [vmem:[#allocation3 + $0x4f] sm:$0xff] }
 0x5ff   : > { %4288 = vmatprep.subr.bf16.mxu1 %v4549_v19 }
 0x600   : > { %v2292_v12 = vpack.c.bf16 %v2288_v58, %v2287_v63 }
 0x602   : > { %2925 = vmatmul.mubr.bf16.vlgmr.msra.gmra.mrb[64].mxu0 %v2249_v6  ;;  %4289 = vmatpush3.bf16.msra.mxu1 %v4549_v19  ;;  %v2245_v19 = vmul.f32 %v5768_v29, %v6049_v32  ;;  %v4569_v6 = vld [vmem:[%s6036_s6 + $0x1a8] sm:$0xff]  }
 0x603   : > { %4129 = vmatpush3.bf16.msra.mxu0 %v4554_v59  ;;  %4290 = vmatprep.subr.bf16.mxu1 %v4552_v40  ;;  %v4564_v59 = vld [vmem:[%s6036_s6 + $0x218] sm:$0xff]  }
 0x604   : > { %2932 = vmatprep.mubr.bf16.mxu0 %v5856_v46  ;;  %4130 = vmatprep.subr.bf16.mxu0 %v4556_v4  ;;  %v2247_v4 = vmul.f32 %v5779_v1, %v6050_v20 }
 0x606   : > { %4291 = vmatpush3.bf16.msra.mxu1 %v4552_v40  ;;  %v2251_v40 = vpack.c.bf16 %v2246_v24, %v2245_v19 }
 0x607   : > { %4131 = vmatpush3.bf16.msra.mxu0 %v4557_v23  ;;  %4300 = vmatprep.subr.bf16.mxu1 %v4555_v10  ;;  %v2248_v23 = vmul.f32 %v5816_v50, %v6051_v48 }
 0x608   : > { %4132 = vmatprep.subr.bf16.mxu0 %v4559_v47  ;;  %v4574_v47 = vld [vmem:[%s6036_s6 + $0x1f8] sm:$0xff]  }
 0x609   : > { %4293 = vmatmul.mubr.bf16.vlgmr.msra.gmra.mrb[8].mxu1 %v2290_v25  ;;  %v2252_v14 = vpack.c.bf16 %v2248_v23, %v2247_v4  ;;  %v3031_v25 = vmul.f32 %v5746_v36, %v4903_v61  ;;  %v3074_v61 = vmul.f32 %v5750_v56, %v5068_v15  ;;  %v3032_v36 = vmul.f32 %v5768_v29, %v5101_v53 }
 0x60a   : > { %2933 = vmatmul.mubr.bf16.gmra.mrb[68].mxu0 %v2250_v51  ;;  %4296 = vmatprep.mubr.bf16.mxu1 %v2291_v44  ;;  %v3072_v51 = vmul.f32 %v5762_v42, %v4998_v34  ;;  %v3076_v15 = vmul.f32 %v5786_v35, %v5141_v62  ;;  %v3035_v53 = vmul.f32 %v5816_v50, %v4950_v43 }
 0x60b   : > { %4301 = vmatpush3.bf16.msra.mxu1 %v4555_v10  ;;  %4133 = vmatpush3.bf16.msra.mxu0 %v4560_v7  ;;  %v4572_v10 = vld [vmem:[%s6036_s6 + $0x1b0] sm:$0xff]   ;;  %v3033_v7 = vmul.f32 %v5788_v18, %v4923_v8  ;;  %v3080_v34 = vpack.c.bf16 %v3075_v9, %v3074_v61  ;;  %v3077_v8 = vmul.f32 %v3069_v30, %v5139_v11 }
 0x60c   : > { %4302 = vmatprep.subr.bf16.mxu1 %v4558_v5  ;;  %2940 = vmatprep.mubr.bf16.mxu0 %v5893_v45  ;;  %v3079_v44 = vpack.c.bf16 %v3073_v55, %v3072_v51  ;;  %v3040_v56 = vpack.c.bf16 %v3035_v53, %v3034_v26  ;;  %v3057_v29 = vpack.c.bf16 %v5835_v39, %v5681_v2 }
 0x60d   : > { %4134 = vmatprep.subr.bf16.mxu0 %v4562_v21  ;;  %v3039_v42 = vpack.c.bf16 %v3033_v7, %v3032_v36  ;;  %v3081_v38 = vpack.c.bf16 %v3077_v8, %v3076_v15  ;;  %v3036_v62 = vmul.f32 %v5818_v60, %v6050_v20 }
 0x60f   : > { %4303 = vmatpush3.bf16.msra.mxu1 %v4558_v5  ;;  %4135 = vmatpush3.bf16.msra.mxu0 %v4563_v3  ;;  %v3038_v5 = vpack.c.bf16 %v3031_v25, %v3030_v31 }
 0x610   : > { %4304 = vmatprep.subr.bf16.mxu1 %v4561_v54  ;;  %4136 = vmatprep.subr.bf16.mxu0 %v4565_v49 }
 0x611   : > { %4297 = vmatmul.mubr.bf16.gmra.mrb[12].mxu1 %v2292_v12 }
 0x612   : > { %2941 = vmatmul.mubr.bf16.gmra.mrb[72].mxu0 %v2251_v40  ;;  %4316 = vmatprep.mubr.bf16.mxu1 %v3078_v27 }
 0x613   : > { %4305 = vmatpush3.bf16.msra.mxu1 %v4561_v54  ;;  %4137 = vmatpush3.bf16.msra.mxu0 %v4566_v13 }
 0x614   : > { %4306 = vmatprep.subr.bf16.mxu1 %v4564_v59  ;;  %2948 = vmatprep.mubr.bf16.mxu0 %v5688_v52 }
 0x615   : > { %4138 = vmatprep.subr.bf16.mxu0 %v4568_v57 }
 0x617   : > { %4307 = vmatpush3.bf16.msra.mxu1 %v4564_v59  ;;  %4139 = vmatpush3.bf16.msra.mxu0 %v4569_v6 }
 0x618   : > { %4308 = vmatprep.subr.bf16.mxu1 %v4567_v22  ;;  %4140 = vmatprep.subr.bf16.mxu0 %v4571_v37 }
 0x61a   : > { %2949 = vmatmul.mubr.bf16.gmra.mrb[76].mxu0 %v2252_v14 }
 0x61b   : > { %4309 = vmatpush3.bf16.msra.mxu1 %v4567_v22  ;;  %3323 = vmatprep.mubr.bf16.mxu0 %v5856_v46  ;;  %v4576_v46 = vld [vmem:[%s6036_s6 + $0x238] sm:$0xff]  }
 0x61c   : > { %4310 = vmatprep.subr.bf16.mxu1 %v4570_v28  ;;  %4141 = vmatpush3.bf16.msra.mxu0 %v4572_v10 }
 0x61d   : > { %4142 = vmatprep.subr.bf16.mxu0 %v4574_v47 }
 0x61f   : > { %4311 = vmatpush3.bf16.msra.mxu1 %v4570_v28 }
 0x620   : > { %4312 = vmatprep.subr.bf16.mxu1 %v4573_v17  ;;  %4143 = vmatpush3.bf16.msra.mxu0 %v4575_v0 }
 0x623   : > { %4313 = vmatpush3.bf16.msra.mxu1 %v4573_v17  ;;  %3324 = vmatmul.mubr.bf16.vlgmr.msra.gmra.mrb[80].mxu0 %v3038_v5 }
 0x624   : > { %4314 = vmatprep.subr.bf16.mxu1 %v4576_v46  ;;  %3331 = vmatprep.mubr.bf16.mxu0 %v5893_v45 }
 0x627   : > { %4315 = vmatpush3.bf16.msra.mxu1 %v4576_v46 }
 0x62a   : > { %4317 = vmatmul.mubr.bf16.vlgmr.msra.gmra.mrb[8].mxu1 %v3079_v44 }
 0x62b   : > { %4320 = vmatprep.mubr.bf16.mxu1 %v3080_v34  ;;  %3332 = vmatmul.mubr.bf16.gmra.mrb[84].mxu0 %v3039_v42 }
 0x62c   : > { %3339 = vmatprep.mubr.bf16.mxu0 %v5688_v52  ;;  %v3037_v52 = vmul.f32 %v3029_v33, %v6051_v48 }
 0x62e   : > { %v3041_v1 = vpack.c.bf16 %v3037_v52, %v3036_v62 }
 0x632   : > { %4321 = vmatmul.mubr.bf16.gmra.mrb[12].mxu1 %v3081_v38 }
 0x633   : > { %3340 = vmatmul.mubr.bf16.gmra.mrb[88].mxu0 %v3040_v56 }
 0x634   : > { %3347 = vmatprep.mubr.bf16.mxu0 %v3057_v29 }
 0x63b   : > { %3348 = vmatmul.mubr.bf16.gmra.mrb[92].mxu0 %v3041_v1 }
 0x6a5   : > { %v4040_v35 = vpop.f32.mrb[48].mxu0 }
 0x6a6   : > { %v4041_v43 = vpop.f32.mrb[49].mxu0 }
 0x6a7   : > { %v4042_v18 = vadd.f32 %v4041_v43, %v4040_v35  ;;  %v4043_v11 = vpop.f32.mrb[50].mxu0 }
 0x6a8   : > { %v4044_v32 = vpop.f32.mrb[51].mxu0 }
 0x6a9   : > { %v4045_v50 = vadd.f32 %v4044_v32, %v4043_v11 }
 0x6bd   : > { %v4046_v21 = vpop.f32.mrb[52].mxu0 }
 0x6be   : > { %v4047_v63 = vpop.f32.mrb[53].mxu0 }
 0x6bf   : > { %v4048_v45 = vadd.f32 %v4047_v63, %v4046_v21  ;;  %v4049_v2 = vpop.f32.mrb[54].mxu0 }
 0x6c0   : > { %v4050_v39 = vpop.f32.mrb[55].mxu0 }
 0x6c1   : > { %v4051_v58 = vadd.f32 %v4050_v39, %v4049_v2 }
 0x6c5   : > { %v4052_v54 = vpop.f32.mrb[56].mxu0 }
 0x6c6   : > { %v4053_v3 = vpop.f32.mrb[57].mxu0 }
 0x6c7   : > { %v4054_v19 = vadd.f32 %v4053_v3, %v4052_v54  ;;  %v4055_v60 = vpop.f32.mrb[58].mxu0 }
 0x6c8   : > { %v4056_v20 = vpop.f32.mrb[59].mxu0 }
 0x6c9   : > { %v4057_v48 = vadd.f32 %v4056_v20, %v4055_v60 }
 0x6cd   : > { %v4058_v24 = vpop.f32.mrb[60].mxu0 }
 0x6ce   : > { %v4059_v16 = vpop.f32.mrb[61].mxu0 }
 0x6cf   : > { %v4060_v41 = vadd.f32 %v4059_v16, %v4058_v24  ;;  %v4061_v49 = vpop.f32.mrb[62].mxu0  ;;  %v3431_v24 = vld [vmem:[%s4726_s11 + $0x10] sm:$0xff] }
 0x6d0   : > { %v4062_v12 = vpop.f32.mrb[63].mxu0 }
 0x6d1   : > { %v4063_v59 = vadd.f32 %v4062_v12, %v4061_v49 }
 0x6d5   : > { %v4092_v40 = vpop.f32.mrb[64].mxu0 }
 0x6d6   : > { %v4093_v13 = vpop.f32.mrb[65].mxu0 }
 0x6d7   : > { %v4094_v27 = vadd.f32 %v4093_v13, %v4092_v40  ;;  %v4095_v57 = vpop.f32.mrb[66].mxu0 }
 0x6d8   : > { %v4096_v22 = vpop.f32.mrb[67].mxu0 }
 0x6d9   : > { %v4351_v6 = vadd.f32 %v4094_v27, %v4042_v18  ;;  %v4097_v4 = vadd.f32 %v4096_v22, %v4095_v57  ;;  %v3429_v18 = vld [vmem:[%s4726_s11] sm:$0xff] }
 0x6db   : > { %v4357_v23 = vadd.f32 %v4097_v4, %v4045_v50 }
 0x6dd   : > { %v4098_v37 = vpop.f32.mrb[68].mxu0 }
 0x6de   : > { %v4099_v28 = vpop.f32.mrb[69].mxu0 }
 0x6df   : > { %v4100_v14 = vadd.f32 %v4099_v28, %v4098_v37  ;;  %v4101_v10 = vpop.f32.mrb[70].mxu0 }
 0x6e0   : > { %v4102_v47 = vpop.f32.mrb[71].mxu0 }
 0x6e1   : > { %v4348_v17 = vadd.f32 %v4100_v14, %v4048_v45  ;;  %v4103_v0 = vadd.f32 %v4102_v47, %v4101_v10  ;;  %v3430_v45 = vld [vmem:[%s4726_s11 + $0x8] sm:$0xff] }
 0x6e3   : > { %v4354_v31 = vadd.f32 %v4103_v0, %v4051_v58 }
 0x6e5   : > { %v4104_v25 = vpop.f32.mrb[72].mxu0 }
 0x6e6   : > { %v4105_v46 = vpop.f32.mrb[73].mxu0 }
 0x6e7   : > { %v4106_v5 = vadd.f32 %v4105_v46, %v4104_v25  ;;  %v4107_v51 = vpop.f32.mrb[74].mxu0 }
 0x6e8   : > { %v4108_v55 = vpop.f32.mrb[75].mxu0 }
 0x6e9   : > { %v4363_v61 = vadd.f32 %v4106_v5, %v4054_v19  ;;  %v4109_v9 = vadd.f32 %v4108_v55, %v4107_v51  ;;  %v3434_v5 = vld [vmem:[%s4726_s11 + $0x28] sm:$0xff] }
 0x6eb   : > { %v5987_v36 = vadd.f32 %v4109_v9, %v4057_v48 }
 0x6ed   : > { %v4110_v7 = vpop.f32.mrb[76].mxu0 }
 0x6ee   : > { %v4111_v44 = vpop.f32.mrb[77].mxu0 }
 0x6ef   : > { %v4112_v34 = vadd.f32 %v4111_v44, %v4110_v7  ;;  %v4113_v42 = vpop.f32.mrb[78].mxu0 }
 0x6f0   : > { %v4114_v30 = vpop.f32.mrb[79].mxu0 }
 0x6f1   : > { %v5989_v15 = vadd.f32 %v4112_v34, %v4060_v41  ;;  %v4115_v26 = vadd.f32 %v4114_v30, %v4113_v42 }
 0x6f3   : > { %v5991_v53 = vadd.f32 %v4115_v26, %v4063_v59  ;;  %v3432_v59 = vld [vmem:[%s4726_s11 + $0x18] sm:$0xff] }
 0x6f6   : > { %v4144_v8 = vpop.f32.mrb[80].mxu0 }
 0x6f7   : > { %v4145_v38 = vpop.f32.mrb[81].mxu0 }
 0x6f8   : > { %v4146_v56 = vadd.f32 %v4145_v38, %v4144_v8  ;;  %v4147_v29 = vpop.f32.mrb[82].mxu0  ;;  %v3435_v38 = vld [vmem:[%s4726_s11 + $0x30] sm:$0xff] }
 0x6f9   : > { %v4148_v33 = vpop.f32.mrb[83].mxu0 }
 0x6fa   : > { %v4352_v62 = vadd.f32 %v4351_v6, %v4146_v56  ;;  %v4149_v52 = vadd.f32 %v4148_v33, %v4147_v29  ;;  %v3436_v33 = vld [vmem:[%s4726_s11 + $0x38] sm:$0xff] }
 0x6fc   : > { %v4358_v1 = vadd.f32 %v4357_v23, %v4149_v52 }
 0x6fd   : > { %v4318_v35 = vpop.f32.mrb[8].mxu1 }
 0x6fe   : > { %v3390_v43 = vpop.f32.mrb[9].mxu1  ;;  %v4150_v11 = vpop.f32.mrb[84].mxu0 }
 0x6ff   : > { %v4353_v32 = vadd.f32 %v4352_v62, %v3390_v43  ;;  %v4319_v50 = vpop.f32.mrb[10].mxu1  ;;  %v4151_v21 = vpop.f32.mrb[85].mxu0 }
 0x700   : > { %v3393_v63 = vpop.f32.mrb[11].mxu1  ;;  %v4152_v2 = vadd.f32 %v4151_v21, %v4150_v11  ;;  %v4153_v39 = vpop.f32.mrb[86].mxu0 }
 0x701   : > { %v3437_v58 = vadd.f32 %v4353_v32, %v3429_v18  ;;  %v4359_v54 = vadd.f32 %v4358_v1, %v3393_v63  ;;  %v4154_v3 = vpop.f32.mrb[87].mxu0 }
 0x702   : > { %v4349_v19 = vadd.f32 %v4348_v17, %v4152_v2  ;;  %v4155_v60 = vadd.f32 %v4154_v3, %v4153_v39 }
 0x703   : > { %v3445_v20 = vmul.f32 0.70710677, %v3437_v58  ;;  %v3438_v48 = vadd.f32 %v4359_v54, %v3430_v45 }
 0x704   : > { %v4350_v16 = vadd.f32 %v4349_v19, %v4318_v35  ;;  %v4355_v41 = vadd.f32 %v4354_v31, %v4155_v60  ;;  %v3433_v31 = vld [vmem:[%s4726_s11 + $0x20] sm:$0xff] }
 0x705   : > { %3453 = vst.msk [vmem:[%s6000_s14] sm:$0xff] %vm323_vm0, %v3445_v20  ;;  %v3446_v49 = vmul.f32 0.70710677, %v3438_v48  ;;  %v4322_v12 = vpop.f32.mrb[12].mxu1 }
 0x706   : > { %v3439_v40 = vadd.f32 %v4350_v16, %v3431_v24  ;;  %v3406_v13 = vpop.f32.mrb[13].mxu1  ;;  %v4356_v27 = vadd.f32 %v4355_v41, %v4319_v50  ;;  %v4156_v57 = vpop.f32.mrb[88].mxu0 }
 0x707   : > { %3454 = vst.msk [vmem:[%s6000_s14 + $0x8] sm:$0xff] %vm323_vm0, %v3446_v49  ;;  %v4323_v22 = vpop.f32.mrb[14].mxu1  ;;  %v4157_v6 = vpop.f32.mrb[89].mxu0 }
 0x708   : > { %v3447_v4 = vmul.f32 0.70710677, %v3439_v40  ;;  %v3440_v23 = vadd.f32 %v4356_v27, %v3432_v59  ;;  %v3409_v37 = vpop.f32.mrb[15].mxu1  ;;  %v4158_v28 = vadd.f32 %v4157_v6, %v4156_v57  ;;  %v4159_v14 = vpop.f32.mrb[90].mxu0 }
 0x709   : > { %v4160_v10 = vpop.f32.mrb[91].mxu0 }
 0x70a   : > { %3455 = vst.msk [vmem:[%s6000_s14 + $0x10] sm:$0xff] %vm323_vm0, %v3447_v4  ;;  %v3448_v47 = vmul.f32 0.70710677, %v3440_v23  ;;  %v4364_v17 = vadd.f32 %v4363_v61, %v4158_v28  ;;  %v4161_v0 = vadd.f32 %v4160_v10, %v4159_v14 }
 0x70c   : > { %3456 = vst.msk [vmem:[%s6000_s14 + $0x18] sm:$0xff] %vm323_vm0, %v3448_v47  ;;  %v4365_v25 = vadd.f32 %v4364_v17, %v3406_v13  ;;  %v4370_v46 = vadd.f32 %v5987_v36, %v4161_v0 }
 0x70e   : > { %v3441_v51 = vadd.f32 %v4365_v25, %v3433_v31  ;;  %v4371_v55 = vadd.f32 %v4370_v46, %v3409_v37  ;;  %v4162_v9 = vpop.f32.mrb[92].mxu0 }
 0x70f   : > { %v4163_v7 = vpop.f32.mrb[93].mxu0 }
 0x710   : > { %v3449_v44 = vmul.f32 0.70710677, %v3441_v51  ;;  %v3442_v34 = vadd.f32 %v4371_v55, %v3434_v5  ;;  %v4164_v42 = vadd.f32 %v4163_v7, %v4162_v9  ;;  %v4165_v61 = vpop.f32.mrb[94].mxu0 }
 0x711   : > { %v4166_v30 = vpop.f32.mrb[95].mxu0 }
 0x712   : > { %3457 = vst.msk [vmem:[%s6000_s14 + $0x20] sm:$0xff] %vm323_vm0, %v3449_v44  ;;  %v3450_v26 = vmul.f32 0.70710677, %v3442_v34  ;;  %v4361_v8 = vadd.f32 %v5989_v15, %v4164_v42  ;;  %v4167_v36 = vadd.f32 %v4166_v30, %v4165_v61 }
 0x714   : > { %3458 = vst.msk [vmem:[%s6000_s14 + $0x28] sm:$0xff] %vm323_vm0, %v3450_v26  ;;  %v4362_v56 = vadd.f32 %v4361_v8, %v4322_v12  ;;  %v4367_v29 = vadd.f32 %v5991_v53, %v4167_v36 }
 0x716   : > { %v3443_v62 = vadd.f32 %v4362_v56, %v3435_v38  ;;  %v4368_v52 = vadd.f32 %v4367_v29, %v4323_v22 }
 0x718   : > { %v3451_v1 = vmul.f32 0.70710677, %v3443_v62  ;;  %v3444_v35 = vadd.f32 %v4368_v52, %v3436_v33 }
 0x71a   : > { %3459 = vst.msk [vmem:[%s6000_s14 + $0x30] sm:$0xff] %vm323_vm0, %v3451_v1  ;;  %v3452_v43 = vmul.f32 0.70710677, %v3444_v35 }
 0x71c   : > { %3460 = vst.msk [vmem:[%s6000_s14 + $0x38] sm:$0xff] %vm323_vm0, %v3452_v43 }
 0x71d PF: > { %s18_s27 = sadd.s32 1, %s4654_s27  }
 0x71e   : > { %p15_p4 = scmp.ge.s32.totalorder %s18_s27, 4  }
 0x720   :  { %17 = sbr.rel (!%p15_p4) target bundleno = 1 (0x1), region = 86 }

</bundles_post_ra>
